<compile_context>
chip_gen: v5e
topology: v5e:2x2
jax: 0.10.0
libtpu: 0.0.40
codegen_flags: <defaults>
</compile_context>

<pallas_src>
import math
import functools

import jax
import jax.numpy as jnp
from jax.experimental import pallas as pl
from jax.experimental.pallas import tpu as pltpu


ACT_DTYPE = jnp.bfloat16   # intermediate activations & weights fed to the MXU
LN_EPS = 1e-5


# -----------------------------------------------------------------------------
# helpers
# -----------------------------------------------------------------------------
def _round_up(x, m):
    return (x + m - 1) // m * m


@functools.lru_cache(maxsize=None)
def _tpu_config():
    """Generation-keyed tile table.

    v5e/v6e have 128 MiB VMEM; v7x has 64 MiB per TensorCore (and 2 TCs), so
    the VMEM limit and N tile are capped there instead of copying v6e's config.
    """
    try:
        kind = jax.devices()[0].device_kind.lower()
    except Exception:
        kind = ""
    if "v7" in kind:
        return dict(tm=256, tn=256, tk=1024, vmem=48 * 1024 * 1024)
    return dict(tm=256, tn=512, tk=1024, vmem=64 * 1024 * 1024)


# -----------------------------------------------------------------------------
# Pallas fused dense kernel
# -----------------------------------------------------------------------------
def _dense_kernel(*refs, has_ln, has_bias, has_res, activation, l2_norm):
    """Tiled matmul with fused LayerNorm prologue and epilogue.

    refs = (a, w, [ln_gamma, ln_beta], [bias], [res], out, acc_scratch)
    """
    it = iter(refs)
    a_ref = next(it)
    w_ref = next(it)
    g_ref = next(it) if has_ln else None
    lb_ref = next(it) if has_ln else None
    bias_ref = next(it) if has_bias else None
    res_ref = next(it) if has_res else None
    o_ref = next(it)
    acc_ref = next(it)

    @pl.when(pl.program_id(2) == 0)
    def _():
        acc_ref[...] = jnp.zeros_like(acc_ref)

    if has_ln:
        # LayerNorm fused into the matmul prologue.  Stats in f32 over the
        # true (un-padded) K dim -- only enabled when there is a single K step.
        x = a_ref[...].astype(jnp.float32)
        mu = jnp.mean(x, axis=-1, keepdims=True)
        var = jnp.mean(jnp.square(x - mu), axis=-1, keepdims=True)
        x = (x - mu) * jax.lax.rsqrt(var + LN_EPS)
        x = x * g_ref[...].astype(jnp.float32) + lb_ref[...].astype(jnp.float32)
        x = x.astype(w_ref.dtype)            # bf16 back into the MXU
    else:
        x = a_ref[...]

    acc_ref[...] += jnp.dot(x, w_ref[...], preferred_element_type=jnp.float32)

    @pl.when(pl.program_id(2) == pl.num_programs(2) - 1)
    def _():
        y = acc_ref[...]
        if has_bias:
            y = y + bias_ref[...].astype(jnp.float32)
        if activation == "gelu":
            # TODO(synk): tanh-approx GELU (EUP friendly); switch to
            # jax.nn.gelu(y, approximate=False) for exact-erf parity with
            # torch.nn.GELU if bit-level parity matters.
            y = jax.nn.gelu(y)
        if has_res:
            y = y + res_ref[...].astype(jnp.float32)
        if l2_norm:
            # Padded output columns are exactly zero (zero-padded W, no bias),
            # so the row norm over the padded width equals the true norm.
            y = y * jax.lax.rsqrt(
                jnp.maximum(jnp.sum(y * y, axis=-1, keepdims=True), 1e-30))
        o_ref[...] = y.astype(o_ref.dtype)


def pallas_dense(x, w, b=None, *, ln=None, activation=None, residual=None,
                 l2_norm=False, out_dtype=None, n_out=None):
    """y = act(LN(x) @ w + b) [+ residual] [row-L2-normalized].

    `w` is stored (K, Np) with N pre-padded to a multiple of 128 (see
    init_params) and in bf16; `b` is (1, Np) f32.  MXU operands are bf16,
    accumulation and epilogue are f32; output dtype is `out_dtype`
    (bf16 by default for intermediate activations).
    """
    cfg = _tpu_config()
    lead = x.shape[:-1]
    K = x.shape[-1]
    assert K == w.shape[0], (K, w.shape)
    Np = w.shape[-1]
    n_out = Np if n_out is None else n_out
    out_dtype = ACT_DTYPE if out_dtype is None else out_dtype

    # ---- N tiling (weights pre-padded, Np % 128 == 0 in practice) ----
    if Np <= cfg["tn"]:
        tn = Np
    else:
        tn = cfg["tn"]
        while Np % tn:
            tn //= 2
    n_j = Np // tn

    if l2_norm and n_j != 1:
        # TODO(synk): embed dim wider than one N tile -> normalize outside.
        y = pallas_dense(x, w, b, ln=ln, activation=activation,
                         residual=residual, l2_norm=False,
                         out_dtype=jnp.float32, n_out=n_out)
        y = y * jax.lax.rsqrt(
            jnp.maximum(jnp.sum(y * y, axis=-1, keepdims=True), 1e-30))
        return y.astype(out_dtype)

    a = x.reshape(-1, K).astype(w.dtype)
    M = a.shape[0]

    # ---- M tiling (16-row alignment: bf16 sublane-pack safe) ----
    if M <= cfg["tm"]:
        Mp = _round_up(M, 16)
        tm = Mp
        # v7x megacore heuristic: keep >= 2 blocks on the parallel grid axes so
        # both TensorCores get work; harmless (one extra step) on 1-TC chips.
        if n_j == 1 and Mp >= 64 and Mp % 32 == 0:
            tm = Mp // 2
    else:
        tm = cfg["tm"]
        Mp = _round_up(M, tm)

    # ---- K tiling: full-extent (un-padded) K block whenever it fits ----
    if K <= cfg["tk"]:
        tk, Kp = K, K
    else:
        tk = cfg["tk"]
        Kp = _round_up(K, tk)
    n_k = Kp // tk

    has_ln = ln is not None and n_k == 1
    if ln is not None and not has_ln:
        # TODO(synk): K tiled across grid steps -> LayerNorm outside the kernel.
        g, lb = ln
        xf = a.astype(jnp.float32)
        mu = jnp.mean(xf, axis=-1, keepdims=True)
        var = jnp.mean(jnp.square(xf - mu), axis=-1, keepdims=True)
        a = ((xf - mu) * jax.lax.rsqrt(var + LN_EPS) * g + lb).astype(w.dtype)

    a_p = a if (Mp == M and Kp == K) else jnp.pad(a, ((0, Mp - M), (0, Kp - K)))
    w_p = w if Kp == K else jnp.pad(w, ((0, Kp - K), (0, 0)))

    operands = [a_p, w_p]
    in_specs = [pl.BlockSpec((tm, tk), lambda i, j, k: (i, k)),
                pl.BlockSpec((tk, tn), lambda i, j, k: (k, j))]
    if has_ln:
        g, lb = ln
        operands += [g.reshape(1, K).astype(jnp.float32),
                     lb.reshape(1, K).astype(jnp.float32)]
        in_specs += [pl.BlockSpec((1, K), lambda i, j, k: (0, 0)),
                     pl.BlockSpec((1, K), lambda i, j, k: (0, 0))]
    has_bias = b is not None
    if has_bias:
        operands.append(b)                               # (1, Np) f32, pre-padded
        in_specs.append(pl.BlockSpec((1, tn), lambda i, j, k: (0, j)))
    has_res = residual is not None
    if has_res:
        r = residual.reshape(-1, residual.shape[-1])
        r_p = jnp.pad(r, ((0, Mp - M), (0, Np - r.shape[-1])))
        operands.append(r_p)
        in_specs.append(pl.BlockSpec((tm, tn), lambda i, j, k: (i, j)))

    kernel = functools.partial(_dense_kernel, has_ln=has_ln, has_bias=has_bias,
                               has_res=has_res, activation=activation,
                               l2_norm=l2_norm)

    a_item = jnp.dtype(a_p.dtype).itemsize
    o_item = jnp.dtype(out_dtype).itemsize
    bytes_accessed = Mp * Kp * a_item + Kp * Np * a_item + Mp * Np * o_item
    if has_ln:
        bytes_accessed += 2 * K * 4
    if has_bias:
        bytes_accessed += Np * 4
    if has_res:
        bytes_accessed += Mp * Np * jnp.dtype(residual.dtype).itemsize
    cost = pl.CostEstimate(
        flops=2 * Mp * Np * Kp,
        transcendentals=Mp * Np if activation == "gelu" else 0,
        bytes_accessed=bytes_accessed)

    out = pl.pallas_call(
        kernel,
        out_shape=jax.ShapeDtypeStruct((Mp, Np), out_dtype),
        grid=(Mp // tm, n_j, n_k),
        in_specs=in_specs,
        out_specs=pl.BlockSpec((tm, tn), lambda i, j, k: (i, j)),
        scratch_shapes=[pltpu.VMEM((tm, tn), jnp.float32)],
        compiler_params=pltpu.CompilerParams(
            dimension_semantics=("parallel", "parallel", "arbitrary"),
            vmem_limit_bytes=cfg["vmem"]),
        cost_estimate=cost,
    )(*operands)

    return out[:M, :n_out].reshape(lead + (n_out,))


# -----------------------------------------------------------------------------
# CLIP head: tiled projection + L2-normalize, then tiled logits matmul
# -----------------------------------------------------------------------------
def clip_head(img_feat, txt_feat, w_me, logit_scale):
    B, E = img_feat.shape
    # Shared multimodal projection + L2 normalize, both modalities in one pass.
    feats = jnp.concatenate([img_feat, txt_feat], axis=0)          # (2B, E) f32
    proj = pallas_dense(feats, w_me, None, l2_norm=True,
                        out_dtype=jnp.float32, n_out=E)            # (2B, E) f32
    img_n, txt_n = proj[:B], proj[B:]

    # Tiled (B_i, B_j) logits matmul (bf16 operands, f32 accumulation).
    rhs = jnp.pad(txt_n.T, ((0, 0), (0, _round_up(B, 128) - B))).astype(ACT_DTYPE)
    logits = pallas_dense(img_n, rhs, None, out_dtype=jnp.float32, n_out=B)

    li = jnp.exp(logit_scale) * logits
    # logits_per_text is exactly the transpose -> no second matmul / in-kernel
    # transpose; XLA handles the tiny (B, B) transpose in the jit.
    return li, li.T


# -----------------------------------------------------------------------------
# Encoder glue (plain JAX; every matmul goes through the fused Pallas kernel)
# -----------------------------------------------------------------------------
def layer_norm(x, gamma, beta, eps=LN_EPS):
    mu = jnp.mean(x, axis=-1, keepdims=True)
    var = jnp.mean(jnp.square(x - mu), axis=-1, keepdims=True)
    return (x - mu) * jax.lax.rsqrt(var + eps) * gamma + beta


def mha(x, p, n_heads, residual):
    B, S, E = x.shape
    hd = E // n_heads
    # Pre-LN fused into the single (E, 3E) QKV matmul.
    qkv = pallas_dense(x, p["wqkv"], p["bqkv"],
                       ln=(p["ln1_g"], p["ln1_b"]), n_out=3 * E)   # (B,S,3E) bf16
    q, k, v = jnp.split(qkv, 3, axis=-1)

    def heads(t):
        return t.reshape(B, S, n_heads, hd).transpose(0, 2, 1, 3)

    q, k, v = map(heads, (q, k, v))
    # TODO(synk): swap for a flash-attention Pallas kernel once S >= 128; at
    # the demo sequence lengths (<= 64) the (S,S) score tile is tiny.
    scores = jnp.einsum("bhqd,bhkd->bhqk", q, k,
                        preferred_element_type=jnp.float32) / math.sqrt(hd)
    attn = jax.nn.softmax(scores, axis=-1)
    out = jnp.einsum("bhqk,bhkd->bhqd", attn.astype(v.dtype), v,
                     preferred_element_type=jnp.float32).astype(ACT_DTYPE)
    out = out.transpose(0, 2, 1, 3).reshape(B, S, E)
    # Output projection with the residual add fused into the kernel epilogue.
    return pallas_dense(out, p["wo"], p["bo"], residual=residual, n_out=E)


def transformer_block(x, p, n_heads):
    E = x.shape[-1]
    x = mha(x, p, n_heads, residual=x)
    # LN2 + bias + GELU fused; hidden activation stays at its padded lane-dense
    # width (w2's K rows are zero-padded to match), so no slice/re-pad.
    h = pallas_dense(x, p["w1"], p["b1"],
                     ln=(p["ln2_g"], p["ln2_b"]), activation="gelu")
    x = pallas_dense(h, p["w2"], p["b2"], residual=x, n_out=E)
    return x


def img_encoder(x_img, p, n_heads):
    # x_img: (B, C, H, W) NCHW, treated as a (B, H*W, C) token sequence.
    B, C, H, W = x_img.shape
    E = p["pos"].shape[-1]
    tokens = x_img.reshape(B, C, H * W).transpose(0, 2, 1)         # (B, HW, C)
    h = pallas_dense(tokens, p["patch_w"], p["patch_b"], n_out=E)  # (B, HW, E)
    h = (h.astype(jnp.float32) + p["pos"][None]).astype(ACT_DTYPE)
    for blk in p["blocks"]:
        h = transformer_block(h, blk, n_heads)
    h = layer_norm(h.astype(jnp.float32), p["lnf_g"], p["lnf_b"])
    return jnp.mean(h, axis=1)                                     # (B, E) f32


def txt_encoder(x_txt, p, n_heads):
    # x_txt: (B, L) int32 token ids.
    # TODO(synk): embedding gather stays in plain JAX (no clean static BlockSpec).
    E = p["pos"].shape[-1]
    h = (p["tok_emb"][x_txt] + p["pos"][None]).astype(ACT_DTYPE)   # (B, L, E)
    for blk in p["blocks"]:
        h = transformer_block(h, blk, n_heads)
    h = layer_norm(h.astype(jnp.float32), p["lnf_g"], p["lnf_b"])
    return jnp.mean(h, axis=1)                                     # (B, E) f32


def dvae_clip_forward(params, x_img, x_txt, n_heads):
    image_features = img_encoder(x_img, params["img"], n_heads)
    text_features = txt_encoder(x_txt, params["txt"], n_heads)
    return clip_head(image_features, text_features,
                     params["w_me"], params["logit_scale"])


# -----------------------------------------------------------------------------
# Deterministic parameter init (weights pre-padded to kernel layout, once)
# -----------------------------------------------------------------------------
def init_params(key, *, img_c, img_h, img_w, vocab, txt_len,
                embed_dim, num_blocks, hidden_dim):
    keys = iter(jax.random.split(key, 1024))

    def nrm(shape, scale=0.02):
        return scale * jax.random.normal(next(keys), shape, jnp.float32)

    def dense(k_in, n_out, *, k_pad_to=None, bias=True):
        """Weight stored (Kp, Np): N padded to a multiple of 128, bf16."""
        npad = _round_up(n_out, 128)
        kpad = k_in if k_pad_to is None else k_pad_to
        w = jnp.pad(nrm((k_in, n_out)),
                    ((0, kpad - k_in), (0, npad - n_out))).astype(ACT_DTYPE)
        b = jnp.zeros((1, npad), jnp.float32) if bias else None
        return w, b

    hid_pad = _round_up(hidden_dim, 128)
    qkv_pad = _round_up(3 * embed_dim, 128)

    def make_block():
        wq, wk, wv = (nrm((embed_dim, embed_dim)) for _ in range(3))
        wqkv = jnp.concatenate([wq, wk, wv], axis=1)               # fused (E, 3E)
        wqkv = jnp.pad(wqkv, ((0, 0), (0, qkv_pad - 3 * embed_dim))).astype(ACT_DTYPE)
        wo, bo = dense(embed_dim, embed_dim)
        w1, b1 = dense(embed_dim, hidden_dim)
        # w2's input rows padded to the padded MLP hidden width (zero rows).
        w2, b2 = dense(hidden_dim, embed_dim, k_pad_to=hid_pad)
        return dict(
            ln1_g=jnp.ones((embed_dim,), jnp.float32),
            ln1_b=jnp.zeros((embed_dim,), jnp.float32),
            wqkv=wqkv,
            bqkv=jnp.zeros((1, qkv_pad), jnp.float32),
            wo=wo, bo=bo,
            ln2_g=jnp.ones((embed_dim,), jnp.float32),
            ln2_b=jnp.zeros((embed_dim,), jnp.float32),
            w1=w1, b1=b1, w2=w2, b2=b2,
        )

    patch_w, patch_b = dense(img_c, embed_dim)
    img = dict(
        patch_w=patch_w, patch_b=patch_b,
        pos=nrm((img_h * img_w, embed_dim)),
        blocks=[make_block() for _ in range(num_blocks)],
        lnf_g=jnp.ones((embed_dim,), jnp.float32),
        lnf_b=jnp.zeros((embed_dim,), jnp.float32),
    )
    txt = dict(
        tok_emb=nrm((vocab, embed_dim)),
        pos=nrm((txt_len, embed_dim)),
        blocks=[make_block() for _ in range(num_blocks)],
        lnf_g=jnp.ones((embed_dim,), jnp.float32),
        lnf_b=jnp.zeros((embed_dim,), jnp.float32),
    )
    w_me, _ = dense(embed_dim, embed_dim, bias=False)   # nn.Linear(E, E, bias=False)
    return dict(
        img=img, txt=txt, w_me=w_me,
        logit_scale=jnp.array(math.log(1.0 / 0.07), jnp.float32),
    )


# -----------------------------------------------------------------------------
if __name__ == "__main__":
    B = 2
    IMG_C, IMG_H, IMG_W = 4, 8, 8
    TXT_LEN, VOCAB = 8, 50
    EMBED, NUM_BLOCKS, HIDDEN, N_HEADS = 32, 2, 64, 4

    key = jax.random.PRNGKey(0)
    k_img, k_txt, k_par = jax.random.split(key, 3)

    x_img = jax.random.normal(k_img, (B, IMG_C, IMG_H, IMG_W), jnp.float32)
    x_txt = jax.random.randint(k_txt, (B, TXT_LEN), 0, VOCAB, dtype=jnp.int32)

    params = init_params(
        k_par, img_c=IMG_C, img_h=IMG_H, img_w=IMG_W,
        vocab=VOCAB, txt_len=TXT_LEN,
        embed_dim=EMBED, num_blocks=NUM_BLOCKS, hidden_dim=HIDDEN,
    )

    fwd = jax.jit(functools.partial(dvae_clip_forward, n_heads=N_HEADS))
    logits_per_image, logits_per_text = fwd(params, x_img, x_txt)
    jax.block_until_ready((logits_per_image, logits_per_text))

    assert logits_per_image.shape == (B, B)
    assert logits_per_text.shape == (B, B)
    assert bool(jnp.all(jnp.isfinite(logits_per_image)))
    assert bool(jnp.all(jnp.isfinite(logits_per_text)))
    print("KERNEL_OK")
</pallas_src>

<mosaic_0001>
module attributes {stable_mosaic.version = 11 : i64} {
  func.func @_dense_kernel(%arg0: i32, %arg1: i32, %arg2: i32, %arg3: memref<16x32xbf16, #tpu.memory_space<vmem>>, %arg4: memref<32x128xbf16, #tpu.memory_space<vmem>>, %arg5: memref<1x32xf32, #tpu.memory_space<vmem>>, %arg6: memref<1x32xf32, #tpu.memory_space<vmem>>, %arg7: memref<1x128xf32, #tpu.memory_space<vmem>>, %arg8: memref<16x128xbf16, #tpu.memory_space<vmem>>, %arg9: memref<16x128xf32, #tpu.memory_space<vmem>>) attributes {dimension_semantics = [#tpu.dimension_semantics<parallel>, #tpu.dimension_semantics<parallel>, #tpu.dimension_semantics<arbitrary>], iteration_bounds = array<i64: 1, 1, 1>, scalar_prefetch = 0 : i64, scratch_operands = 1 : i64, tpu.core_type = #tpu.core_type<tc>, window_params = [{transform_indices = @transform_0, window_bounds = array<i64: 16, 32>}, {transform_indices = @transform_1, window_bounds = array<i64: 32, 128>}, {pipeline_mode = #tpu.pipeline_mode<synchronous>, transform_indices = @transform_2, window_bounds = array<i64: 1, 32>}, {pipeline_mode = #tpu.pipeline_mode<synchronous>, transform_indices = @transform_3, window_bounds = array<i64: 1, 32>}, {transform_indices = @transform_4, window_bounds = array<i64: 1, 128>}, {transform_indices = @transform_5, window_bounds = array<i64: 16, 128>}]} {
    %c0_i32 = arith.constant 0 : i32
    %0 = arith.cmpi eq, %arg2, %c0_i32 : i32
    %1 = arith.extui %0 : i1 to i32
    %c0_i32_0 = arith.constant 0 : i32
    %2 = arith.cmpi ne, %1, %c0_i32_0 : i32
    scf.if %2 {
      %cst_19 = arith.constant 0.000000e+00 : f32
      %38 = vector.broadcast %cst_19 : f32 to vector<16x128xf32>
      %c0_20 = arith.constant 0 : index
      %c0_21 = arith.constant 0 : index
      %39 = vector.load %arg9[%c0_20, %c0_21] : memref<16x128xf32, #tpu.memory_space<vmem>>, vector<16x128xf32>
      tpu.vector_store %arg9[%c0_20, %c0_21], %38 {strides = array<i32>} : memref<16x128xf32, #tpu.memory_space<vmem>>, vector<16x128xf32>,
    } else {
    }
    %c0 = arith.constant 0 : index
    %c0_1 = arith.constant 0 : index
    %3 = vector.load %arg3[%c0, %c0_1] : memref<16x32xbf16, #tpu.memory_space<vmem>>, vector<16x32xbf16>
    %4 = arith.extf %3 : vector<16x32xbf16> to vector<16x32xf32>
    %cst = arith.constant dense<0.000000e+00> : vector<16xf32>
    %5 = vector.multi_reduction <add>, %4, %cst [1] : vector<16x32xf32> to vector<16xf32>
    %6 = vector.shape_cast %5 : vector<16xf32> to vector<16x1xf32>
    %cst_2 = arith.constant 3.200000e+01 : f32
    %7 = vector.broadcast %cst_2 : f32 to vector<16x1xf32>
    %8 = arith.divf %6, %7 : vector<16x1xf32>
    %9 = vector.broadcast %8 : vector<16x1xf32> to vector<16x32xf32>
    %10 = arith.subf %4, %9 : vector<16x32xf32>
    %11 = arith.mulf %10, %10 : vector<16x32xf32>
    %cst_3 = arith.constant dense<0.000000e+00> : vector<16xf32>
    %12 = vector.multi_reduction <add>, %11, %cst_3 [1] : vector<16x32xf32> to vector<16xf32>
    %13 = vector.shape_cast %12 : vector<16xf32> to vector<16x1xf32>
    %cst_4 = arith.constant 3.200000e+01 : f32
    %14 = vector.broadcast %cst_4 : f32 to vector<16x1xf32>
    %15 = arith.divf %13, %14 : vector<16x1xf32>
    %16 = vector.broadcast %8 : vector<16x1xf32> to vector<16x32xf32>
    %17 = arith.subf %4, %16 : vector<16x32xf32>
    %cst_5 = arith.constant 9.99999974E-6 : f32
    %18 = vector.broadcast %cst_5 : f32 to vector<16x1xf32>
    %19 = arith.addf %15, %18 : vector<16x1xf32>
    %20 = math.rsqrt %19 : vector<16x1xf32>
    %21 = vector.broadcast %20 : vector<16x1xf32> to vector<16x32xf32>
    %22 = arith.mulf %17, %21 : vector<16x32xf32>
    %c0_6 = arith.constant 0 : index
    %c0_7 = arith.constant 0 : index
    %23 = vector.load %arg5[%c0_6, %c0_7] : memref<1x32xf32, #tpu.memory_space<vmem>>, vector<1x32xf32>
    %24 = vector.broadcast %23 : vector<1x32xf32> to vector<16x32xf32>
    %25 = arith.mulf %22, %24 : vector<16x32xf32>
    %c0_8 = arith.constant 0 : index
    %c0_9 = arith.constant 0 : index
    %26 = vector.load %arg6[%c0_8, %c0_9] : memref<1x32xf32, #tpu.memory_space<vmem>>, vector<1x32xf32>
    %27 = vector.broadcast %26 : vector<1x32xf32> to vector<16x32xf32>
    %28 = arith.addf %25, %27 : vector<16x32xf32>
    %29 = arith.truncf %28 : vector<16x32xf32> to vector<16x32xbf16>
    %c0_10 = arith.constant 0 : index
    %c0_11 = arith.constant 0 : index
    %30 = vector.load %arg9[%c0_10, %c0_11] : memref<16x128xf32, #tpu.memory_space<vmem>>, vector<16x128xf32>
    %c0_12 = arith.constant 0 : index
    %c0_13 = arith.constant 0 : index
    %31 = vector.load %arg4[%c0_12, %c0_13] : memref<32x128xbf16, #tpu.memory_space<vmem>>, vector<32x128xbf16>
    %cst_14 = arith.constant dense<0.000000e+00> : vector<16x128xf32>
    %32 = tpu.matmul %29, %31, %cst_14 {dimension_numbers = #tpu.dot_dimension_numbers<[1], [0], [0], [1], [0, 0, 1, 1], [], []>} : vector<16x32xbf16>, vector<32x128xbf16>, vector<16x128xf32> -> vector<16x128xf32>
    %33 = arith.addf %30, %32 : vector<16x128xf32>
    %c0_15 = arith.constant 0 : index
    %c0_16 = arith.constant 0 : index
    %34 = vector.load %arg9[%c0_15, %c0_16] : memref<16x128xf32, #tpu.memory_space<vmem>>, vector<16x128xf32>
    tpu.vector_store %arg9[%c0_15, %c0_16], %33 {strides = array<i32>} : memref<16x128xf32, #tpu.memory_space<vmem>>, vector<16x128xf32>,
    %c0_i32_17 = arith.constant 0 : i32
    %35 = arith.cmpi eq, %arg2, %c0_i32_17 : i32
    %36 = arith.extui %35 : i1 to i32
    %c0_i32_18 = arith.constant 0 : i32
    %37 = arith.cmpi ne, %36, %c0_i32_18 : i32
    scf.if %37 {
      %c0_19 = arith.constant 0 : index
      %c0_20 = arith.constant 0 : index
      %38 = vector.load %arg9[%c0_19, %c0_20] : memref<16x128xf32, #tpu.memory_space<vmem>>, vector<16x128xf32>
      %c0_21 = arith.constant 0 : index
      %c0_22 = arith.constant 0 : index
      %39 = vector.load %arg7[%c0_21, %c0_22] : memref<1x128xf32, #tpu.memory_space<vmem>>, vector<1x128xf32>
      %40 = vector.broadcast %39 : vector<1x128xf32> to vector<16x128xf32>
      %41 = arith.addf %38, %40 : vector<16x128xf32>
      %42 = arith.truncf %41 : vector<16x128xf32> to vector<16x128xbf16>
      %c0_23 = arith.constant 0 : index
      %c0_24 = arith.constant 0 : index
      %43 = vector.load %arg8[%c0_23, %c0_24] : memref<16x128xbf16, #tpu.memory_space<vmem>>, vector<16x128xbf16>
      tpu.vector_store %arg8[%c0_23, %c0_24], %42 {strides = array<i32>} : memref<16x128xbf16, #tpu.memory_space<vmem>>, vector<16x128xbf16>,
    } else {
    }
    return
  }
  func.func @transform_0(%arg0: i32, %arg1: i32, %arg2: i32) -> (i32, i32) {
    %c0_i32 = arith.constant 0 : i32
    return %arg0, %arg2 : i32, i32
  }
  func.func @transform_1(%arg0: i32, %arg1: i32, %arg2: i32) -> (i32, i32) {
    %c0_i32 = arith.constant 0 : i32
    return %arg2, %arg1 : i32, i32
  }
  func.func @transform_2(%arg0: i32, %arg1: i32, %arg2: i32) -> (i32, i32) {
    %c0_i32 = arith.constant 0 : i32
    %c0_i32_0 = arith.constant 0 : i32
    %c0_i32_1 = arith.constant 0 : i32
    return %c0_i32, %c0_i32_0 : i32, i32
  }
  func.func @transform_3(%arg0: i32, %arg1: i32, %arg2: i32) -> (i32, i32) {
    %c0_i32 = arith.constant 0 : i32
    %c0_i32_0 = arith.constant 0 : i32
    %c0_i32_1 = arith.constant 0 : i32
    return %c0_i32, %c0_i32_0 : i32, i32
  }
  func.func @transform_4(%arg0: i32, %arg1: i32, %arg2: i32) -> (i32, i32) {
    %c0_i32 = arith.constant 0 : i32
    %c0_i32_0 = arith.constant 0 : i32
    return %c0_i32, %arg1 : i32, i32
  }
  func.func @transform_5(%arg0: i32, %arg1: i32, %arg2: i32) -> (i32, i32) {
    %c0_i32 = arith.constant 0 : i32
    return %arg0, %arg1 : i32, i32
  }
}

module attributes {stable_mosaic.version = 11 : i64} {
  func.func @_dense_kernel(%arg0: i32, %arg1: i32, %arg2: i32, %arg3: memref<16x32xbf16, #tpu.memory_space<vmem>>, %arg4: memref<32x128xbf16, #tpu.memory_space<vmem>>, %arg5: memref<1x128xf32, #tpu.memory_space<vmem>>, %arg6: memref<16x128xbf16, #tpu.memory_space<vmem>>, %arg7: memref<16x128xbf16, #tpu.memory_space<vmem>>, %arg8: memref<16x128xf32, #tpu.memory_space<vmem>>) attributes {dimension_semantics = [#tpu.dimension_semantics<parallel>, #tpu.dimension_semantics<parallel>, #tpu.dimension_semantics<arbitrary>], iteration_bounds = array<i64: 1, 1, 1>, scalar_prefetch = 0 : i64, scratch_operands = 1 : i64, tpu.core_type = #tpu.core_type<tc>, window_params = [{transform_indices = @transform_0, window_bounds = array<i64: 16, 32>}, {transform_indices = @transform_1, window_bounds = array<i64: 32, 128>}, {transform_indices = @transform_2, window_bounds = array<i64: 1, 128>}, {transform_indices = @transform_3, window_bounds = array<i64: 16, 128>}, {transform_indices = @transform_4, window_bounds = array<i64: 16, 128>}]} {
    %c0_i32 = arith.constant 0 : i32
    %0 = arith.cmpi eq, %arg2, %c0_i32 : i32
    %1 = arith.extui %0 : i1 to i32
    %c0_i32_0 = arith.constant 0 : i32
    %2 = arith.cmpi ne, %1, %c0_i32_0 : i32
    scf.if %2 {
      %cst_10 = arith.constant 0.000000e+00 : f32
      %12 = vector.broadcast %cst_10 : f32 to vector<16x128xf32>
      %c0_11 = arith.constant 0 : index
      %c0_12 = arith.constant 0 : index
      %13 = vector.load %arg8[%c0_11, %c0_12] : memref<16x128xf32, #tpu.memory_space<vmem>>, vector<16x128xf32>
      tpu.vector_store %arg8[%c0_11, %c0_12], %12 {strides = array<i32>} : memref<16x128xf32, #tpu.memory_space<vmem>>, vector<16x128xf32>,
    } else {
    }
    %c0 = arith.constant 0 : index
    %c0_1 = arith.constant 0 : index
    %3 = vector.load %arg3[%c0, %c0_1] : memref<16x32xbf16, #tpu.memory_space<vmem>>, vector<16x32xbf16>
    %c0_2 = arith.constant 0 : index
    %c0_3 = arith.constant 0 : index
    %4 = vector.load %arg8[%c0_2, %c0_3] : memref<16x128xf32, #tpu.memory_space<vmem>>, vector<16x128xf32>
    %c0_4 = arith.constant 0 : index
    %c0_5 = arith.constant 0 : index
    %5 = vector.load %arg4[%c0_4, %c0_5] : memref<32x128xbf16, #tpu.memory_space<vmem>>, vector<32x128xbf16>
    %cst = arith.constant dense<0.000000e+00> : vector<16x128xf32>
    %6 = tpu.matmul %3, %5, %cst {dimension_numbers = #tpu.dot_dimension_numbers<[1], [0], [0], [1], [0, 0, 1, 1], [], []>} : vector<16x32xbf16>, vector<32x128xbf16>, vector<16x128xf32> -> vector<16x128xf32>
    %7 = arith.addf %4, %6 : vector<16x128xf32>
    %c0_6 = arith.constant 0 : index
    %c0_7 = arith.constant 0 : index
    %8 = vector.load %arg8[%c0_6, %c0_7] : memref<16x128xf32, #tpu.memory_space<vmem>>, vector<16x128xf32>
    tpu.vector_store %arg8[%c0_6, %c0_7], %7 {strides = array<i32>} : memref<16x128xf32, #tpu.memory_space<vmem>>, vector<16x128xf32>,
    %c0_i32_8 = arith.constant 0 : i32
    %9 = arith.cmpi eq, %arg2, %c0_i32_8 : i32
    %10 = arith.extui %9 : i1 to i32
    %c0_i32_9 = arith.constant 0 : i32
    %11 = arith.cmpi ne, %10, %c0_i32_9 : i32
    scf.if %11 {
      %c0_10 = arith.constant 0 : index
      %c0_11 = arith.constant 0 : index
      %12 = vector.load %arg8[%c0_10, %c0_11] : memref<16x128xf32, #tpu.memory_space<vmem>>, vector<16x128xf32>
      %c0_12 = arith.constant 0 : index
      %c0_13 = arith.constant 0 : index
      %13 = vector.load %arg5[%c0_12, %c0_13] : memref<1x128xf32, #tpu.memory_space<vmem>>, vector<1x128xf32>
      %14 = vector.broadcast %13 : vector<1x128xf32> to vector<16x128xf32>
      %15 = arith.addf %12, %14 : vector<16x128xf32>
      %c0_14 = arith.constant 0 : index
      %c0_15 = arith.constant 0 : index
      %16 = vector.load %arg6[%c0_14, %c0_15] : memref<16x128xbf16, #tpu.memory_space<vmem>>, vector<16x128xbf16>
      %17 = arith.extf %16 : vector<16x128xbf16> to vector<16x128xf32>
      %18 = arith.addf %15, %17 : vector<16x128xf32>
      %19 = arith.truncf %18 : vector<16x128xf32> to vector<16x128xbf16>
      %c0_16 = arith.constant 0 : index
      %c0_17 = arith.constant 0 : index
      %20 = vector.load %arg7[%c0_16, %c0_17] : memref<16x128xbf16, #tpu.memory_space<vmem>>, vector<16x128xbf16>
      tpu.vector_store %arg7[%c0_16, %c0_17], %19 {strides = array<i32>} : memref<16x128xbf16, #tpu.memory_space<vmem>>, vector<16x128xbf16>,
    } else {
    }
    return
  }
  func.func @transform_0(%arg0: i32, %arg1: i32, %arg2: i32) -> (i32, i32) {
    %c0_i32 = arith.constant 0 : i32
    return %arg0, %arg2 : i32, i32
  }
  func.func @transform_1(%arg0: i32, %arg1: i32, %arg2: i32) -> (i32, i32) {
    %c0_i32 = arith.constant 0 : i32
    return %arg2, %arg1 : i32, i32
  }
  func.func @transform_2(%arg0: i32, %arg1: i32, %arg2: i32) -> (i32, i32) {
    %c0_i32 = arith.constant 0 : i32
    %c0_i32_0 = arith.constant 0 : i32
    return %c0_i32, %arg1 : i32, i32
  }
  func.func @transform_3(%arg0: i32, %arg1: i32, %arg2: i32) -> (i32, i32) {
    %c0_i32 = arith.constant 0 : i32
    return %arg0, %arg1 : i32, i32
  }
  func.func @transform_4(%arg0: i32, %arg1: i32, %arg2: i32) -> (i32, i32) {
    %c0_i32 = arith.constant 0 : i32
    return %arg0, %arg1 : i32, i32
  }
}

module attributes {stable_mosaic.version = 11 : i64} {
  func.func @_dense_kernel(%arg0: i32, %arg1: i32, %arg2: i32, %arg3: memref<16x32xbf16, #tpu.memory_space<vmem>>, %arg4: memref<32x128xbf16, #tpu.memory_space<vmem>>, %arg5: memref<1x32xf32, #tpu.memory_space<vmem>>, %arg6: memref<1x32xf32, #tpu.memory_space<vmem>>, %arg7: memref<1x128xf32, #tpu.memory_space<vmem>>, %arg8: memref<16x128xbf16, #tpu.memory_space<vmem>>, %arg9: memref<16x128xf32, #tpu.memory_space<vmem>>) attributes {dimension_semantics = [#tpu.dimension_semantics<parallel>, #tpu.dimension_semantics<parallel>, #tpu.dimension_semantics<arbitrary>], iteration_bounds = array<i64: 1, 1, 1>, scalar_prefetch = 0 : i64, scratch_operands = 1 : i64, tpu.core_type = #tpu.core_type<tc>, window_params = [{transform_indices = @transform_0, window_bounds = array<i64: 16, 32>}, {transform_indices = @transform_1, window_bounds = array<i64: 32, 128>}, {pipeline_mode = #tpu.pipeline_mode<synchronous>, transform_indices = @transform_2, window_bounds = array<i64: 1, 32>}, {pipeline_mode = #tpu.pipeline_mode<synchronous>, transform_indices = @transform_3, window_bounds = array<i64: 1, 32>}, {transform_indices = @transform_4, window_bounds = array<i64: 1, 128>}, {transform_indices = @transform_5, window_bounds = array<i64: 16, 128>}]} {
    %c0_i32 = arith.constant 0 : i32
    %0 = arith.cmpi eq, %arg2, %c0_i32 : i32
    %1 = arith.extui %0 : i1 to i32
    %c0_i32_0 = arith.constant 0 : i32
    %2 = arith.cmpi ne, %1, %c0_i32_0 : i32
    scf.if %2 {
      %cst_19 = arith.constant 0.000000e+00 : f32
      %38 = vector.broadcast %cst_19 : f32 to vector<16x128xf32>
      %c0_20 = arith.constant 0 : index
      %c0_21 = arith.constant 0 : index
      %39 = vector.load %arg9[%c0_20, %c0_21] : memref<16x128xf32, #tpu.memory_space<vmem>>, vector<16x128xf32>
      tpu.vector_store %arg9[%c0_20, %c0_21], %38 {strides = array<i32>} : memref<16x128xf32, #tpu.memory_space<vmem>>, vector<16x128xf32>,
    } else {
    }
    %c0 = arith.constant 0 : index
    %c0_1 = arith.constant 0 : index
    %3 = vector.load %arg3[%c0, %c0_1] : memref<16x32xbf16, #tpu.memory_space<vmem>>, vector<16x32xbf16>
    %4 = arith.extf %3 : vector<16x32xbf16> to vector<16x32xf32>
    %cst = arith.constant dense<0.000000e+00> : vector<16xf32>
    %5 = vector.multi_reduction <add>, %4, %cst [1] : vector<16x32xf32> to vector<16xf32>
    %6 = vector.shape_cast %5 : vector<16xf32> to vector<16x1xf32>
    %cst_2 = arith.constant 3.200000e+01 : f32
    %7 = vector.broadcast %cst_2 : f32 to vector<16x1xf32>
    %8 = arith.divf %6, %7 : vector<16x1xf32>
    %9 = vector.broadcast %8 : vector<16x1xf32> to vector<16x32xf32>
    %10 = arith.subf %4, %9 : vector<16x32xf32>
    %11 = arith.mulf %10, %10 : vector<16x32xf32>
    %cst_3 = arith.constant dense<0.000000e+00> : vector<16xf32>
    %12 = vector.multi_reduction <add>, %11, %cst_3 [1] : vector<16x32xf32> to vector<16xf32>
    %13 = vector.shape_cast %12 : vector<16xf32> to vector<16x1xf32>
    %cst_4 = arith.constant 3.200000e+01 : f32
    %14 = vector.broadcast %cst_4 : f32 to vector<16x1xf32>
    %15 = arith.divf %13, %14 : vector<16x1xf32>
    %16 = vector.broadcast %8 : vector<16x1xf32> to vector<16x32xf32>
    %17 = arith.subf %4, %16 : vector<16x32xf32>
    %cst_5 = arith.constant 9.99999974E-6 : f32
    %18 = vector.broadcast %cst_5 : f32 to vector<16x1xf32>
    %19 = arith.addf %15, %18 : vector<16x1xf32>
    %20 = math.rsqrt %19 : vector<16x1xf32>
    %21 = vector.broadcast %20 : vector<16x1xf32> to vector<16x32xf32>
    %22 = arith.mulf %17, %21 : vector<16x32xf32>
    %c0_6 = arith.constant 0 : index
    %c0_7 = arith.constant 0 : index
    %23 = vector.load %arg5[%c0_6, %c0_7] : memref<1x32xf32, #tpu.memory_space<vmem>>, vector<1x32xf32>
    %24 = vector.broadcast %23 : vector<1x32xf32> to vector<16x32xf32>
    %25 = arith.mulf %22, %24 : vector<16x32xf32>
    %c0_8 = arith.constant 0 : index
    %c0_9 = arith.constant 0 : index
    %26 = vector.load %arg6[%c0_8, %c0_9] : memref<1x32xf32, #tpu.memory_space<vmem>>, vector<1x32xf32>
    %27 = vector.broadcast %26 : vector<1x32xf32> to vector<16x32xf32>
    %28 = arith.addf %25, %27 : vector<16x32xf32>
    %29 = arith.truncf %28 : vector<16x32xf32> to vector<16x32xbf16>
    %c0_10 = arith.constant 0 : index
    %c0_11 = arith.constant 0 : index
    %30 = vector.load %arg9[%c0_10, %c0_11] : memref<16x128xf32, #tpu.memory_space<vmem>>, vector<16x128xf32>
    %c0_12 = arith.constant 0 : index
    %c0_13 = arith.constant 0 : index
    %31 = vector.load %arg4[%c0_12, %c0_13] : memref<32x128xbf16, #tpu.memory_space<vmem>>, vector<32x128xbf16>
    %cst_14 = arith.constant dense<0.000000e+00> : vector<16x128xf32>
    %32 = tpu.matmul %29, %31, %cst_14 {dimension_numbers = #tpu.dot_dimension_numbers<[1], [0], [0], [1], [0, 0, 1, 1], [], []>} : vector<16x32xbf16>, vector<32x128xbf16>, vector<16x128xf32> -> vector<16x128xf32>
    %33 = arith.addf %30, %32 : vector<16x128xf32>
    %c0_15 = arith.constant 0 : index
    %c0_16 = arith.constant 0 : index
    %34 = vector.load %arg9[%c0_15, %c0_16] : memref<16x128xf32, #tpu.memory_space<vmem>>, vector<16x128xf32>
    tpu.vector_store %arg9[%c0_15, %c0_16], %33 {strides = array<i32>} : memref<16x128xf32, #tpu.memory_space<vmem>>, vector<16x128xf32>,
    %c0_i32_17 = arith.constant 0 : i32
    %35 = arith.cmpi eq, %arg2, %c0_i32_17 : i32
    %36 = arith.extui %35 : i1 to i32
    %c0_i32_18 = arith.constant 0 : i32
    %37 = arith.cmpi ne, %36, %c0_i32_18 : i32
    scf.if %37 {
      %c0_19 = arith.constant 0 : index
      %c0_20 = arith.constant 0 : index
      %38 = vector.load %arg9[%c0_19, %c0_20] : memref<16x128xf32, #tpu.memory_space<vmem>>, vector<16x128xf32>
      %c0_21 = arith.constant 0 : index
      %c0_22 = arith.constant 0 : index
      %39 = vector.load %arg7[%c0_21, %c0_22] : memref<1x128xf32, #tpu.memory_space<vmem>>, vector<1x128xf32>
      %40 = vector.broadcast %39 : vector<1x128xf32> to vector<16x128xf32>
      %41 = arith.addf %38, %40 : vector<16x128xf32>
      %42 = arith.mulf %41, %41 : vector<16x128xf32>
      %43 = arith.mulf %41, %42 : vector<16x128xf32>
      %cst_23 = arith.constant 4.471500e-02 : f32
      %44 = vector.broadcast %cst_23 : f32 to vector<16x128xf32>
      %45 = arith.mulf %44, %43 : vector<16x128xf32>
      %46 = arith.addf %41, %45 : vector<16x128xf32>
      %cst_24 = arith.constant 0.797884583 : f32
      %47 = vector.broadcast %cst_24 : f32 to vector<16x128xf32>
      %48 = arith.mulf %47, %46 : vector<16x128xf32>
      %49 = math.tanh %48 : vector<16x128xf32>
      %cst_25 = arith.constant 1.000000e+00 : f32
      %50 = vector.broadcast %cst_25 : f32 to vector<16x128xf32>
      %51 = arith.addf %50, %49 : vector<16x128xf32>
      %cst_26 = arith.constant 5.000000e-01 : f32
      %52 = vector.broadcast %cst_26 : f32 to vector<16x128xf32>
      %53 = arith.mulf %52, %51 : vector<16x128xf32>
      %54 = arith.mulf %41, %53 : vector<16x128xf32>
      %55 = arith.truncf %54 : vector<16x128xf32> to vector<16x128xbf16>
      %c0_27 = arith.constant 0 : index
      %c0_28 = arith.constant 0 : index
      %56 = vector.load %arg8[%c0_27, %c0_28] : memref<16x128xbf16, #tpu.memory_space<vmem>>, vector<16x128xbf16>
      tpu.vector_store %arg8[%c0_27, %c0_28], %55 {strides = array<i32>} : memref<16x128xbf16, #tpu.memory_space<vmem>>, vector<16x128xbf16>,
    } else {
    }
    return
  }
  func.func @transform_0(%arg0: i32, %arg1: i32, %arg2: i32) -> (i32, i32) {
    %c0_i32 = arith.constant 0 : i32
    return %arg0, %arg2 : i32, i32
  }
  func.func @transform_1(%arg0: i32, %arg1: i32, %arg2: i32) -> (i32, i32) {
    %c0_i32 = arith.constant 0 : i32
    return %arg2, %arg1 : i32, i32
  }
  func.func @transform_2(%arg0: i32, %arg1: i32, %arg2: i32) -> (i32, i32) {
    %c0_i32 = arith.constant 0 : i32
    %c0_i32_0 = arith.constant 0 : i32
    %c0_i32_1 = arith.constant 0 : i32
    return %c0_i32, %c0_i32_0 : i32, i32
  }
  func.func @transform_3(%arg0: i32, %arg1: i32, %arg2: i32) -> (i32, i32) {
    %c0_i32 = arith.constant 0 : i32
    %c0_i32_0 = arith.constant 0 : i32
    %c0_i32_1 = arith.constant 0 : i32
    return %c0_i32, %c0_i32_0 : i32, i32
  }
  func.func @transform_4(%arg0: i32, %arg1: i32, %arg2: i32) -> (i32, i32) {
    %c0_i32 = arith.constant 0 : i32
    %c0_i32_0 = arith.constant 0 : i32
    return %c0_i32, %arg1 : i32, i32
  }
  func.func @transform_5(%arg0: i32, %arg1: i32, %arg2: i32) -> (i32, i32) {
    %c0_i32 = arith.constant 0 : i32
    return %arg0, %arg1 : i32, i32
  }
}

module attributes {stable_mosaic.version = 11 : i64} {
  func.func @_dense_kernel(%arg0: i32, %arg1: i32, %arg2: i32, %arg3: memref<16x128xbf16, #tpu.memory_space<vmem>>, %arg4: memref<128x128xbf16, #tpu.memory_space<vmem>>, %arg5: memref<1x128xf32, #tpu.memory_space<vmem>>, %arg6: memref<16x128xbf16, #tpu.memory_space<vmem>>, %arg7: memref<16x128xbf16, #tpu.memory_space<vmem>>, %arg8: memref<16x128xf32, #tpu.memory_space<vmem>>) attributes {dimension_semantics = [#tpu.dimension_semantics<parallel>, #tpu.dimension_semantics<parallel>, #tpu.dimension_semantics<arbitrary>], iteration_bounds = array<i64: 1, 1, 1>, scalar_prefetch = 0 : i64, scratch_operands = 1 : i64, tpu.core_type = #tpu.core_type<tc>, window_params = [{transform_indices = @transform_0, window_bounds = array<i64: 16, 128>}, {transform_indices = @transform_1, window_bounds = array<i64: 128, 128>}, {transform_indices = @transform_2, window_bounds = array<i64: 1, 128>}, {transform_indices = @transform_3, window_bounds = array<i64: 16, 128>}, {transform_indices = @transform_4, window_bounds = array<i64: 16, 128>}]} {
    %c0_i32 = arith.constant 0 : i32
    %0 = arith.cmpi eq, %arg2, %c0_i32 : i32
    %1 = arith.extui %0 : i1 to i32
    %c0_i32_0 = arith.constant 0 : i32
    %2 = arith.cmpi ne, %1, %c0_i32_0 : i32
    scf.if %2 {
      %cst_10 = arith.constant 0.000000e+00 : f32
      %12 = vector.broadcast %cst_10 : f32 to vector<16x128xf32>
      %c0_11 = arith.constant 0 : index
      %c0_12 = arith.constant 0 : index
      %13 = vector.load %arg8[%c0_11, %c0_12] : memref<16x128xf32, #tpu.memory_space<vmem>>, vector<16x128xf32>
      tpu.vector_store %arg8[%c0_11, %c0_12], %12 {strides = array<i32>} : memref<16x128xf32, #tpu.memory_space<vmem>>, vector<16x128xf32>,
    } else {
    }
    %c0 = arith.constant 0 : index
    %c0_1 = arith.constant 0 : index
    %3 = vector.load %arg3[%c0, %c0_1] : memref<16x128xbf16, #tpu.memory_space<vmem>>, vector<16x128xbf16>
    %c0_2 = arith.constant 0 : index
    %c0_3 = arith.constant 0 : index
    %4 = vector.load %arg8[%c0_2, %c0_3] : memref<16x128xf32, #tpu.memory_space<vmem>>, vector<16x128xf32>
    %c0_4 = arith.constant 0 : index
    %c0_5 = arith.constant 0 : index
    %5 = vector.load %arg4[%c0_4, %c0_5] : memref<128x128xbf16, #tpu.memory_space<vmem>>, vector<128x128xbf16>
    %cst = arith.constant dense<0.000000e+00> : vector<16x128xf32>
    %6 = tpu.matmul %3, %5, %cst {dimension_numbers = #tpu.dot_dimension_numbers<[1], [0], [0], [1], [0, 0, 1, 1], [], []>} : vector<16x128xbf16>, vector<128x128xbf16>, vector<16x128xf32> -> vector<16x128xf32>
    %7 = arith.addf %4, %6 : vector<16x128xf32>
    %c0_6 = arith.constant 0 : index
    %c0_7 = arith.constant 0 : index
    %8 = vector.load %arg8[%c0_6, %c0_7] : memref<16x128xf32, #tpu.memory_space<vmem>>, vector<16x128xf32>
    tpu.vector_store %arg8[%c0_6, %c0_7], %7 {strides = array<i32>} : memref<16x128xf32, #tpu.memory_space<vmem>>, vector<16x128xf32>,
    %c0_i32_8 = arith.constant 0 : i32
    %9 = arith.cmpi eq, %arg2, %c0_i32_8 : i32
    %10 = arith.extui %9 : i1 to i32
    %c0_i32_9 = arith.constant 0 : i32
    %11 = arith.cmpi ne, %10, %c0_i32_9 : i32
    scf.if %11 {
      %c0_10 = arith.constant 0 : index
      %c0_11 = arith.constant 0 : index
      %12 = vector.load %arg8[%c0_10, %c0_11] : memref<16x128xf32, #tpu.memory_space<vmem>>, vector<16x128xf32>
      %c0_12 = arith.constant 0 : index
      %c0_13 = arith.constant 0 : index
      %13 = vector.load %arg5[%c0_12, %c0_13] : memref<1x128xf32, #tpu.memory_space<vmem>>, vector<1x128xf32>
      %14 = vector.broadcast %13 : vector<1x128xf32> to vector<16x128xf32>
      %15 = arith.addf %12, %14 : vector<16x128xf32>
      %c0_14 = arith.constant 0 : index
      %c0_15 = arith.constant 0 : index
      %16 = vector.load %arg6[%c0_14, %c0_15] : memref<16x128xbf16, #tpu.memory_space<vmem>>, vector<16x128xbf16>
      %17 = arith.extf %16 : vector<16x128xbf16> to vector<16x128xf32>
      %18 = arith.addf %15, %17 : vector<16x128xf32>
      %19 = arith.truncf %18 : vector<16x128xf32> to vector<16x128xbf16>
      %c0_16 = arith.constant 0 : index
      %c0_17 = arith.constant 0 : index
      %20 = vector.load %arg7[%c0_16, %c0_17] : memref<16x128xbf16, #tpu.memory_space<vmem>>, vector<16x128xbf16>
      tpu.vector_store %arg7[%c0_16, %c0_17], %19 {strides = array<i32>} : memref<16x128xbf16, #tpu.memory_space<vmem>>, vector<16x128xbf16>,
    } else {
    }
    return
  }
  func.func @transform_0(%arg0: i32, %arg1: i32, %arg2: i32) -> (i32, i32) {
    %c0_i32 = arith.constant 0 : i32
    return %arg0, %arg2 : i32, i32
  }
  func.func @transform_1(%arg0: i32, %arg1: i32, %arg2: i32) -> (i32, i32) {
    %c0_i32 = arith.constant 0 : i32
    return %arg2, %arg1 : i32, i32
  }
  func.func @transform_2(%arg0: i32, %arg1: i32, %arg2: i32) -> (i32, i32) {
    %c0_i32 = arith.constant 0 : i32
    %c0_i32_0 = arith.constant 0 : i32
    return %c0_i32, %arg1 : i32, i32
  }
  func.func @transform_3(%arg0: i32, %arg1: i32, %arg2: i32) -> (i32, i32) {
    %c0_i32 = arith.constant 0 : i32
    return %arg0, %arg1 : i32, i32
  }
  func.func @transform_4(%arg0: i32, %arg1: i32, %arg2: i32) -> (i32, i32) {
    %c0_i32 = arith.constant 0 : i32
    return %arg0, %arg1 : i32, i32
  }
}

module attributes {stable_mosaic.version = 11 : i64} {
  func.func @_dense_kernel(%arg0: i32, %arg1: i32, %arg2: i32, %arg3: memref<64x4xbf16, #tpu.memory_space<vmem>>, %arg4: memref<4x128xbf16, #tpu.memory_space<vmem>>, %arg5: memref<1x128xf32, #tpu.memory_space<vmem>>, %arg6: memref<64x128xbf16, #tpu.memory_space<vmem>>, %arg7: memref<64x128xf32, #tpu.memory_space<vmem>>) attributes {dimension_semantics = [#tpu.dimension_semantics<parallel>, #tpu.dimension_semantics<parallel>, #tpu.dimension_semantics<arbitrary>], iteration_bounds = array<i64: 2, 1, 1>, scalar_prefetch = 0 : i64, scratch_operands = 1 : i64, tpu.core_type = #tpu.core_type<tc>, window_params = [{transform_indices = @transform_0, window_bounds = array<i64: 64, 4>}, {transform_indices = @transform_1, window_bounds = array<i64: 4, 128>}, {transform_indices = @transform_2, window_bounds = array<i64: 1, 128>}, {transform_indices = @transform_3, window_bounds = array<i64: 64, 128>}]} {
    %c0_i32 = arith.constant 0 : i32
    %0 = arith.cmpi eq, %arg2, %c0_i32 : i32
    %1 = arith.extui %0 : i1 to i32
    %c0_i32_0 = arith.constant 0 : i32
    %2 = arith.cmpi ne, %1, %c0_i32_0 : i32
    scf.if %2 {
      %cst_10 = arith.constant 0.000000e+00 : f32
      %12 = vector.broadcast %cst_10 : f32 to vector<64x128xf32>
      %c0_11 = arith.constant 0 : index
      %c0_12 = arith.constant 0 : index
      %13 = vector.load %arg7[%c0_11, %c0_12] : memref<64x128xf32, #tpu.memory_space<vmem>>, vector<64x128xf32>
      tpu.vector_store %arg7[%c0_11, %c0_12], %12 {strides = array<i32>} : memref<64x128xf32, #tpu.memory_space<vmem>>, vector<64x128xf32>,
    } else {
    }
    %c0 = arith.constant 0 : index
    %c0_1 = arith.constant 0 : index
    %3 = vector.load %arg3[%c0, %c0_1] : memref<64x4xbf16, #tpu.memory_space<vmem>>, vector<64x4xbf16>
    %c0_2 = arith.constant 0 : index
    %c0_3 = arith.constant 0 : index
    %4 = vector.load %arg7[%c0_2, %c0_3] : memref<64x128xf32, #tpu.memory_space<vmem>>, vector<64x128xf32>
    %c0_4 = arith.constant 0 : index
    %c0_5 = arith.constant 0 : index
    %5 = vector.load %arg4[%c0_4, %c0_5] : memref<4x128xbf16, #tpu.memory_space<vmem>>, vector<4x128xbf16>
    %cst = arith.constant dense<0.000000e+00> : vector<64x128xf32>
    %6 = tpu.matmul %3, %5, %cst {dimension_numbers = #tpu.dot_dimension_numbers<[1], [0], [0], [1], [0, 0, 1, 1], [], []>} : vector<64x4xbf16>, vector<4x128xbf16>, vector<64x128xf32> -> vector<64x128xf32>
    %7 = arith.addf %4, %6 : vector<64x128xf32>
    %c0_6 = arith.constant 0 : index
    %c0_7 = arith.constant 0 : index
    %8 = vector.load %arg7[%c0_6, %c0_7] : memref<64x128xf32, #tpu.memory_space<vmem>>, vector<64x128xf32>
    tpu.vector_store %arg7[%c0_6, %c0_7], %7 {strides = array<i32>} : memref<64x128xf32, #tpu.memory_space<vmem>>, vector<64x128xf32>,
    %c0_i32_8 = arith.constant 0 : i32
    %9 = arith.cmpi eq, %arg2, %c0_i32_8 : i32
    %10 = arith.extui %9 : i1 to i32
    %c0_i32_9 = arith.constant 0 : i32
    %11 = arith.cmpi ne, %10, %c0_i32_9 : i32
    scf.if %11 {
      %c0_10 = arith.constant 0 : index
      %c0_11 = arith.constant 0 : index
      %12 = vector.load %arg7[%c0_10, %c0_11] : memref<64x128xf32, #tpu.memory_space<vmem>>, vector<64x128xf32>
      %c0_12 = arith.constant 0 : index
      %c0_13 = arith.constant 0 : index
      %13 = vector.load %arg5[%c0_12, %c0_13] : memref<1x128xf32, #tpu.memory_space<vmem>>, vector<1x128xf32>
      %14 = vector.broadcast %13 : vector<1x128xf32> to vector<64x128xf32>
      %15 = arith.addf %12, %14 : vector<64x128xf32>
      %16 = arith.truncf %15 : vector<64x128xf32> to vector<64x128xbf16>
      %c0_14 = arith.constant 0 : index
      %c0_15 = arith.constant 0 : index
      %17 = vector.load %arg6[%c0_14, %c0_15] : memref<64x128xbf16, #tpu.memory_space<vmem>>, vector<64x128xbf16>
      tpu.vector_store %arg6[%c0_14, %c0_15], %16 {strides = array<i32>} : memref<64x128xbf16, #tpu.memory_space<vmem>>, vector<64x128xbf16>,
    } else {
    }
    return
  }
  func.func @transform_0(%arg0: i32, %arg1: i32, %arg2: i32) -> (i32, i32) {
    %c0_i32 = arith.constant 0 : i32
    return %arg0, %arg2 : i32, i32
  }
  func.func @transform_1(%arg0: i32, %arg1: i32, %arg2: i32) -> (i32, i32) {
    %c0_i32 = arith.constant 0 : i32
    return %arg2, %arg1 : i32, i32
  }
  func.func @transform_2(%arg0: i32, %arg1: i32, %arg2: i32) -> (i32, i32) {
    %c0_i32 = arith.constant 0 : i32
    %c0_i32_0 = arith.constant 0 : i32
    return %c0_i32, %arg1 : i32, i32
  }
  func.func @transform_3(%arg0: i32, %arg1: i32, %arg2: i32) -> (i32, i32) {
    %c0_i32 = arith.constant 0 : i32
    return %arg0, %arg1 : i32, i32
  }
}

module attributes {stable_mosaic.version = 11 : i64} {
  func.func @_dense_kernel(%arg0: i32, %arg1: i32, %arg2: i32, %arg3: memref<64x32xbf16, #tpu.memory_space<vmem>>, %arg4: memref<32x128xbf16, #tpu.memory_space<vmem>>, %arg5: memref<1x32xf32, #tpu.memory_space<vmem>>, %arg6: memref<1x32xf32, #tpu.memory_space<vmem>>, %arg7: memref<1x128xf32, #tpu.memory_space<vmem>>, %arg8: memref<64x128xbf16, #tpu.memory_space<vmem>>, %arg9: memref<64x128xf32, #tpu.memory_space<vmem>>) attributes {dimension_semantics = [#tpu.dimension_semantics<parallel>, #tpu.dimension_semantics<parallel>, #tpu.dimension_semantics<arbitrary>], iteration_bounds = array<i64: 2, 1, 1>, scalar_prefetch = 0 : i64, scratch_operands = 1 : i64, tpu.core_type = #tpu.core_type<tc>, window_params = [{transform_indices = @transform_0, window_bounds = array<i64: 64, 32>}, {transform_indices = @transform_1, window_bounds = array<i64: 32, 128>}, {pipeline_mode = #tpu.pipeline_mode<synchronous>, transform_indices = @transform_2, window_bounds = array<i64: 1, 32>}, {pipeline_mode = #tpu.pipeline_mode<synchronous>, transform_indices = @transform_3, window_bounds = array<i64: 1, 32>}, {transform_indices = @transform_4, window_bounds = array<i64: 1, 128>}, {transform_indices = @transform_5, window_bounds = array<i64: 64, 128>}]} {
    %c0_i32 = arith.constant 0 : i32
    %0 = arith.cmpi eq, %arg2, %c0_i32 : i32
    %1 = arith.extui %0 : i1 to i32
    %c0_i32_0 = arith.constant 0 : i32
    %2 = arith.cmpi ne, %1, %c0_i32_0 : i32
    scf.if %2 {
      %cst_19 = arith.constant 0.000000e+00 : f32
      %38 = vector.broadcast %cst_19 : f32 to vector<64x128xf32>
      %c0_20 = arith.constant 0 : index
      %c0_21 = arith.constant 0 : index
      %39 = vector.load %arg9[%c0_20, %c0_21] : memref<64x128xf32, #tpu.memory_space<vmem>>, vector<64x128xf32>
      tpu.vector_store %arg9[%c0_20, %c0_21], %38 {strides = array<i32>} : memref<64x128xf32, #tpu.memory_space<vmem>>, vector<64x128xf32>,
    } else {
    }
    %c0 = arith.constant 0 : index
    %c0_1 = arith.constant 0 : index
    %3 = vector.load %arg3[%c0, %c0_1] : memref<64x32xbf16, #tpu.memory_space<vmem>>, vector<64x32xbf16>
    %4 = arith.extf %3 : vector<64x32xbf16> to vector<64x32xf32>
    %cst = arith.constant dense<0.000000e+00> : vector<64xf32>
    %5 = vector.multi_reduction <add>, %4, %cst [1] : vector<64x32xf32> to vector<64xf32>
    %6 = vector.shape_cast %5 : vector<64xf32> to vector<64x1xf32>
    %cst_2 = arith.constant 3.200000e+01 : f32
    %7 = vector.broadcast %cst_2 : f32 to vector<64x1xf32>
    %8 = arith.divf %6, %7 : vector<64x1xf32>
    %9 = vector.broadcast %8 : vector<64x1xf32> to vector<64x32xf32>
    %10 = arith.subf %4, %9 : vector<64x32xf32>
    %11 = arith.mulf %10, %10 : vector<64x32xf32>
    %cst_3 = arith.constant dense<0.000000e+00> : vector<64xf32>
    %12 = vector.multi_reduction <add>, %11, %cst_3 [1] : vector<64x32xf32> to vector<64xf32>
    %13 = vector.shape_cast %12 : vector<64xf32> to vector<64x1xf32>
    %cst_4 = arith.constant 3.200000e+01 : f32
    %14 = vector.broadcast %cst_4 : f32 to vector<64x1xf32>
    %15 = arith.divf %13, %14 : vector<64x1xf32>
    %16 = vector.broadcast %8 : vector<64x1xf32> to vector<64x32xf32>
    %17 = arith.subf %4, %16 : vector<64x32xf32>
    %cst_5 = arith.constant 9.99999974E-6 : f32
    %18 = vector.broadcast %cst_5 : f32 to vector<64x1xf32>
    %19 = arith.addf %15, %18 : vector<64x1xf32>
    %20 = math.rsqrt %19 : vector<64x1xf32>
    %21 = vector.broadcast %20 : vector<64x1xf32> to vector<64x32xf32>
    %22 = arith.mulf %17, %21 : vector<64x32xf32>
    %c0_6 = arith.constant 0 : index
    %c0_7 = arith.constant 0 : index
    %23 = vector.load %arg5[%c0_6, %c0_7] : memref<1x32xf32, #tpu.memory_space<vmem>>, vector<1x32xf32>
    %24 = vector.broadcast %23 : vector<1x32xf32> to vector<64x32xf32>
    %25 = arith.mulf %22, %24 : vector<64x32xf32>
    %c0_8 = arith.constant 0 : index
    %c0_9 = arith.constant 0 : index
    %26 = vector.load %arg6[%c0_8, %c0_9] : memref<1x32xf32, #tpu.memory_space<vmem>>, vector<1x32xf32>
    %27 = vector.broadcast %26 : vector<1x32xf32> to vector<64x32xf32>
    %28 = arith.addf %25, %27 : vector<64x32xf32>
    %29 = arith.truncf %28 : vector<64x32xf32> to vector<64x32xbf16>
    %c0_10 = arith.constant 0 : index
    %c0_11 = arith.constant 0 : index
    %30 = vector.load %arg9[%c0_10, %c0_11] : memref<64x128xf32, #tpu.memory_space<vmem>>, vector<64x128xf32>
    %c0_12 = arith.constant 0 : index
    %c0_13 = arith.constant 0 : index
    %31 = vector.load %arg4[%c0_12, %c0_13] : memref<32x128xbf16, #tpu.memory_space<vmem>>, vector<32x128xbf16>
    %cst_14 = arith.constant dense<0.000000e+00> : vector<64x128xf32>
    %32 = tpu.matmul %29, %31, %cst_14 {dimension_numbers = #tpu.dot_dimension_numbers<[1], [0], [0], [1], [0, 0, 1, 1], [], []>} : vector<64x32xbf16>, vector<32x128xbf16>, vector<64x128xf32> -> vector<64x128xf32>
    %33 = arith.addf %30, %32 : vector<64x128xf32>
    %c0_15 = arith.constant 0 : index
    %c0_16 = arith.constant 0 : index
    %34 = vector.load %arg9[%c0_15, %c0_16] : memref<64x128xf32, #tpu.memory_space<vmem>>, vector<64x128xf32>
    tpu.vector_store %arg9[%c0_15, %c0_16], %33 {strides = array<i32>} : memref<64x128xf32, #tpu.memory_space<vmem>>, vector<64x128xf32>,
    %c0_i32_17 = arith.constant 0 : i32
    %35 = arith.cmpi eq, %arg2, %c0_i32_17 : i32
    %36 = arith.extui %35 : i1 to i32
    %c0_i32_18 = arith.constant 0 : i32
    %37 = arith.cmpi ne, %36, %c0_i32_18 : i32
    scf.if %37 {
      %c0_19 = arith.constant 0 : index
      %c0_20 = arith.constant 0 : index
      %38 = vector.load %arg9[%c0_19, %c0_20] : memref<64x128xf32, #tpu.memory_space<vmem>>, vector<64x128xf32>
      %c0_21 = arith.constant 0 : index
      %c0_22 = arith.constant 0 : index
      %39 = vector.load %arg7[%c0_21, %c0_22] : memref<1x128xf32, #tpu.memory_space<vmem>>, vector<1x128xf32>
      %40 = vector.broadcast %39 : vector<1x128xf32> to vector<64x128xf32>
      %41 = arith.addf %38, %40 : vector<64x128xf32>
      %42 = arith.truncf %41 : vector<64x128xf32> to vector<64x128xbf16>
      %c0_23 = arith.constant 0 : index
      %c0_24 = arith.constant 0 : index
      %43 = vector.load %arg8[%c0_23, %c0_24] : memref<64x128xbf16, #tpu.memory_space<vmem>>, vector<64x128xbf16>
      tpu.vector_store %arg8[%c0_23, %c0_24], %42 {strides = array<i32>} : memref<64x128xbf16, #tpu.memory_space<vmem>>, vector<64x128xbf16>,
    } else {
    }
    return
  }
  func.func @transform_0(%arg0: i32, %arg1: i32, %arg2: i32) -> (i32, i32) {
    %c0_i32 = arith.constant 0 : i32
    return %arg0, %arg2 : i32, i32
  }
  func.func @transform_1(%arg0: i32, %arg1: i32, %arg2: i32) -> (i32, i32) {
    %c0_i32 = arith.constant 0 : i32
    return %arg2, %arg1 : i32, i32
  }
  func.func @transform_2(%arg0: i32, %arg1: i32, %arg2: i32) -> (i32, i32) {
    %c0_i32 = arith.constant 0 : i32
    %c0_i32_0 = arith.constant 0 : i32
    %c0_i32_1 = arith.constant 0 : i32
    return %c0_i32, %c0_i32_0 : i32, i32
  }
  func.func @transform_3(%arg0: i32, %arg1: i32, %arg2: i32) -> (i32, i32) {
    %c0_i32 = arith.constant 0 : i32
    %c0_i32_0 = arith.constant 0 : i32
    %c0_i32_1 = arith.constant 0 : i32
    return %c0_i32, %c0_i32_0 : i32, i32
  }
  func.func @transform_4(%arg0: i32, %arg1: i32, %arg2: i32) -> (i32, i32) {
    %c0_i32 = arith.constant 0 : i32
    %c0_i32_0 = arith.constant 0 : i32
    return %c0_i32, %arg1 : i32, i32
  }
  func.func @transform_5(%arg0: i32, %arg1: i32, %arg2: i32) -> (i32, i32) {
    %c0_i32 = arith.constant 0 : i32
    return %arg0, %arg1 : i32, i32
  }
}

module attributes {stable_mosaic.version = 11 : i64} {
  func.func @_dense_kernel(%arg0: i32, %arg1: i32, %arg2: i32, %arg3: memref<64x32xbf16, #tpu.memory_space<vmem>>, %arg4: memref<32x128xbf16, #tpu.memory_space<vmem>>, %arg5: memref<1x32xf32, #tpu.memory_space<vmem>>, %arg6: memref<1x32xf32, #tpu.memory_space<vmem>>, %arg7: memref<1x128xf32, #tpu.memory_space<vmem>>, %arg8: memref<64x128xbf16, #tpu.memory_space<vmem>>, %arg9: memref<64x128xf32, #tpu.memory_space<vmem>>) attributes {dimension_semantics = [#tpu.dimension_semantics<parallel>, #tpu.dimension_semantics<parallel>, #tpu.dimension_semantics<arbitrary>], iteration_bounds = array<i64: 2, 1, 1>, scalar_prefetch = 0 : i64, scratch_operands = 1 : i64, tpu.core_type = #tpu.core_type<tc>, window_params = [{transform_indices = @transform_0, window_bounds = array<i64: 64, 32>}, {transform_indices = @transform_1, window_bounds = array<i64: 32, 128>}, {pipeline_mode = #tpu.pipeline_mode<synchronous>, transform_indices = @transform_2, window_bounds = array<i64: 1, 32>}, {pipeline_mode = #tpu.pipeline_mode<synchronous>, transform_indices = @transform_3, window_bounds = array<i64: 1, 32>}, {transform_indices = @transform_4, window_bounds = array<i64: 1, 128>}, {transform_indices = @transform_5, window_bounds = array<i64: 64, 128>}]} {
    %c0_i32 = arith.constant 0 : i32
    %0 = arith.cmpi eq, %arg2, %c0_i32 : i32
    %1 = arith.extui %0 : i1 to i32
    %c0_i32_0 = arith.constant 0 : i32
    %2 = arith.cmpi ne, %1, %c0_i32_0 : i32
    scf.if %2 {
      %cst_19 = arith.constant 0.000000e+00 : f32
      %38 = vector.broadcast %cst_19 : f32 to vector<64x128xf32>
      %c0_20 = arith.constant 0 : index
      %c0_21 = arith.constant 0 : index
      %39 = vector.load %arg9[%c0_20, %c0_21] : memref<64x128xf32, #tpu.memory_space<vmem>>, vector<64x128xf32>
      tpu.vector_store %arg9[%c0_20, %c0_21], %38 {strides = array<i32>} : memref<64x128xf32, #tpu.memory_space<vmem>>, vector<64x128xf32>,
    } else {
    }
    %c0 = arith.constant 0 : index
    %c0_1 = arith.constant 0 : index
    %3 = vector.load %arg3[%c0, %c0_1] : memref<64x32xbf16, #tpu.memory_space<vmem>>, vector<64x32xbf16>
    %4 = arith.extf %3 : vector<64x32xbf16> to vector<64x32xf32>
    %cst = arith.constant dense<0.000000e+00> : vector<64xf32>
    %5 = vector.multi_reduction <add>, %4, %cst [1] : vector<64x32xf32> to vector<64xf32>
    %6 = vector.shape_cast %5 : vector<64xf32> to vector<64x1xf32>
    %cst_2 = arith.constant 3.200000e+01 : f32
    %7 = vector.broadcast %cst_2 : f32 to vector<64x1xf32>
    %8 = arith.divf %6, %7 : vector<64x1xf32>
    %9 = vector.broadcast %8 : vector<64x1xf32> to vector<64x32xf32>
    %10 = arith.subf %4, %9 : vector<64x32xf32>
    %11 = arith.mulf %10, %10 : vector<64x32xf32>
    %cst_3 = arith.constant dense<0.000000e+00> : vector<64xf32>
    %12 = vector.multi_reduction <add>, %11, %cst_3 [1] : vector<64x32xf32> to vector<64xf32>
    %13 = vector.shape_cast %12 : vector<64xf32> to vector<64x1xf32>
    %cst_4 = arith.constant 3.200000e+01 : f32
    %14 = vector.broadcast %cst_4 : f32 to vector<64x1xf32>
    %15 = arith.divf %13, %14 : vector<64x1xf32>
    %16 = vector.broadcast %8 : vector<64x1xf32> to vector<64x32xf32>
    %17 = arith.subf %4, %16 : vector<64x32xf32>
    %cst_5 = arith.constant 9.99999974E-6 : f32
    %18 = vector.broadcast %cst_5 : f32 to vector<64x1xf32>
    %19 = arith.addf %15, %18 : vector<64x1xf32>
    %20 = math.rsqrt %19 : vector<64x1xf32>
    %21 = vector.broadcast %20 : vector<64x1xf32> to vector<64x32xf32>
    %22 = arith.mulf %17, %21 : vector<64x32xf32>
    %c0_6 = arith.constant 0 : index
    %c0_7 = arith.constant 0 : index
    %23 = vector.load %arg5[%c0_6, %c0_7] : memref<1x32xf32, #tpu.memory_space<vmem>>, vector<1x32xf32>
    %24 = vector.broadcast %23 : vector<1x32xf32> to vector<64x32xf32>
    %25 = arith.mulf %22, %24 : vector<64x32xf32>
    %c0_8 = arith.constant 0 : index
    %c0_9 = arith.constant 0 : index
    %26 = vector.load %arg6[%c0_8, %c0_9] : memref<1x32xf32, #tpu.memory_space<vmem>>, vector<1x32xf32>
    %27 = vector.broadcast %26 : vector<1x32xf32> to vector<64x32xf32>
    %28 = arith.addf %25, %27 : vector<64x32xf32>
    %29 = arith.truncf %28 : vector<64x32xf32> to vector<64x32xbf16>
    %c0_10 = arith.constant 0 : index
    %c0_11 = arith.constant 0 : index
    %30 = vector.load %arg9[%c0_10, %c0_11] : memref<64x128xf32, #tpu.memory_space<vmem>>, vector<64x128xf32>
    %c0_12 = arith.constant 0 : index
    %c0_13 = arith.constant 0 : index
    %31 = vector.load %arg4[%c0_12, %c0_13] : memref<32x128xbf16, #tpu.memory_space<vmem>>, vector<32x128xbf16>
    %cst_14 = arith.constant dense<0.000000e+00> : vector<64x128xf32>
    %32 = tpu.matmul %29, %31, %cst_14 {dimension_numbers = #tpu.dot_dimension_numbers<[1], [0], [0], [1], [0, 0, 1, 1], [], []>} : vector<64x32xbf16>, vector<32x128xbf16>, vector<64x128xf32> -> vector<64x128xf32>
    %33 = arith.addf %30, %32 : vector<64x128xf32>
    %c0_15 = arith.constant 0 : index
    %c0_16 = arith.constant 0 : index
    %34 = vector.load %arg9[%c0_15, %c0_16] : memref<64x128xf32, #tpu.memory_space<vmem>>, vector<64x128xf32>
    tpu.vector_store %arg9[%c0_15, %c0_16], %33 {strides = array<i32>} : memref<64x128xf32, #tpu.memory_space<vmem>>, vector<64x128xf32>,
    %c0_i32_17 = arith.constant 0 : i32
    %35 = arith.cmpi eq, %arg2, %c0_i32_17 : i32
    %36 = arith.extui %35 : i1 to i32
    %c0_i32_18 = arith.constant 0 : i32
    %37 = arith.cmpi ne, %36, %c0_i32_18 : i32
    scf.if %37 {
      %c0_19 = arith.constant 0 : index
      %c0_20 = arith.constant 0 : index
      %38 = vector.load %arg9[%c0_19, %c0_20] : memref<64x128xf32, #tpu.memory_space<vmem>>, vector<64x128xf32>
      %c0_21 = arith.constant 0 : index
      %c0_22 = arith.constant 0 : index
      %39 = vector.load %arg7[%c0_21, %c0_22] : memref<1x128xf32, #tpu.memory_space<vmem>>, vector<1x128xf32>
      %40 = vector.broadcast %39 : vector<1x128xf32> to vector<64x128xf32>
      %41 = arith.addf %38, %40 : vector<64x128xf32>
      %42 = arith.mulf %41, %41 : vector<64x128xf32>
      %43 = arith.mulf %41, %42 : vector<64x128xf32>
      %cst_23 = arith.constant 4.471500e-02 : f32
      %44 = vector.broadcast %cst_23 : f32 to vector<64x128xf32>
      %45 = arith.mulf %44, %43 : vector<64x128xf32>
      %46 = arith.addf %41, %45 : vector<64x128xf32>
      %cst_24 = arith.constant 0.797884583 : f32
      %47 = vector.broadcast %cst_24 : f32 to vector<64x128xf32>
      %48 = arith.mulf %47, %46 : vector<64x128xf32>
      %49 = math.tanh %48 : vector<64x128xf32>
      %cst_25 = arith.constant 1.000000e+00 : f32
      %50 = vector.broadcast %cst_25 : f32 to vector<64x128xf32>
      %51 = arith.addf %50, %49 : vector<64x128xf32>
      %cst_26 = arith.constant 5.000000e-01 : f32
      %52 = vector.broadcast %cst_26 : f32 to vector<64x128xf32>
      %53 = arith.mulf %52, %51 : vector<64x128xf32>
      %54 = arith.mulf %41, %53 : vector<64x128xf32>
      %55 = arith.truncf %54 : vector<64x128xf32> to vector<64x128xbf16>
      %c0_27 = arith.constant 0 : index
      %c0_28 = arith.constant 0 : index
      %56 = vector.load %arg8[%c0_27, %c0_28] : memref<64x128xbf16, #tpu.memory_space<vmem>>, vector<64x128xbf16>
      tpu.vector_store %arg8[%c0_27, %c0_28], %55 {strides = array<i32>} : memref<64x128xbf16, #tpu.memory_space<vmem>>, vector<64x128xbf16>,
    } else {
    }
    return
  }
  func.func @transform_0(%arg0: i32, %arg1: i32, %arg2: i32) -> (i32, i32) {
    %c0_i32 = arith.constant 0 : i32
    return %arg0, %arg2 : i32, i32
  }
  func.func @transform_1(%arg0: i32, %arg1: i32, %arg2: i32) -> (i32, i32) {
    %c0_i32 = arith.constant 0 : i32
    return %arg2, %arg1 : i32, i32
  }
  func.func @transform_2(%arg0: i32, %arg1: i32, %arg2: i32) -> (i32, i32) {
    %c0_i32 = arith.constant 0 : i32
    %c0_i32_0 = arith.constant 0 : i32
    %c0_i32_1 = arith.constant 0 : i32
    return %c0_i32, %c0_i32_0 : i32, i32
  }
  func.func @transform_3(%arg0: i32, %arg1: i32, %arg2: i32) -> (i32, i32) {
    %c0_i32 = arith.constant 0 : i32
    %c0_i32_0 = arith.constant 0 : i32
    %c0_i32_1 = arith.constant 0 : i32
    return %c0_i32, %c0_i32_0 : i32, i32
  }
  func.func @transform_4(%arg0: i32, %arg1: i32, %arg2: i32) -> (i32, i32) {
    %c0_i32 = arith.constant 0 : i32
    %c0_i32_0 = arith.constant 0 : i32
    return %c0_i32, %arg1 : i32, i32
  }
  func.func @transform_5(%arg0: i32, %arg1: i32, %arg2: i32) -> (i32, i32) {
    %c0_i32 = arith.constant 0 : i32
    return %arg0, %arg1 : i32, i32
  }
}

module attributes {stable_mosaic.version = 11 : i64} {
  func.func @_dense_kernel(%arg0: i32, %arg1: i32, %arg2: i32, %arg3: memref<64x32xbf16, #tpu.memory_space<vmem>>, %arg4: memref<32x128xbf16, #tpu.memory_space<vmem>>, %arg5: memref<1x128xf32, #tpu.memory_space<vmem>>, %arg6: memref<64x128xbf16, #tpu.memory_space<vmem>>, %arg7: memref<64x128xbf16, #tpu.memory_space<vmem>>, %arg8: memref<64x128xf32, #tpu.memory_space<vmem>>) attributes {dimension_semantics = [#tpu.dimension_semantics<parallel>, #tpu.dimension_semantics<parallel>, #tpu.dimension_semantics<arbitrary>], iteration_bounds = array<i64: 2, 1, 1>, scalar_prefetch = 0 : i64, scratch_operands = 1 : i64, tpu.core_type = #tpu.core_type<tc>, window_params = [{transform_indices = @transform_0, window_bounds = array<i64: 64, 32>}, {transform_indices = @transform_1, window_bounds = array<i64: 32, 128>}, {transform_indices = @transform_2, window_bounds = array<i64: 1, 128>}, {transform_indices = @transform_3, window_bounds = array<i64: 64, 128>}, {transform_indices = @transform_4, window_bounds = array<i64: 64, 128>}]} {
    %c0_i32 = arith.constant 0 : i32
    %0 = arith.cmpi eq, %arg2, %c0_i32 : i32
    %1 = arith.extui %0 : i1 to i32
    %c0_i32_0 = arith.constant 0 : i32
    %2 = arith.cmpi ne, %1, %c0_i32_0 : i32
    scf.if %2 {
      %cst_10 = arith.constant 0.000000e+00 : f32
      %12 = vector.broadcast %cst_10 : f32 to vector<64x128xf32>
      %c0_11 = arith.constant 0 : index
      %c0_12 = arith.constant 0 : index
      %13 = vector.load %arg8[%c0_11, %c0_12] : memref<64x128xf32, #tpu.memory_space<vmem>>, vector<64x128xf32>
      tpu.vector_store %arg8[%c0_11, %c0_12], %12 {strides = array<i32>} : memref<64x128xf32, #tpu.memory_space<vmem>>, vector<64x128xf32>,
    } else {
    }
    %c0 = arith.constant 0 : index
    %c0_1 = arith.constant 0 : index
    %3 = vector.load %arg3[%c0, %c0_1] : memref<64x32xbf16, #tpu.memory_space<vmem>>, vector<64x32xbf16>
    %c0_2 = arith.constant 0 : index
    %c0_3 = arith.constant 0 : index
    %4 = vector.load %arg8[%c0_2, %c0_3] : memref<64x128xf32, #tpu.memory_space<vmem>>, vector<64x128xf32>
    %c0_4 = arith.constant 0 : index
    %c0_5 = arith.constant 0 : index
    %5 = vector.load %arg4[%c0_4, %c0_5] : memref<32x128xbf16, #tpu.memory_space<vmem>>, vector<32x128xbf16>
    %cst = arith.constant dense<0.000000e+00> : vector<64x128xf32>
    %6 = tpu.matmul %3, %5, %cst {dimension_numbers = #tpu.dot_dimension_numbers<[1], [0], [0], [1], [0, 0, 1, 1], [], []>} : vector<64x32xbf16>, vector<32x128xbf16>, vector<64x128xf32> -> vector<64x128xf32>
    %7 = arith.addf %4, %6 : vector<64x128xf32>
    %c0_6 = arith.constant 0 : index
    %c0_7 = arith.constant 0 : index
    %8 = vector.load %arg8[%c0_6, %c0_7] : memref<64x128xf32, #tpu.memory_space<vmem>>, vector<64x128xf32>
    tpu.vector_store %arg8[%c0_6, %c0_7], %7 {strides = array<i32>} : memref<64x128xf32, #tpu.memory_space<vmem>>, vector<64x128xf32>,
    %c0_i32_8 = arith.constant 0 : i32
    %9 = arith.cmpi eq, %arg2, %c0_i32_8 : i32
    %10 = arith.extui %9 : i1 to i32
    %c0_i32_9 = arith.constant 0 : i32
    %11 = arith.cmpi ne, %10, %c0_i32_9 : i32
    scf.if %11 {
      %c0_10 = arith.constant 0 : index
      %c0_11 = arith.constant 0 : index
      %12 = vector.load %arg8[%c0_10, %c0_11] : memref<64x128xf32, #tpu.memory_space<vmem>>, vector<64x128xf32>
      %c0_12 = arith.constant 0 : index
      %c0_13 = arith.constant 0 : index
      %13 = vector.load %arg5[%c0_12, %c0_13] : memref<1x128xf32, #tpu.memory_space<vmem>>, vector<1x128xf32>
      %14 = vector.broadcast %13 : vector<1x128xf32> to vector<64x128xf32>
      %15 = arith.addf %12, %14 : vector<64x128xf32>
      %c0_14 = arith.constant 0 : index
      %c0_15 = arith.constant 0 : index
      %16 = vector.load %arg6[%c0_14, %c0_15] : memref<64x128xbf16, #tpu.memory_space<vmem>>, vector<64x128xbf16>
      %17 = arith.extf %16 : vector<64x128xbf16> to vector<64x128xf32>
      %18 = arith.addf %15, %17 : vector<64x128xf32>
      %19 = arith.truncf %18 : vector<64x128xf32> to vector<64x128xbf16>
      %c0_16 = arith.constant 0 : index
      %c0_17 = arith.constant 0 : index
      %20 = vector.load %arg7[%c0_16, %c0_17] : memref<64x128xbf16, #tpu.memory_space<vmem>>, vector<64x128xbf16>
      tpu.vector_store %arg7[%c0_16, %c0_17], %19 {strides = array<i32>} : memref<64x128xbf16, #tpu.memory_space<vmem>>, vector<64x128xbf16>,
    } else {
    }
    return
  }
  func.func @transform_0(%arg0: i32, %arg1: i32, %arg2: i32) -> (i32, i32) {
    %c0_i32 = arith.constant 0 : i32
    return %arg0, %arg2 : i32, i32
  }
  func.func @transform_1(%arg0: i32, %arg1: i32, %arg2: i32) -> (i32, i32) {
    %c0_i32 = arith.constant 0 : i32
    return %arg2, %arg1 : i32, i32
  }
  func.func @transform_2(%arg0: i32, %arg1: i32, %arg2: i32) -> (i32, i32) {
    %c0_i32 = arith.constant 0 : i32
    %c0_i32_0 = arith.constant 0 : i32
    return %c0_i32, %arg1 : i32, i32
  }
  func.func @transform_3(%arg0: i32, %arg1: i32, %arg2: i32) -> (i32, i32) {
    %c0_i32 = arith.constant 0 : i32
    return %arg0, %arg1 : i32, i32
  }
  func.func @transform_4(%arg0: i32, %arg1: i32, %arg2: i32) -> (i32, i32) {
    %c0_i32 = arith.constant 0 : i32
    return %arg0, %arg1 : i32, i32
  }
}

module attributes {stable_mosaic.version = 11 : i64} {
  func.func @_dense_kernel(%arg0: i32, %arg1: i32, %arg2: i32, %arg3: memref<64x128xbf16, #tpu.memory_space<vmem>>, %arg4: memref<128x128xbf16, #tpu.memory_space<vmem>>, %arg5: memref<1x128xf32, #tpu.memory_space<vmem>>, %arg6: memref<64x128xbf16, #tpu.memory_space<vmem>>, %arg7: memref<64x128xbf16, #tpu.memory_space<vmem>>, %arg8: memref<64x128xf32, #tpu.memory_space<vmem>>) attributes {dimension_semantics = [#tpu.dimension_semantics<parallel>, #tpu.dimension_semantics<parallel>, #tpu.dimension_semantics<arbitrary>], iteration_bounds = array<i64: 2, 1, 1>, scalar_prefetch = 0 : i64, scratch_operands = 1 : i64, tpu.core_type = #tpu.core_type<tc>, window_params = [{transform_indices = @transform_0, window_bounds = array<i64: 64, 128>}, {transform_indices = @transform_1, window_bounds = array<i64: 128, 128>}, {transform_indices = @transform_2, window_bounds = array<i64: 1, 128>}, {transform_indices = @transform_3, window_bounds = array<i64: 64, 128>}, {transform_indices = @transform_4, window_bounds = array<i64: 64, 128>}]} {
    %c0_i32 = arith.constant 0 : i32
    %0 = arith.cmpi eq, %arg2, %c0_i32 : i32
    %1 = arith.extui %0 : i1 to i32
    %c0_i32_0 = arith.constant 0 : i32
    %2 = arith.cmpi ne, %1, %c0_i32_0 : i32
    scf.if %2 {
      %cst_10 = arith.constant 0.000000e+00 : f32
      %12 = vector.broadcast %cst_10 : f32 to vector<64x128xf32>
      %c0_11 = arith.constant 0 : index
      %c0_12 = arith.constant 0 : index
      %13 = vector.load %arg8[%c0_11, %c0_12] : memref<64x128xf32, #tpu.memory_space<vmem>>, vector<64x128xf32>
      tpu.vector_store %arg8[%c0_11, %c0_12], %12 {strides = array<i32>} : memref<64x128xf32, #tpu.memory_space<vmem>>, vector<64x128xf32>,
    } else {
    }
    %c0 = arith.constant 0 : index
    %c0_1 = arith.constant 0 : index
    %3 = vector.load %arg3[%c0, %c0_1] : memref<64x128xbf16, #tpu.memory_space<vmem>>, vector<64x128xbf16>
    %c0_2 = arith.constant 0 : index
    %c0_3 = arith.constant 0 : index
    %4 = vector.load %arg8[%c0_2, %c0_3] : memref<64x128xf32, #tpu.memory_space<vmem>>, vector<64x128xf32>
    %c0_4 = arith.constant 0 : index
    %c0_5 = arith.constant 0 : index
    %5 = vector.load %arg4[%c0_4, %c0_5] : memref<128x128xbf16, #tpu.memory_space<vmem>>, vector<128x128xbf16>
    %cst = arith.constant dense<0.000000e+00> : vector<64x128xf32>
    %6 = tpu.matmul %3, %5, %cst {dimension_numbers = #tpu.dot_dimension_numbers<[1], [0], [0], [1], [0, 0, 1, 1], [], []>} : vector<64x128xbf16>, vector<128x128xbf16>, vector<64x128xf32> -> vector<64x128xf32>
    %7 = arith.addf %4, %6 : vector<64x128xf32>
    %c0_6 = arith.constant 0 : index
    %c0_7 = arith.constant 0 : index
    %8 = vector.load %arg8[%c0_6, %c0_7] : memref<64x128xf32, #tpu.memory_space<vmem>>, vector<64x128xf32>
    tpu.vector_store %arg8[%c0_6, %c0_7], %7 {strides = array<i32>} : memref<64x128xf32, #tpu.memory_space<vmem>>, vector<64x128xf32>,
    %c0_i32_8 = arith.constant 0 : i32
    %9 = arith.cmpi eq, %arg2, %c0_i32_8 : i32
    %10 = arith.extui %9 : i1 to i32
    %c0_i32_9 = arith.constant 0 : i32
    %11 = arith.cmpi ne, %10, %c0_i32_9 : i32
    scf.if %11 {
      %c0_10 = arith.constant 0 : index
      %c0_11 = arith.constant 0 : index
      %12 = vector.load %arg8[%c0_10, %c0_11] : memref<64x128xf32, #tpu.memory_space<vmem>>, vector<64x128xf32>
      %c0_12 = arith.constant 0 : index
      %c0_13 = arith.constant 0 : index
      %13 = vector.load %arg5[%c0_12, %c0_13] : memref<1x128xf32, #tpu.memory_space<vmem>>, vector<1x128xf32>
      %14 = vector.broadcast %13 : vector<1x128xf32> to vector<64x128xf32>
      %15 = arith.addf %12, %14 : vector<64x128xf32>
      %c0_14 = arith.constant 0 : index
      %c0_15 = arith.constant 0 : index
      %16 = vector.load %arg6[%c0_14, %c0_15] : memref<64x128xbf16, #tpu.memory_space<vmem>>, vector<64x128xbf16>
      %17 = arith.extf %16 : vector<64x128xbf16> to vector<64x128xf32>
      %18 = arith.addf %15, %17 : vector<64x128xf32>
      %19 = arith.truncf %18 : vector<64x128xf32> to vector<64x128xbf16>
      %c0_16 = arith.constant 0 : index
      %c0_17 = arith.constant 0 : index
      %20 = vector.load %arg7[%c0_16, %c0_17] : memref<64x128xbf16, #tpu.memory_space<vmem>>, vector<64x128xbf16>
      tpu.vector_store %arg7[%c0_16, %c0_17], %19 {strides = array<i32>} : memref<64x128xbf16, #tpu.memory_space<vmem>>, vector<64x128xbf16>,
    } else {
    }
    return
  }
  func.func @transform_0(%arg0: i32, %arg1: i32, %arg2: i32) -> (i32, i32) {
    %c0_i32 = arith.constant 0 : i32
    return %arg0, %arg2 : i32, i32
  }
  func.func @transform_1(%arg0: i32, %arg1: i32, %arg2: i32) -> (i32, i32) {
    %c0_i32 = arith.constant 0 : i32
    return %arg2, %arg1 : i32, i32
  }
  func.func @transform_2(%arg0: i32, %arg1: i32, %arg2: i32) -> (i32, i32) {
    %c0_i32 = arith.constant 0 : i32
    %c0_i32_0 = arith.constant 0 : i32
    return %c0_i32, %arg1 : i32, i32
  }
  func.func @transform_3(%arg0: i32, %arg1: i32, %arg2: i32) -> (i32, i32) {
    %c0_i32 = arith.constant 0 : i32
    return %arg0, %arg1 : i32, i32
  }
  func.func @transform_4(%arg0: i32, %arg1: i32, %arg2: i32) -> (i32, i32) {
    %c0_i32 = arith.constant 0 : i32
    return %arg0, %arg1 : i32, i32
  }
}

module attributes {stable_mosaic.version = 11 : i64} {
  func.func @_dense_kernel(%arg0: i32, %arg1: i32, %arg2: i32, %arg3: memref<16x32xbf16, #tpu.memory_space<vmem>>, %arg4: memref<32x128xbf16, #tpu.memory_space<vmem>>, %arg5: memref<16x128xf32, #tpu.memory_space<vmem>>, %arg6: memref<16x128xf32, #tpu.memory_space<vmem>>) attributes {dimension_semantics = [#tpu.dimension_semantics<parallel>, #tpu.dimension_semantics<parallel>, #tpu.dimension_semantics<arbitrary>], iteration_bounds = array<i64: 1, 1, 1>, scalar_prefetch = 0 : i64, scratch_operands = 1 : i64, tpu.core_type = #tpu.core_type<tc>, window_params = [{transform_indices = @transform_0, window_bounds = array<i64: 16, 32>}, {transform_indices = @transform_1, window_bounds = array<i64: 32, 128>}, {transform_indices = @transform_2, window_bounds = array<i64: 16, 128>}]} {
    %c0_i32 = arith.constant 0 : i32
    %0 = arith.cmpi eq, %arg2, %c0_i32 : i32
    %1 = arith.extui %0 : i1 to i32
    %c0_i32_0 = arith.constant 0 : i32
    %2 = arith.cmpi ne, %1, %c0_i32_0 : i32
    scf.if %2 {
      %cst_10 = arith.constant 0.000000e+00 : f32
      %12 = vector.broadcast %cst_10 : f32 to vector<16x128xf32>
      %c0_11 = arith.constant 0 : index
      %c0_12 = arith.constant 0 : index
      %13 = vector.load %arg6[%c0_11, %c0_12] : memref<16x128xf32, #tpu.memory_space<vmem>>, vector<16x128xf32>
      tpu.vector_store %arg6[%c0_11, %c0_12], %12 {strides = array<i32>} : memref<16x128xf32, #tpu.memory_space<vmem>>, vector<16x128xf32>,
    } else {
    }
    %c0 = arith.constant 0 : index
    %c0_1 = arith.constant 0 : index
    %3 = vector.load %arg3[%c0, %c0_1] : memref<16x32xbf16, #tpu.memory_space<vmem>>, vector<16x32xbf16>
    %c0_2 = arith.constant 0 : index
    %c0_3 = arith.constant 0 : index
    %4 = vector.load %arg6[%c0_2, %c0_3] : memref<16x128xf32, #tpu.memory_space<vmem>>, vector<16x128xf32>
    %c0_4 = arith.constant 0 : index
    %c0_5 = arith.constant 0 : index
    %5 = vector.load %arg4[%c0_4, %c0_5] : memref<32x128xbf16, #tpu.memory_space<vmem>>, vector<32x128xbf16>
    %cst = arith.constant dense<0.000000e+00> : vector<16x128xf32>
    %6 = tpu.matmul %3, %5, %cst {dimension_numbers = #tpu.dot_dimension_numbers<[1], [0], [0], [1], [0, 0, 1, 1], [], []>} : vector<16x32xbf16>, vector<32x128xbf16>, vector<16x128xf32> -> vector<16x128xf32>
    %7 = arith.addf %4, %6 : vector<16x128xf32>
    %c0_6 = arith.constant 0 : index
    %c0_7 = arith.constant 0 : index
    %8 = vector.load %arg6[%c0_6, %c0_7] : memref<16x128xf32, #tpu.memory_space<vmem>>, vector<16x128xf32>
    tpu.vector_store %arg6[%c0_6, %c0_7], %7 {strides = array<i32>} : memref<16x128xf32, #tpu.memory_space<vmem>>, vector<16x128xf32>,
    %c0_i32_8 = arith.constant 0 : i32
    %9 = arith.cmpi eq, %arg2, %c0_i32_8 : i32
    %10 = arith.extui %9 : i1 to i32
    %c0_i32_9 = arith.constant 0 : i32
    %11 = arith.cmpi ne, %10, %c0_i32_9 : i32
    scf.if %11 {
      %c0_10 = arith.constant 0 : index
      %c0_11 = arith.constant 0 : index
      %12 = vector.load %arg6[%c0_10, %c0_11] : memref<16x128xf32, #tpu.memory_space<vmem>>, vector<16x128xf32>
      %13 = arith.mulf %12, %12 : vector<16x128xf32>
      %cst_12 = arith.constant dense<0.000000e+00> : vector<16xf32>
      %14 = vector.multi_reduction <add>, %13, %cst_12 [1] : vector<16x128xf32> to vector<16xf32>
      %15 = vector.shape_cast %14 : vector<16xf32> to vector<16x1xf32>
      %cst_13 = arith.constant 1.000000e-30 : f32
      %16 = vector.broadcast %cst_13 : f32 to vector<16x1xf32>
      %17 = arith.maximumf %15, %16 : vector<16x1xf32>
      %18 = math.rsqrt %17 : vector<16x1xf32>
      %19 = vector.broadcast %18 : vector<16x1xf32> to vector<16x128xf32>
      %20 = arith.mulf %12, %19 : vector<16x128xf32>
      %c0_14 = arith.constant 0 : index
      %c0_15 = arith.constant 0 : index
      %21 = vector.load %arg5[%c0_14, %c0_15] : memref<16x128xf32, #tpu.memory_space<vmem>>, vector<16x128xf32>
      tpu.vector_store %arg5[%c0_14, %c0_15], %20 {strides = array<i32>} : memref<16x128xf32, #tpu.memory_space<vmem>>, vector<16x128xf32>,
    } else {
    }
    return
  }
  func.func @transform_0(%arg0: i32, %arg1: i32, %arg2: i32) -> (i32, i32) {
    %c0_i32 = arith.constant 0 : i32
    return %arg0, %arg2 : i32, i32
  }
  func.func @transform_1(%arg0: i32, %arg1: i32, %arg2: i32) -> (i32, i32) {
    %c0_i32 = arith.constant 0 : i32
    return %arg2, %arg1 : i32, i32
  }
  func.func @transform_2(%arg0: i32, %arg1: i32, %arg2: i32) -> (i32, i32) {
    %c0_i32 = arith.constant 0 : i32
    return %arg0, %arg1 : i32, i32
  }
}

module attributes {stable_mosaic.version = 11 : i64} {
  func.func @_dense_kernel(%arg0: i32, %arg1: i32, %arg2: i32, %arg3: memref<16x32xbf16, #tpu.memory_space<vmem>>, %arg4: memref<32x128xbf16, #tpu.memory_space<vmem>>, %arg5: memref<16x128xf32, #tpu.memory_space<vmem>>, %arg6: memref<16x128xf32, #tpu.memory_space<vmem>>) attributes {dimension_semantics = [#tpu.dimension_semantics<parallel>, #tpu.dimension_semantics<parallel>, #tpu.dimension_semantics<arbitrary>], iteration_bounds = array<i64: 1, 1, 1>, scalar_prefetch = 0 : i64, scratch_operands = 1 : i64, tpu.core_type = #tpu.core_type<tc>, window_params = [{transform_indices = @transform_0, window_bounds = array<i64: 16, 32>}, {transform_indices = @transform_1, window_bounds = array<i64: 32, 128>}, {transform_indices = @transform_2, window_bounds = array<i64: 16, 128>}]} {
    %c0_i32 = arith.constant 0 : i32
    %0 = arith.cmpi eq, %arg2, %c0_i32 : i32
    %1 = arith.extui %0 : i1 to i32
    %c0_i32_0 = arith.constant 0 : i32
    %2 = arith.cmpi ne, %1, %c0_i32_0 : i32
    scf.if %2 {
      %cst_10 = arith.constant 0.000000e+00 : f32
      %12 = vector.broadcast %cst_10 : f32 to vector<16x128xf32>
      %c0_11 = arith.constant 0 : index
      %c0_12 = arith.constant 0 : index
      %13 = vector.load %arg6[%c0_11, %c0_12] : memref<16x128xf32, #tpu.memory_space<vmem>>, vector<16x128xf32>
      tpu.vector_store %arg6[%c0_11, %c0_12], %12 {strides = array<i32>} : memref<16x128xf32, #tpu.memory_space<vmem>>, vector<16x128xf32>,
    } else {
    }
    %c0 = arith.constant 0 : index
    %c0_1 = arith.constant 0 : index
    %3 = vector.load %arg3[%c0, %c0_1] : memref<16x32xbf16, #tpu.memory_space<vmem>>, vector<16x32xbf16>
    %c0_2 = arith.constant 0 : index
    %c0_3 = arith.constant 0 : index
    %4 = vector.load %arg6[%c0_2, %c0_3] : memref<16x128xf32, #tpu.memory_space<vmem>>, vector<16x128xf32>
    %c0_4 = arith.constant 0 : index
    %c0_5 = arith.constant 0 : index
    %5 = vector.load %arg4[%c0_4, %c0_5] : memref<32x128xbf16, #tpu.memory_space<vmem>>, vector<32x128xbf16>
    %cst = arith.constant dense<0.000000e+00> : vector<16x128xf32>
    %6 = tpu.matmul %3, %5, %cst {dimension_numbers = #tpu.dot_dimension_numbers<[1], [0], [0], [1], [0, 0, 1, 1], [], []>} : vector<16x32xbf16>, vector<32x128xbf16>, vector<16x128xf32> -> vector<16x128xf32>
    %7 = arith.addf %4, %6 : vector<16x128xf32>
    %c0_6 = arith.constant 0 : index
    %c0_7 = arith.constant 0 : index
    %8 = vector.load %arg6[%c0_6, %c0_7] : memref<16x128xf32, #tpu.memory_space<vmem>>, vector<16x128xf32>
    tpu.vector_store %arg6[%c0_6, %c0_7], %7 {strides = array<i32>} : memref<16x128xf32, #tpu.memory_space<vmem>>, vector<16x128xf32>,
    %c0_i32_8 = arith.constant 0 : i32
    %9 = arith.cmpi eq, %arg2, %c0_i32_8 : i32
    %10 = arith.extui %9 : i1 to i32
    %c0_i32_9 = arith.constant 0 : i32
    %11 = arith.cmpi ne, %10, %c0_i32_9 : i32
    scf.if %11 {
      %c0_10 = arith.constant 0 : index
      %c0_11 = arith.constant 0 : index
      %12 = vector.load %arg6[%c0_10, %c0_11] : memref<16x128xf32, #tpu.memory_space<vmem>>, vector<16x128xf32>
      %c0_12 = arith.constant 0 : index
      %c0_13 = arith.constant 0 : index
      %13 = vector.load %arg5[%c0_12, %c0_13] : memref<16x128xf32, #tpu.memory_space<vmem>>, vector<16x128xf32>
      tpu.vector_store %arg5[%c0_12, %c0_13], %12 {strides = array<i32>} : memref<16x128xf32, #tpu.memory_space<vmem>>, vector<16x128xf32>,
    } else {
    }
    return
  }
  func.func @transform_0(%arg0: i32, %arg1: i32, %arg2: i32) -> (i32, i32) {
    %c0_i32 = arith.constant 0 : i32
    return %arg0, %arg2 : i32, i32
  }
  func.func @transform_1(%arg0: i32, %arg1: i32, %arg2: i32) -> (i32, i32) {
    %c0_i32 = arith.constant 0 : i32
    return %arg2, %arg1 : i32, i32
  }
  func.func @transform_2(%arg0: i32, %arg1: i32, %arg2: i32) -> (i32, i32) {
    %c0_i32 = arith.constant 0 : i32
    return %arg0, %arg1 : i32, i32
  }
}

</mosaic_0001>

<bundles_post_ra>
// kernel: dvae_clip_forward.28
= control target key start
LH: loop header
LB: loop body
LE: loop exit
PB: predicated region body
PF: predicated region fallthrough
CT: control target
= control target key end

     0   :  { %vm31_vm0 = vcmask 261120   ;;  %v184_v5 = vmov 32.0   ;;  %s241_s0 = inlined_call_operand.vmem [shape: bf16[16,32], index: 0, kind: input, shape index: {}]   ;;  %s242_s2 = inlined_call_operand.vmem [shape: f32[1,32], index: 2, kind: input, shape index: {}]   ;;  %s243_s3 = inlined_call_operand.vmem [shape: f32[1,32], index: 3, kind: input, shape index: {}]   ;;  %s244_s4 = inlined_call_operand.vmem [shape: f32[1,128], index: 4, kind: input, shape index: {}]   ;;  %s245_s1 = inlined_call_operand.vmem [shape: bf16[32,128], index: 1, kind: input, shape index: {}]   ;;  %s246_s5 = inlined_call_operand.vmem [shape: bf16[16,128], index: 5, kind: output, shape index: {}]  }
   0x1   :  { %v166_v0 = vld [vmem:[%s241_s0] sm:$0xff]   ;;  %178 = vrcp.f32 %v184_v5  ;;  %v164_v22 = vld [vmem:[%s245_s1 + $0x8] sm:$0xff] }
   0x2   :  { %v167_v1 = vunpack.c.l.bf16 %v166_v0  ;;  %v168_v3 = vunpack.c.h.bf16 %v166_v0  ;;  %123 = vmatpush.bf16.msra.mxu0 %v164_v22  ;;  %v163_v24 = vld [vmem:[%s245_s1] sm:$0xff] }
   0x3   :  { %v175_v43 = vld [vmem:[%s242_s2] ss:$0 sm:$0xff] }
   0x4   :  { %v32_v2 = vsel %vm31_vm0, %v167_v1, 0.0  ;;  %v35_v4 = vsel %vm31_vm0, %v168_v3, 0.0  ;;  %v176_v48 = vld [vmem:[%s243_s3] ss:$0 sm:$0xff] }
   0x5   :  { %33 = vadd.xlane.f32.xlu0 %v32_v2  ;;  %v177_v54 = vld [vmem:[%s244_s4] ss:$0 sm:$0xff] }
   0x6   :  { %124 = vmatpush.bf16.msra.mxu0 %v163_v24 }
   0x7   :  { %v179_v6 = vpop.eup %178 }
   0x8   :  { %v39_v7 = vmul.f32 32.0, %v179_v6  ;;  %vm43_vm1 = vweird.f32 %v179_v6 }
   0xa   :  { %v40_v8 = vsub.f32 1.0, %v39_v7 }
   0xc   :  { %v41_v9 = vmul.f32 %v179_v6, %v40_v8 }
   0xd   :  { %36 = vadd.xlane.f32.xlu0 %v35_v4 }
   0xe   :  { %v42_v10 = vadd.f32 %v179_v6, %v41_v9 }
  0x10   :  { %v44_v11 = vsel %vm43_vm1, %v179_v6, %v42_v10 }
  0x78   :  { %v34_v12 = vpop.xlane.xlu0 %33 }
  0x79   :  { %v45_v13 = vmul.f32 %v44_v11, %v34_v12 }
  0x7b   :  { %v47_v14 = vsub.f32 %v167_v1, %v45_v13 }
  0x7d   :  { %v49_v15 = vmul.f32 %v47_v14, %v47_v14 }
  0x7f   :  { %v51_v16 = vsel %vm31_vm0, %v49_v15, 0.0 }
  0x80   :  { %52 = vadd.xlane.f32.xlu1 %v51_v16  ;;  %v37_v17 = vpop.xlane.xlu0 %36 }
  0x81   :  { %v46_v18 = vmul.f32 %v44_v11, %v37_v17 }
  0x83   :  { %v48_v19 = vsub.f32 %v168_v3, %v46_v18 }
  0x85   :  { %v50_v20 = vmul.f32 %v48_v19, %v48_v19 }
  0x87   :  { %v54_v21 = vsel %vm31_vm0, %v50_v20, 0.0 }
  0x88   :  { %55 = vadd.xlane.f32.xlu1 %v54_v21 }
  0xf3   :  { %v53_v23 = vpop.xlane.xlu1 %52 }
  0xf4   :  { %v57_v25 = vmul.f32 %v53_v23, %v44_v11 }
  0xf6   :  { %v59_v26 = vadd.f32 1e-05, %v57_v25 }
  0xf8   :  { %180 = vrsqrt.f32 %v59_v26  ;;  %vm67_vm3 = vweird.f32 %v59_v26 }
  0xfb   :  { %v56_v27 = vpop.xlane.xlu1 %55 }
  0xfc   :  { %v58_v28 = vmul.f32 %v56_v27, %v44_v11 }
  0xfe   :  { %v181_v29 = vpop.eup %180  ;;  %v60_v30 = vadd.f32 1e-05, %v58_v28 }
  0xff   :  { %v62_v31 = vmul.f32 %v181_v29, %v59_v26  ;;  %vm68_vm2 = vweird.f32 %v181_v29 }
 0x100   :  { %182 = vrsqrt.f32 %v60_v30  ;;  %vm69_vm4 = vmor %vm67_vm3, %vm68_vm2  ;;  %vm77_vm6 = vweird.f32 %v60_v30 }
 0x101   :  { %v63_v32 = vmul.f32 %v181_v29, %v62_v31 }
 0x103   :  { %v64_v33 = vmul.f32 0.5, %v63_v32 }
 0x105   :  { %v65_v34 = vsub.f32 1.5, %v64_v33 }
 0x106   :  { %v183_v35 = vpop.eup %182 }
 0x107   :  { %v66_v36 = vmul.f32 %v181_v29, %v65_v34  ;;  %v72_v37 = vmul.f32 %v183_v35, %v60_v30  ;;  %vm78_vm5 = vweird.f32 %v183_v35 }
 0x108   :  { %vm79_vm7 = vmor %vm77_vm6, %vm78_vm5 }
 0x109   :  { %v73_v38 = vmul.f32 %v183_v35, %v72_v37  ;;  %v70_v39 = vsel %vm69_vm4, %v181_v29, %v66_v36 }
 0x10a   :  { %v81_v42 = vmul.f32 %v70_v39, %v47_v14 }
 0x10b   :  { %v74_v40 = vmul.f32 0.5, %v73_v38 }
 0x10c   :  { %v87_v47 = vmul.f32 %v175_v43, %v81_v42 }
 0x10d   :  { %v75_v41 = vsub.f32 1.5, %v74_v40 }
 0x10e   :  { %v93_v50 = vadd.f32 %v176_v48, %v87_v47 }
 0x10f   :  { %v76_v44 = vmul.f32 %v183_v35, %v75_v41 }
 0x111   :  { %v80_v45 = vsel %vm79_vm7, %v183_v35, %v76_v44 }
 0x112   :  { %v82_v46 = vmul.f32 %v80_v45, %v48_v19 }
 0x114   :  { %v88_v49 = vmul.f32 %v175_v43, %v82_v46 }
 0x116   :  { %v94_v51 = vadd.f32 %v176_v48, %v88_v49 }
 0x118   :  { %v95_v52 = vpack.c.bf16 %v94_v51, %v93_v50 }
 0x11a   :  { %162 = vmatmul.msk.bf16.vlgmr.msra.gmra.mxu0 %vm31_vm0, %v95_v52 }
 0x197   :  { %v126_v53 = vpop.f32.mrf.mxu0 }
 0x198   :  { %v144_v56 = vadd.f32 %v177_v54, %v126_v53 }
 0x19f   :  { %v128_v55 = vpop.f32.mrf.mxu0 }
 0x1a0   :  { %v145_v57 = vadd.f32 %v177_v54, %v128_v55 }
 0x1a2   :  { %v172_v58 = vpack.c.bf16 %v145_v57, %v144_v56 }
 0x1a4   :  { %173 = vst [vmem:[%s246_s5] sm:$0xff] %v172_v58  }

// kernel: dvae_clip_forward.29
= control target key start
LH: loop header
LB: loop body
LE: loop exit
PB: predicated region body
PF: predicated region fallthrough
CT: control target
= control target key end

     0   :  { %vm49_vm0 = vcmask 261120   ;;  %s165_s1 = inlined_call_operand.vmem [shape: bf16[32,128], index: 1, kind: input, shape index: {}]   ;;  %s166_s2 = inlined_call_operand.vmem [shape: f32[1,128], index: 2, kind: input, shape index: {}]   ;;  %s167_s0 = inlined_call_operand.vmem [shape: bf16[16,32], index: 0, kind: input, shape index: {}]   ;;  %s168_s3 = inlined_call_operand.vmem [shape: bf16[16,128], index: 3, kind: input, shape index: {}]   ;;  %s169_s4 = inlined_call_operand.vmem [shape: bf16[16,128], index: 4, kind: output, shape index: {}]  }
   0x1   :  { %v111_v0 = vld [vmem:[%s165_s1 + $0x8] sm:$0xff]  ;;  %v110_v1 = vld [vmem:[%s165_s1] sm:$0xff] }
   0x2   :  { %59 = vmatpush.bf16.msra.mxu0 %v111_v0  ;;  %v109_v2 = vld [vmem:[%s167_s0] sm:$0xff] }
   0x3   :  { %v121_v4 = vld [vmem:[%s166_s2] ss:$0 sm:$0xff] }
   0x4   :  { %v113_v5 = vld [vmem:[%s168_s3] sm:$0xff]  }
   0x5   :  { %v114_v7 = vunpack.c.l.bf16 %v113_v5  ;;  %v115_v8 = vunpack.c.h.bf16 %v113_v5 }
   0x6   :  { %60 = vmatpush.bf16.msra.mxu0 %v110_v1 }
   0x9   :  { %108 = vmatmul.msk.bf16.vlgmr.msra.gmra.mxu0 %vm49_vm0, %v109_v2 }
  0x86   :  { %v62_v3 = vpop.f32.mrf.mxu0 }
  0x87   :  { %v80_v6 = vadd.f32 %v121_v4, %v62_v3 }
  0x89   :  { %v86_v11 = vadd.f32 %v114_v7, %v80_v6 }
  0x8e   :  { %v64_v9 = vpop.f32.mrf.mxu0 }
  0x8f   :  { %v81_v10 = vadd.f32 %v121_v4, %v64_v9 }
  0x91   :  { %v87_v12 = vadd.f32 %v115_v8, %v81_v10 }
  0x93   :  { %v119_v13 = vpack.c.bf16 %v87_v12, %v86_v11 }
  0x95   :  { %120 = vst [vmem:[%s169_s4] sm:$0xff] %v119_v13  }

// kernel: dvae_clip_forward.30
= control target key start
LH: loop header
LB: loop body
LE: loop exit
PB: predicated region body
PF: predicated region fallthrough
CT: control target
= control target key end

     0   :  { %vm31_vm0 = vcmask 261120   ;;  %v206_v5 = vmov 32.0   ;;  %s263_s0 = inlined_call_operand.vmem [shape: bf16[16,32], index: 0, kind: input, shape index: {}]   ;;  %s264_s2 = inlined_call_operand.vmem [shape: f32[1,32], index: 2, kind: input, shape index: {}]   ;;  %s265_s3 = inlined_call_operand.vmem [shape: f32[1,32], index: 3, kind: input, shape index: {}]   ;;  %s266_s4 = inlined_call_operand.vmem [shape: f32[1,128], index: 4, kind: input, shape index: {}]   ;;  %s267_s1 = inlined_call_operand.vmem [shape: bf16[32,128], index: 1, kind: input, shape index: {}]   ;;  %s268_s5 = inlined_call_operand.vmem [shape: bf16[16,128], index: 5, kind: output, shape index: {}]  }
   0x1   :  { %v184_v0 = vld [vmem:[%s263_s0] sm:$0xff]   ;;  %196 = vrcp.f32 %v206_v5  ;;  %v182_v22 = vld [vmem:[%s267_s1 + $0x8] sm:$0xff] }
   0x2   :  { %v185_v1 = vunpack.c.l.bf16 %v184_v0  ;;  %v186_v3 = vunpack.c.h.bf16 %v184_v0  ;;  %123 = vmatpush.bf16.msra.mxu0 %v182_v22  ;;  %v181_v24 = vld [vmem:[%s267_s1] sm:$0xff] }
   0x3   :  { %v193_v43 = vld [vmem:[%s264_s2] ss:$0 sm:$0xff] }
   0x4   :  { %v32_v2 = vsel %vm31_vm0, %v185_v1, 0.0  ;;  %v35_v4 = vsel %vm31_vm0, %v186_v3, 0.0  ;;  %v194_v48 = vld [vmem:[%s265_s3] ss:$0 sm:$0xff] }
   0x5   :  { %33 = vadd.xlane.f32.xlu0 %v32_v2  ;;  %v195_v53 = vld [vmem:[%s266_s4] ss:$0 sm:$0xff] }
   0x6   :  { %124 = vmatpush.bf16.msra.mxu0 %v181_v24 }
   0x7   :  { %v197_v6 = vpop.eup %196 }
   0x8   :  { %v39_v7 = vmul.f32 32.0, %v197_v6  ;;  %vm43_vm1 = vweird.f32 %v197_v6 }
   0xa   :  { %v40_v8 = vsub.f32 1.0, %v39_v7 }
   0xc   :  { %v41_v9 = vmul.f32 %v197_v6, %v40_v8 }
   0xd   :  { %36 = vadd.xlane.f32.xlu0 %v35_v4 }
   0xe   :  { %v42_v10 = vadd.f32 %v197_v6, %v41_v9 }
  0x10   :  { %v44_v11 = vsel %vm43_vm1, %v197_v6, %v42_v10 }
  0x78   :  { %v34_v12 = vpop.xlane.xlu0 %33 }
  0x79   :  { %v45_v13 = vmul.f32 %v44_v11, %v34_v12 }
  0x7b   :  { %v47_v14 = vsub.f32 %v185_v1, %v45_v13 }
  0x7d   :  { %v49_v15 = vmul.f32 %v47_v14, %v47_v14 }
  0x7f   :  { %v51_v16 = vsel %vm31_vm0, %v49_v15, 0.0 }
  0x80   :  { %52 = vadd.xlane.f32.xlu1 %v51_v16  ;;  %v37_v17 = vpop.xlane.xlu0 %36 }
  0x81   :  { %v46_v18 = vmul.f32 %v44_v11, %v37_v17 }
  0x83   :  { %v48_v19 = vsub.f32 %v186_v3, %v46_v18 }
  0x85   :  { %v50_v20 = vmul.f32 %v48_v19, %v48_v19 }
  0x87   :  { %v54_v21 = vsel %vm31_vm0, %v50_v20, 0.0 }
  0x88   :  { %55 = vadd.xlane.f32.xlu1 %v54_v21 }
  0xf3   :  { %v53_v23 = vpop.xlane.xlu1 %52 }
  0xf4   :  { %v57_v25 = vmul.f32 %v53_v23, %v44_v11 }
  0xf6   :  { %v59_v26 = vadd.f32 1e-05, %v57_v25 }
  0xf8   :  { %198 = vrsqrt.f32 %v59_v26  ;;  %vm67_vm3 = vweird.f32 %v59_v26 }
  0xfb   :  { %v56_v27 = vpop.xlane.xlu1 %55 }
  0xfc   :  { %v58_v28 = vmul.f32 %v56_v27, %v44_v11 }
  0xfe   :  { %v199_v29 = vpop.eup %198  ;;  %v60_v30 = vadd.f32 1e-05, %v58_v28 }
  0xff   :  { %v62_v31 = vmul.f32 %v199_v29, %v59_v26  ;;  %vm68_vm2 = vweird.f32 %v199_v29 }
 0x100   :  { %200 = vrsqrt.f32 %v60_v30  ;;  %vm69_vm4 = vmor %vm67_vm3, %vm68_vm2  ;;  %vm77_vm6 = vweird.f32 %v60_v30 }
 0x101   :  { %v63_v32 = vmul.f32 %v199_v29, %v62_v31 }
 0x103   :  { %v64_v33 = vmul.f32 0.5, %v63_v32 }
 0x105   :  { %v65_v34 = vsub.f32 1.5, %v64_v33 }
 0x106   :  { %v201_v35 = vpop.eup %200 }
 0x107   :  { %v66_v36 = vmul.f32 %v199_v29, %v65_v34  ;;  %v72_v37 = vmul.f32 %v201_v35, %v60_v30  ;;  %vm78_vm5 = vweird.f32 %v201_v35 }
 0x108   :  { %vm79_vm7 = vmor %vm77_vm6, %vm78_vm5 }
 0x109   :  { %v73_v38 = vmul.f32 %v201_v35, %v72_v37  ;;  %v70_v39 = vsel %vm69_vm4, %v199_v29, %v66_v36 }
 0x10a   :  { %v81_v42 = vmul.f32 %v70_v39, %v47_v14 }
 0x10b   :  { %v74_v40 = vmul.f32 0.5, %v73_v38 }
 0x10c   :  { %v87_v47 = vmul.f32 %v193_v43, %v81_v42 }
 0x10d   :  { %v75_v41 = vsub.f32 1.5, %v74_v40 }
 0x10e   :  { %v93_v50 = vadd.f32 %v194_v48, %v87_v47 }
 0x10f   :  { %v76_v44 = vmul.f32 %v201_v35, %v75_v41 }
 0x111   :  { %v80_v45 = vsel %vm79_vm7, %v201_v35, %v76_v44 }
 0x112   :  { %v82_v46 = vmul.f32 %v80_v45, %v48_v19 }
 0x114   :  { %v88_v49 = vmul.f32 %v193_v43, %v82_v46 }
 0x116   :  { %v94_v51 = vadd.f32 %v194_v48, %v88_v49 }
 0x118   :  { %v95_v52 = vpack.c.bf16 %v94_v51, %v93_v50 }
 0x11a   :  { %180 = vmatmul.msk.bf16.vlgmr.msra.gmra.mxu0 %vm31_vm0, %v95_v52 }
 0x197   :  { %v126_v54 = vpop.f32.mrf.mxu0 }
 0x198   :  { %v144_v55 = vadd.f32 %v195_v53, %v126_v54 }
 0x19a   :  { %v146_v56 = vmul.f32 %v144_v55, %v144_v55 }
 0x19c   :  { %v148_v57 = vmul.f32 %v146_v56, %v144_v55 }
 0x19e   :  { %v150_v58 = vmul.f32 0.044715, %v148_v57 }
 0x19f   :  { %v128_v59 = vpop.f32.mrf.mxu0 }
 0x1a0   :  { %v152_v60 = vadd.f32 %v150_v58, %v144_v55  ;;  %v145_v61 = vadd.f32 %v195_v53, %v128_v59 }
 0x1a2   :  { %v154_v62 = vmul.f32 0.7978846, %v152_v60  ;;  %v147_v63 = vmul.f32 %v145_v61, %v145_v61 }
 0x1a4   :  { %v149_v0 = vmul.f32 %v147_v63, %v145_v61  ;;  %202 = vtanh.f32 %v154_v62 }
 0x1a6   :  { %v151_v1 = vmul.f32 0.044715, %v149_v0 }
 0x1a8   :  { %v153_v2 = vadd.f32 %v151_v1, %v145_v61 }
 0x1aa   :  { %v155_v3 = vmul.f32 0.7978846, %v153_v2  ;;  %v203_v4 = vpop.eup %202 }
 0x1ab   :  { %v158_v5 = vadd.f32 1.0, %v203_v4 }
 0x1ac   :  { %204 = vtanh.f32 %v155_v3 }
 0x1ad   :  { %v160_v7 = vmul.f32 0.5, %v158_v5 }
 0x1af   :  { %v162_v10 = vmul.f32 %v160_v7, %v144_v55 }
 0x1b2   :  { %v205_v6 = vpop.eup %204 }
 0x1b3   :  { %v159_v8 = vadd.f32 1.0, %v205_v6 }
 0x1b5   :  { %v161_v9 = vmul.f32 0.5, %v159_v8 }
 0x1b7   :  { %v163_v11 = vmul.f32 %v161_v9, %v145_v61 }
 0x1b9   :  { %v190_v12 = vpack.c.bf16 %v163_v11, %v162_v10 }
 0x1bb   :  { %191 = vst [vmem:[%s268_s5] sm:$0xff] %v190_v12  }

// kernel: dvae_clip_forward.31
= control target key start
LH: loop header
LB: loop body
LE: loop exit
PB: predicated region body
PF: predicated region fallthrough
CT: control target
= control target key end

     0   :  { %s256_s1 = inlined_call_operand.vmem [shape: bf16[128,128], index: 1, kind: input, shape index: {}]   ;;  %s257_s2 = inlined_call_operand.vmem [shape: f32[1,128], index: 2, kind: input, shape index: {}]   ;;  %s258_s0 = inlined_call_operand.vmem [shape: bf16[16,128], index: 0, kind: input, shape index: {}]   ;;  %s259_s3 = inlined_call_operand.vmem [shape: bf16[16,128], index: 3, kind: input, shape index: {}]   ;;  %s260_s4 = inlined_call_operand.vmem [shape: bf16[16,128], index: 4, kind: output, shape index: {}]  }
   0x1   :  { %v184_v0 = vld [vmem:[%s256_s1 + $0x38] sm:$0xff]  ;;  %v183_v1 = vld [vmem:[%s256_s1 + $0x30] sm:$0xff]  ;;  %v182_v2 = vld [vmem:[%s256_s1 + $0x28] sm:$0xff] }
   0x2   :  { %97 = vmatpush.bf16.msra.mxu0 %v184_v0  ;;  %v181_v3 = vld [vmem:[%s256_s1 + $0x20] sm:$0xff]  ;;  %v180_v4 = vld [vmem:[%s256_s1 + $0x18] sm:$0xff]  ;;  %v179_v5 = vld [vmem:[%s256_s1 + $0x10] sm:$0xff] }
   0x3   :  { %v178_v6 = vld [vmem:[%s256_s1 + $0x8] sm:$0xff]  ;;  %v177_v7 = vld [vmem:[%s256_s1] sm:$0xff] }
   0x4   :  { %v176_v8 = vld [vmem:[%s258_s0] sm:$0xff] }
   0x5   :  { %v194_v10 = vld [vmem:[%s257_s2] ss:$0 sm:$0xff] }
   0x6   :  { %98 = vmatpush.bf16.msra.mxu0 %v183_v1  ;;  %v186_v11 = vld [vmem:[%s259_s3] sm:$0xff]  }
   0x7   :  { %v187_v13 = vunpack.c.l.bf16 %v186_v11  ;;  %v188_v14 = vunpack.c.h.bf16 %v186_v11 }
   0xa   :  { %99 = vmatpush.bf16.msra.mxu0 %v182_v2 }
   0xe   :  { %100 = vmatpush.bf16.msra.mxu0 %v181_v3 }
  0x12   :  { %101 = vmatpush.bf16.msra.mxu0 %v180_v4 }
  0x16   :  { %102 = vmatpush.bf16.msra.mxu0 %v179_v5 }
  0x1a   :  { %103 = vmatpush.bf16.msra.mxu0 %v178_v6 }
  0x1e   :  { %104 = vmatpush.bf16.msra.mxu0 %v177_v7 }
  0x21   :  { %105 = vmatmul.bf16.vlgmr.msra.gmra.mxu0 %v176_v8 }
  0x9e   :  { %v106_v9 = vpop.f32.mrf.mxu0 }
  0x9f   :  { %v124_v12 = vadd.f32 %v194_v10, %v106_v9 }
  0xa1   :  { %v130_v17 = vadd.f32 %v187_v13, %v124_v12 }
  0xa6   :  { %v108_v15 = vpop.f32.mrf.mxu0 }
  0xa7   :  { %v125_v16 = vadd.f32 %v194_v10, %v108_v15 }
  0xa9   :  { %v131_v18 = vadd.f32 %v188_v14, %v125_v16 }
  0xab   :  { %v192_v19 = vpack.c.bf16 %v131_v18, %v130_v17 }
  0xad   :  { %193 = vst [vmem:[%s260_s4] sm:$0xff] %v192_v19  }

// kernel: dvae_clip_forward.19
= control target key start
LH: loop header
LB: loop body
LE: loop exit
PB: predicated region body
PF: predicated region fallthrough
CT: control target
= control target key end

     0   :  { %s648_s12 = smov 0   ;;  %s650_s13 = smov 0   ;;  %s687_s0 = inlined_call_operand.vmem [shape: bf16[128,4], index: 0, kind: input, shape index: {}]   ;;  %s688_s1 = inlined_call_operand.vmem [shape: bf16[4,128], index: 1, kind: input, shape index: {}]   ;;  %s689_s2 = inlined_call_operand.vmem [shape: f32[1,128], index: 2, kind: input, shape index: {}]   ;;  %s690_s3 = inlined_call_operand.vmem [shape: bf16[128,128], index: 3, kind: output, shape index: {}]  }
   0x1   :  { %s652_s14 = smov 0  }
   0x2 LB: > { %s32_s15 = sadd.s32 1, %s622_s13  ;;  %p522_p0 = scmp.ge.s32.totalorder %s626_s14, 1  ;;  %s626_s14 = sphi %s652_s14, %s13_s14   ;;  %s622_s13 = sphi %s650_s13, %s692_s13   ;;  %s618_s12 = sphi %s648_s12, %s691_s12  }
   0x3   : > { %p34_p1 = scmp.ge.s32.totalorder %s32_s15, 2  ;;  %p186_p2 = scmp.lt.s32.totalorder %s626_s14, 3 }
   0x5   : > { %s694_s15 = smov (%p34_p1, %s32_s15), 0  ;;  %p187_p3 = pnand %p522_p0, %p186_p2 }
   0x6   : > { %s523_s18 = sshll.u32 (!%p187_p3), %s618_s12, 3 }
   0x7   : > { %190 = sbr.rel (%p187_p3) target bundleno = 164 (0xa4), region = 32  ;;  %p227_p4 = scmp.lt.s32.totalorder (!%p187_p3), %s523_s18, 15 }
   0xc   : > { %v283_v0 = vld [vmem:[%s688_s1] sm:$0x3]  ;;  %vm317_vm0 = vcmask 1041408   ;;  %s696_s18 = smov (!%p227_p4, %s523_s18), 15  ;;  %vm304_vm1 = vcmask 31744  }
   0xd   : > { %v319_v1 = vsel %vm317_vm0, %v283_v0, 0  ;;  %s524_s19 = sshll.u32 %s696_s18, 2  ;;  %v603_v8 = vld [vmem:[%s689_s2] ss:$0 sm:$0xff] }
   0xe   : > { %328 = vmatpush.bf16.msra.mxu0 %v319_v1  ;;  %576 = vmatpush.bf16.msra.mxu1 %v319_v1  ;;  %s233_s22 = scalar_lea.vmem %s687_s0, %s524_s19  ;;  %s252_s27 = scalar_lea.vmem %s690_s3, %s524_s19 }
   0xf   : > { %577 = vmatpush.bf16.msra.mxu2 %v319_v1  ;;  %578 = vmatpush.bf16.msra.mxu3 %v319_v1  ;;  %v549_v2 = vld [vmem:[%s233_s22] sm:$0xff]  ;;  %v550_v3 = vld [vmem:[%s233_s22 + $0x8] sm:$0xff]  ;;  %v551_v4 = vld [vmem:[%s233_s22 + $0x10] sm:$0xff] }
  0x10   : > { %v552_v5 = vld [vmem:[%s233_s22 + $0x18] sm:$0xff] }
  0x11   : > { %543 = vmatmul.msk.bf16.vlgmr.msra.gmra.mxu0 %vm304_vm1, %v549_v2  ;;  %544 = vmatmul.msk.bf16.vlgmr.msra.gmra.mxu1 %vm304_vm1, %v550_v3 }
  0x12   : > { %545 = vmatmul.msk.bf16.vlgmr.msra.gmra.mxu2 %vm304_vm1, %v551_v4  ;;  %546 = vmatmul.msk.bf16.vlgmr.msra.gmra.mxu3 %vm304_vm1, %v552_v5 }
  0x8e   : > { %v330_v6 = vpop.f32.mrf.mxu0  ;;  %v335_v7 = vpop.f32.mrf.mxu1 }
  0x8f   : > { %v381_v13 = vadd.f32 %v603_v8, %v330_v6  ;;  %v383_v14 = vadd.f32 %v603_v8, %v335_v7 }
  0x95   : > { %v340_v9 = vpop.f32.mrf.mxu2  ;;  %v345_v10 = vpop.f32.mrf.mxu3 }
  0x96   : > { %v332_v11 = vpop.f32.mrf.mxu0  ;;  %v337_v12 = vpop.f32.mrf.mxu1  ;;  %v385_v21 = vadd.f32 %v603_v8, %v340_v9  ;;  %v387_v22 = vadd.f32 %v603_v8, %v345_v10 }
  0x97   : > { %v382_v15 = vadd.f32 %v603_v8, %v332_v11  ;;  %v384_v16 = vadd.f32 %v603_v8, %v337_v12 }
  0x99   : > { %v556_v17 = vpack.c.bf16 %v382_v15, %v381_v13  ;;  %v561_v18 = vpack.c.bf16 %v384_v16, %v383_v14 }
  0x9b   : > { %557 = vst [vmem:[%s252_s27] sm:$0xff] %v556_v17  }
  0x9c   : > { %573 = vst [vmem:[%s252_s27 + $0x8] sm:$0xff] %v561_v18  }
  0x9d   : > { %v342_v19 = vpop.f32.mrf.mxu2  ;;  %v347_v20 = vpop.f32.mrf.mxu3 }
  0x9e   : > { %v386_v23 = vadd.f32 %v603_v8, %v342_v19  ;;  %v388_v24 = vadd.f32 %v603_v8, %v347_v20 }
  0xa0   : > { %v566_v25 = vpack.c.bf16 %v386_v23, %v385_v21  ;;  %v571_v26 = vpack.c.bf16 %v388_v24, %v387_v22 }
  0xa2   : > { %574 = vst [vmem:[%s252_s27 + $0x10] sm:$0xff] %v566_v25  }
  0xa3   : > { %575 = vst [vmem:[%s252_s27 + $0x18] sm:$0xff] %v571_v26  }
  0xa4 PF: > { %s13_s14 = sadd.s32 1, %s626_s14   ;;  %s691_s12 = smov %s622_s13 }
  0xa5   : > { %p10_p5 = scmp.ge.s32.totalorder %s13_s14, 4   ;;  %s692_s13 = smov %s694_s15 }
  0xa7   :  { %12 = sbr.rel (!%p10_p5) target bundleno = 2 (0x2), region = 76 }

// kernel: dvae_clip_forward.20
= control target key start
LH: loop header
LB: loop body
LE: loop exit
PB: predicated region body
PF: predicated region fallthrough
CT: control target
= control target key end

     0   :  { %s961_s18 = smov 0   ;;  %s963_s19 = smov 0   ;;  %s1154_s0 = inlined_call_operand.vmem [shape: bf16[128,32], index: 0, kind: input, shape index: {}]   ;;  %s1155_s1 = inlined_call_operand.vmem [shape: bf16[32,128], index: 1, kind: input, shape index: {}]   ;;  %s1156_s2 = inlined_call_operand.vmem [shape: f32[1,32], index: 2, kind: input, shape index: {}]   ;;  %s1157_s3 = inlined_call_operand.vmem [shape: f32[1,32], index: 3, kind: input, shape index: {}]   ;;  %s1158_s4 = inlined_call_operand.vmem [shape: f32[1,128], index: 4, kind: input, shape index: {}]   ;;  %s1159_s5 = inlined_call_operand.vmem [shape: bf16[128,128], index: 5, kind: output, shape index: {}]  }
   0x1   :  { %s965_s20 = smov 0  }
   0x2 LB: > { %s34_s21 = sadd.s32 1, %s924_s19  ;;  %p791_p0 = scmp.ge.s32.totalorder %s928_s20, 1  ;;  %s928_s20 = sphi %s965_s20, %s15_s20   ;;  %s924_s19 = sphi %s963_s19, %s1167_s19   ;;  %s920_s18 = sphi %s961_s18, %s1166_s18  }
   0x3   : > { %p36_p1 = scmp.ge.s32.totalorder %s34_s21, 2  ;;  %p238_p2 = scmp.lt.s32.totalorder %s928_s20, 3 }
   0x5   : > { %s1169_s21 = smov (%p36_p1, %s34_s21), 0  ;;  %p239_p3 = pnand %p791_p0, %p238_p2 }
   0x6   : > { %s792_s22 = sshll.u32 (!%p239_p3), %s920_s18, 3 }
   0x7   : > { %242 = sbr.rel (%p239_p3) target bundleno = 452 (0x1c4), region = 40  ;;  %p284_p4 = scmp.lt.s32.totalorder (!%p239_p3), %s792_s22, 15 }
   0xc   : > { %s1171_s22 = smov (!%p284_p4, %s792_s22), 15  ;;  %vm342_vm0 = vcmask 261120   ;;  %v930_v20 = vmov 32.0  }
   0xd   : > { %s793_s23 = sshll.u32 %s1171_s22, 2  ;;  %888 = vrcp.f32 %v930_v20 }
   0xe   : > { %s290_s26 = scalar_lea.vmem %s1154_s0, %s793_s23  ;;  %s311_s14 = scalar_lea.vmem %s1159_s5, %s793_s23 }
   0xf   : > { %v850_v0 = vld [vmem:[%s290_s26 + $0x18] sm:$0xff]   ;;  %v849_v1 = vld [vmem:[%s290_s26 + $0x10] sm:$0xff]   ;;  %v813_v2 = vld [vmem:[%s290_s26] sm:$0xff]  }
  0x10   : > { %v826_v3 = vunpack.c.l.bf16 %v850_v0  ;;  %v822_v4 = vunpack.c.l.bf16 %v849_v1  ;;  %v814_v5 = vunpack.c.l.bf16 %v813_v2  ;;  %v827_v9 = vunpack.c.h.bf16 %v850_v0  ;;  %v848_v15 = vld [vmem:[%s290_s26 + $0x8] sm:$0xff]  }
  0x11   : > { %v823_v10 = vunpack.c.h.bf16 %v849_v1  ;;  %v815_v11 = vunpack.c.h.bf16 %v813_v2  ;;  %v818_v16 = vunpack.c.l.bf16 %v848_v15  ;;  %v819_v17 = vunpack.c.h.bf16 %v848_v15 }
  0x12   : > { %v361_v6 = vsel %vm342_vm0, %v826_v3, 0.0  ;;  %v355_v7 = vsel %vm342_vm0, %v822_v4, 0.0  ;;  %v343_v8 = vsel %vm342_vm0, %v814_v5, 0.0  ;;  %v364_v12 = vsel %vm342_vm0, %v827_v9, 0.0 }
  0x13   : > { %362 = vadd.xlane.f32.xlu1 %v361_v6  ;;  %356 = vadd.xlane.f32.xlu0 %v355_v7  ;;  %v358_v13 = vsel %vm342_vm0, %v823_v10, 0.0  ;;  %v346_v14 = vsel %vm342_vm0, %v815_v11, 0.0  ;;  %v349_v18 = vsel %vm342_vm0, %v818_v16, 0.0  ;;  %v352_v19 = vsel %vm342_vm0, %v819_v17, 0.0  ;;  %v889_v21 = vpop.eup %888  ;;  %v811_v7 = vld [vmem:[%s1155_s1 + $0x8] sm:$0xff] }
  0x14   : > { %344 = vadd.xlane.f32.xlu2 %v343_v8  ;;  %v368_v22 = vmul.f32 32.0, %v889_v21  ;;  %vm372_vm1 = vweird.f32 %v889_v21  ;;  %855 = vmatpush.bf16.msra.mxu2 %v811_v7 }
  0x15   : > { %856 = vmatpush.bf16.msra.mxu3 %v811_v7  ;;  %596 = vmatpush.bf16.msra.mxu0 %v811_v7 }
  0x16   : > { %v369_v23 = vsub.f32 1.0, %v368_v22  ;;  %854 = vmatpush.bf16.msra.mxu1 %v811_v7 }
  0x18   : > { %v370_v24 = vmul.f32 %v889_v21, %v369_v23 }
  0x1a   : > { %v371_v25 = vadd.f32 %v889_v21, %v370_v24 }
  0x1b   : > { %365 = vadd.xlane.f32.xlu1 %v364_v12  ;;  %359 = vadd.xlane.f32.xlu0 %v358_v13 }
  0x1c   : > { %347 = vadd.xlane.f32.xlu2 %v346_v14  ;;  %v995_v26 = vsel %vm372_vm1, %v889_v21, %v371_v25 }
  0x23   : > { %350 = vadd.xlane.f32.xlu0 %v349_v18  ;;  %353 = vadd.xlane.f32.xlu1 %v352_v19 }
  0x86   : > { %v363_v27 = vpop.xlane.xlu1 %362  ;;  %v357_v28 = vpop.xlane.xlu0 %356 }
  0x87   : > { %v380_v29 = vmul.f32 %v995_v26, %v363_v27  ;;  %v378_v30 = vmul.f32 %v995_v26, %v357_v28  ;;  %v345_v31 = vpop.xlane.xlu2 %344 }
  0x88   : > { %v374_v40 = vmul.f32 %v995_v26, %v345_v31 }
  0x89   : > { %v999_v32 = vsub.f32 %v826_v3, %v380_v29  ;;  %v1001_v33 = vsub.f32 %v822_v4, %v378_v30 }
  0x8a   : > { %v1019_v48 = vsub.f32 %v814_v5, %v374_v40 }
  0x8b   : > { %v396_v34 = vmul.f32 %v999_v32, %v999_v32  ;;  %v394_v35 = vmul.f32 %v1001_v33, %v1001_v33 }
  0x8c   : > { %v390_v59 = vmul.f32 %v1019_v48, %v1019_v48 }
  0x8d   : > { %v416_v36 = vsel %vm342_vm0, %v396_v34, 0.0  ;;  %v410_v37 = vsel %vm342_vm0, %v394_v35, 0.0 }
  0x8e   : > { %v366_v38 = vpop.xlane.xlu1 %365  ;;  %v360_v39 = vpop.xlane.xlu0 %359  ;;  %417 = vadd.xlane.f32.xlu1 %v416_v36  ;;  %411 = vadd.xlane.f32.xlu2 %v410_v37  ;;  %v398_v63 = vsel %vm342_vm0, %v390_v59, 0.0 }
  0x8f   : > { %v381_v41 = vmul.f32 %v995_v26, %v366_v38  ;;  %v379_v42 = vmul.f32 %v995_v26, %v360_v39  ;;  %v348_v43 = vpop.xlane.xlu2 %347 }
  0x90   : > { %v375_v44 = vmul.f32 %v995_v26, %v348_v43 }
  0x91   : > { %v1013_v45 = vsub.f32 %v827_v9, %v381_v41  ;;  %v1015_v46 = vsub.f32 %v823_v10, %v379_v42  ;;  %v810_v10 = vld [vmem:[%s1155_s1] sm:$0xff] }
  0x92   : > { %v1017_v47 = vsub.f32 %v815_v11, %v375_v44  ;;  %858 = vmatpush.bf16.msra.mxu2 %v810_v10  ;;  %859 = vmatpush.bf16.msra.mxu3 %v810_v10 }
  0x93   : > { %v395_v49 = vmul.f32 %v1015_v46, %v1015_v46  ;;  %v397_v50 = vmul.f32 %v1013_v45, %v1013_v45  ;;  %597 = vmatpush.bf16.msra.mxu0 %v810_v10  ;;  %857 = vmatpush.bf16.msra.mxu1 %v810_v10 }
  0x94   : > { %v391_v51 = vmul.f32 %v1017_v47, %v1017_v47 }
  0x95   : > { %v413_v52 = vsel %vm342_vm0, %v395_v49, 0.0  ;;  %v419_v53 = vsel %vm342_vm0, %v397_v50, 0.0 }
  0x96   : > { %414 = vadd.xlane.f32.xlu0 %v413_v52  ;;  %v351_v54 = vpop.xlane.xlu0 %350  ;;  %420 = vadd.xlane.f32.xlu2 %v419_v53  ;;  %v401_v55 = vsel %vm342_vm0, %v391_v51, 0.0  ;;  %v354_v56 = vpop.xlane.xlu1 %353 }
  0x97   : > { %v376_v57 = vmul.f32 %v995_v26, %v351_v54  ;;  %402 = vadd.xlane.f32.xlu1 %v401_v55  ;;  %v377_v58 = vmul.f32 %v995_v26, %v354_v56 }
  0x99   : > { %v1034_v60 = vsub.f32 %v818_v16, %v376_v57  ;;  %v1036_v61 = vsub.f32 %v819_v17, %v377_v58 }
  0x9b   : > { %v392_v62 = vmul.f32 %v1034_v60, %v1034_v60  ;;  %v393_v1 = vmul.f32 %v1036_v61, %v1036_v61 }
  0x9d   : > { %v404_v0 = vsel %vm342_vm0, %v392_v62, 0.0  ;;  %v407_v2 = vsel %vm342_vm0, %v393_v1, 0.0 }
  0x9e   : > { %405 = vadd.xlane.f32.xlu2 %v404_v0  ;;  %399 = vadd.xlane.f32.xlu0 %v398_v63 }
  0xa6   : > { %408 = vadd.xlane.f32.xlu0 %v407_v2 }
 0x101   : > { %v418_v3 = vpop.xlane.xlu1 %417  ;;  %v412_v4 = vpop.xlane.xlu2 %411 }
 0x102   : > { %v428_v5 = vmul.f32 %v418_v3, %v995_v26  ;;  %v426_v6 = vmul.f32 %v412_v4, %v995_v26  ;;  %v1092_v3 = vld [vmem:[%s1156_s2] ss:$0 sm:$0xff] }
 0x104   : > { %v436_v8 = vadd.f32 1e-05, %v428_v5  ;;  %v434_v9 = vadd.f32 1e-05, %v426_v6 }
 0x106   : > { %890 = vrsqrt.f32 %v436_v8  ;;  %vm504_vm2 = vweird.f32 %v436_v8  ;;  %vm484_vm5 = vweird.f32 %v434_v9 }
 0x107   : > { %892 = vrsqrt.f32 %v434_v9 }
 0x109   : > { %v415_v11 = vpop.xlane.xlu0 %414  ;;  %v421_v12 = vpop.xlane.xlu2 %420 }
 0x10a   : > { %v427_v13 = vmul.f32 %v415_v11, %v995_v26  ;;  %v403_v14 = vpop.xlane.xlu1 %402  ;;  %v429_v15 = vmul.f32 %v421_v12, %v995_v26 }
 0x10b   : > { %v423_v16 = vmul.f32 %v403_v14, %v995_v26 }
 0x10c   : > { %v891_v17 = vpop.eup %890  ;;  %v435_v18 = vadd.f32 1e-05, %v427_v13  ;;  %v1056_v19 = vadd.f32 1e-05, %v429_v15  ;;  %v886_v15 = vld [vmem:[%s1157_s3] ss:$0 sm:$0xff] }
 0x10d   : > { %v893_v20 = vpop.eup %892  ;;  %v499_v21 = vmul.f32 %v891_v17, %v436_v8  ;;  %v431_v22 = vadd.f32 1e-05, %v423_v16  ;;  %vm505_vm4 = vweird.f32 %v891_v17 }
 0x10e   : > { %v479_v23 = vmul.f32 %v893_v20, %v434_v9  ;;  %894 = vrsqrt.f32 %v435_v18  ;;  %vm485_vm3 = vweird.f32 %v893_v20  ;;  %vm494_vm7 = vweird.f32 %v435_v18  ;;  %vm1079_vm8 = vmor %vm504_vm2, %vm505_vm4 }
 0x10f   : > { %v500_v24 = vmul.f32 %v891_v17, %v499_v21  ;;  %896 = vrsqrt.f32 %v431_v22  ;;  %vm1069_vm6 = vmor %vm484_vm5, %vm485_vm3  ;;  %vm454_vm9 = vweird.f32 %v431_v22  ;;  %vm514_vm12 = vweird.f32 %v1056_v19 }
 0x110   : > { %v480_v25 = vmul.f32 %v893_v20, %v479_v23  ;;  %898 = vrsqrt.f32 %v1056_v19 }
 0x111   : > { %v501_v27 = vmul.f32 0.5, %v500_v24  ;;  %v400_v28 = vpop.xlane.xlu0 %399  ;;  %v406_v29 = vpop.xlane.xlu2 %405 }
 0x112   : > { %v481_v30 = vmul.f32 0.5, %v480_v25  ;;  %v422_v31 = vmul.f32 %v400_v28, %v995_v26  ;;  %v424_v34 = vmul.f32 %v406_v29, %v995_v26 }
 0x113   : > { %v502_v35 = vsub.f32 1.5, %v501_v27 }
 0x114   : > { %v895_v36 = vpop.eup %894  ;;  %v482_v37 = vsub.f32 1.5, %v481_v30  ;;  %v1061_v38 = vadd.f32 1e-05, %v422_v31  ;;  %v1065_v41 = vadd.f32 1e-05, %v424_v34 }
 0x115   : > { %v1063_v39 = vpop.eup %896  ;;  %v489_v40 = vmul.f32 %v895_v36, %v435_v18  ;;  %v503_v43 = vmul.f32 %v891_v17, %v502_v35  ;;  %vm495_vm10 = vweird.f32 %v895_v36 }
 0x116   : > { %v899_v42 = vpop.eup %898  ;;  %v483_v44 = vmul.f32 %v893_v20, %v482_v37  ;;  %v449_v49 = vmul.f32 %v1063_v39, %v431_v22  ;;  %900 = vrsqrt.f32 %v1061_v38  ;;  %vm455_vm11 = vweird.f32 %v1063_v39  ;;  %vm496_vm14 = vmor %vm494_vm7, %vm495_vm10 }
 0x117   : > { %v490_v51 = vmul.f32 %v895_v36, %v489_v40  ;;  %v509_v52 = vmul.f32 %v899_v42, %v1056_v19  ;;  %902 = vrsqrt.f32 %v1065_v41  ;;  %v507_v59 = vsel %vm1079_vm8, %v891_v17, %v503_v43  ;;  %vm1101_vm15 = vmor %vm454_vm9, %vm455_vm11 }
 0x118   : > { %v487_v53 = vsel %vm1069_vm6, %v893_v20, %v483_v44  ;;  %v450_v54 = vmul.f32 %v1063_v39, %v449_v49  ;;  %vm515_vm13 = vweird.f32 %v899_v42  ;;  %v524_v7 = vmul.f32 %v507_v59, %v999_v32 }
 0x119   : > { %v491_v56 = vmul.f32 0.5, %v490_v51  ;;  %v510_v57 = vmul.f32 %v899_v42, %v509_v52  ;;  %v409_v58 = vpop.xlane.xlu0 %408  ;;  %v522_v0 = vmul.f32 %v487_v53, %v1001_v33  ;;  %vm516_vm1 = vmor %vm514_vm12, %vm515_vm13  ;;  %vm444_vm2 = vweird.f32 %v1061_v38 }
 0x11a   : > { %v451_v62 = vmul.f32 0.5, %v450_v54  ;;  %v425_v63 = vmul.f32 %v409_v58, %v995_v26  ;;  %v536_v22 = vmul.f32 %v1092_v3, %v524_v7  ;;  %vm464_vm4 = vweird.f32 %v1065_v41 }
 0x11b   : > { %v492_v1 = vsub.f32 1.5, %v491_v56  ;;  %v511_v2 = vmul.f32 0.5, %v510_v57  ;;  %v534_v32 = vmul.f32 %v1092_v3, %v522_v0 }
 0x11c   : > { %v901_v4 = vpop.eup %900  ;;  %v452_v5 = vsub.f32 1.5, %v451_v62  ;;  %v433_v6 = vadd.f32 1e-05, %v425_v63 }
 0x11d   : > { %v493_v26 = vmul.f32 %v895_v36, %v492_v1  ;;  %v512_v33 = vsub.f32 1.5, %v511_v2  ;;  %v439_v8 = vmul.f32 %v901_v4, %v1061_v38  ;;  %v903_v11 = vpop.eup %902  ;;  %vm445_vm3 = vweird.f32 %v901_v4 }
 0x11e   : > { %v453_v9 = vmul.f32 %v1063_v39, %v452_v5  ;;  %904 = vrsqrt.f32 %v433_v6  ;;  %v459_v17 = vmul.f32 %v903_v11, %v1065_v41  ;;  %v546_v19 = vadd.f32 %v886_v15, %v534_v32  ;;  %vm446_vm5 = vmor %vm444_vm2, %vm445_vm3 }
 0x11f   : > { %v497_v12 = vsel %vm496_vm14, %v895_v36, %v493_v26  ;;  %v513_v13 = vmul.f32 %v899_v42, %v512_v33  ;;  %v440_v14 = vmul.f32 %v901_v4, %v439_v8  ;;  %vm465_vm6 = vweird.f32 %v903_v11 }
 0x120   : > { %v523_v16 = vmul.f32 %v497_v12, %v1015_v46  ;;  %v457_v18 = vsel %vm1101_vm15, %v1063_v39, %v453_v9  ;;  %v460_v24 = vmul.f32 %v903_v11, %v459_v17  ;;  %vm466_vm7 = vmor %vm464_vm4, %vm465_vm6  ;;  %vm474_vm9 = vweird.f32 %v433_v6 }
 0x121   : > { %v517_v20 = vsel %vm516_vm1, %v899_v42, %v513_v13  ;;  %v441_v21 = vmul.f32 0.5, %v440_v14  ;;  %v519_v28 = vmul.f32 %v457_v18, %v1017_v47 }
 0x122   : > { %v525_v23 = vmul.f32 %v517_v20, %v1013_v45  ;;  %v535_v25 = vmul.f32 %v1092_v3, %v523_v16  ;;  %v461_v29 = vmul.f32 0.5, %v460_v24  ;;  %v548_v45 = vadd.f32 %v886_v15, %v536_v22 }
 0x123   : > { %v442_v46 = vsub.f32 1.5, %v441_v21  ;;  %v531_v44 = vmul.f32 %v1092_v3, %v519_v28 }
 0x124   : > { %v905_v27 = vpop.eup %904  ;;  %v547_v30 = vadd.f32 %v886_v15, %v535_v25  ;;  %v537_v31 = vmul.f32 %v1092_v3, %v525_v23  ;;  %v462_v36 = vsub.f32 1.5, %v461_v29 }
 0x125   : > { %v443_v34 = vmul.f32 %v901_v4, %v442_v46  ;;  %v469_v35 = vmul.f32 %v905_v27, %v433_v6  ;;  %vm475_vm8 = vweird.f32 %v905_v27  ;;  %v543_v54 = vadd.f32 %v886_v15, %v531_v44 }
 0x126   : > { %v552_v37 = vpack.c.bf16 %v547_v30, %v546_v19  ;;  %v549_v39 = vadd.f32 %v886_v15, %v537_v31  ;;  %v463_v43 = vmul.f32 %v903_v11, %v462_v36  ;;  %vm476_vm10 = vmor %vm474_vm9, %vm475_vm8 }
 0x127   : > { %v447_v38 = vsel %vm446_vm5, %v901_v4, %v443_v34  ;;  %v470_v40 = vmul.f32 %v905_v27, %v469_v35  ;;  %v887_v4 = vld [vmem:[%s1158_s4] ss:$0 sm:$0xff] }
 0x128   : > { %v518_v42 = vmul.f32 %v447_v38, %v1019_v48  ;;  %806 = vmatmul.msk.bf16.vlgmr.msra.gmra.mxu2 %vm342_vm0, %v552_v37  ;;  %v553_v47 = vpack.c.bf16 %v549_v39, %v548_v45  ;;  %v467_v50 = vsel %vm466_vm7, %v903_v11, %v463_v43 }
 0x129   : > { %v471_v49 = vmul.f32 0.5, %v470_v40  ;;  %v520_v53 = vmul.f32 %v467_v50, %v1034_v60 }
 0x12a   : > { %807 = vmatmul.msk.bf16.vlgmr.msra.gmra.mxu3 %vm342_vm0, %v553_v47  ;;  %v530_v51 = vmul.f32 %v1092_v3, %v518_v42 }
 0x12b   : > { %v472_v52 = vsub.f32 1.5, %v471_v49  ;;  %v532_v58 = vmul.f32 %v1092_v3, %v520_v53 }
 0x12c   : > { %v542_v48 = vadd.f32 %v886_v15, %v530_v51 }
 0x12d   : > { %v473_v55 = vmul.f32 %v905_v27, %v472_v52  ;;  %v544_v62 = vadd.f32 %v886_v15, %v532_v58 }
 0x12e   : > { %v550_v56 = vpack.c.bf16 %v543_v54, %v542_v48 }
 0x12f   : > { %v477_v57 = vsel %vm476_vm10, %v905_v27, %v473_v55 }
 0x130   : > { %v521_v41 = vmul.f32 %v477_v57, %v1036_v61  ;;  %804 = vmatmul.msk.bf16.vlgmr.msra.gmra.mxu0 %vm342_vm0, %v550_v56 }
 0x132   : > { %v533_v59 = vmul.f32 %v1092_v3, %v521_v41 }
 0x134   : > { %v545_v63 = vadd.f32 %v886_v15, %v533_v59 }
 0x136   : > { %v551_v0 = vpack.c.bf16 %v545_v63, %v544_v62 }
 0x138   : > { %805 = vmatmul.msk.bf16.vlgmr.msra.gmra.mxu1 %vm342_vm0, %v551_v0 }
 0x1ab   : > { %v609_v60 = vpop.f32.mrf.mxu2 }
 0x1ac   : > { %v654_v5 = vadd.f32 %v887_v4, %v609_v60 }
 0x1ad   : > { %v614_v1 = vpop.f32.mrf.mxu3  ;;  %v599_v2 = vpop.f32.mrf.mxu0 }
 0x1ae   : > { %v656_v7 = vadd.f32 %v887_v4, %v614_v1  ;;  %v650_v33 = vadd.f32 %v887_v4, %v599_v2 }
 0x1b3   : > { %v611_v61 = vpop.f32.mrf.mxu2 }
 0x1b4   : > { %v655_v6 = vadd.f32 %v887_v4, %v611_v61 }
 0x1b5   : > { %v616_v3 = vpop.f32.mrf.mxu3  ;;  %v601_v26 = vpop.f32.mrf.mxu0 }
 0x1b6   : > { %v841_v8 = vpack.c.bf16 %v655_v6, %v654_v5  ;;  %v657_v9 = vadd.f32 %v887_v4, %v616_v3  ;;  %v651_v10 = vadd.f32 %v887_v4, %v601_v26  ;;  %v604_v11 = vpop.f32.mrf.mxu1 }
 0x1b7   : > { %v652_v32 = vadd.f32 %v887_v4, %v604_v11 }
 0x1b8   : > { %852 = vst [vmem:[%s311_s14 + $0x10] sm:$0xff] %v841_v8   ;;  %v846_v12 = vpack.c.bf16 %v657_v9, %v656_v7  ;;  %v831_v13 = vpack.c.bf16 %v651_v10, %v650_v33 }
 0x1ba   : > { %853 = vst [vmem:[%s311_s14 + $0x18] sm:$0xff] %v846_v12  }
 0x1bb   : > { %832 = vst [vmem:[%s311_s14] sm:$0xff] %v831_v13  }
 0x1be   : > { %v606_v14 = vpop.f32.mrf.mxu1 }
 0x1bf   : > { %v653_v15 = vadd.f32 %v887_v4, %v606_v14 }
 0x1c1   : > { %v836_v16 = vpack.c.bf16 %v653_v15, %v652_v32 }
 0x1c3   : > { %851 = vst [vmem:[%s311_s14 + $0x8] sm:$0xff] %v836_v16  }
 0x1c4 PF: > { %s15_s20 = sadd.s32 1, %s928_s20   ;;  %s1166_s18 = smov %s924_s19 }
 0x1c5   : > { %p12_p5 = scmp.ge.s32.totalorder %s15_s20, 4   ;;  %s1167_s19 = smov %s1169_s21 }
 0x1c7   :  { %14 = sbr.rel (!%p12_p5) target bundleno = 2 (0x2), region = 84 }

// kernel: dvae_clip_forward.22
= control target key start
LH: loop header
LB: loop body
LE: loop exit
PB: predicated region body
PF: predicated region fallthrough
CT: control target
= control target key end

     0   :  { %s1049_s18 = smov 0   ;;  %s1051_s19 = smov 0   ;;  %s1284_s0 = inlined_call_operand.vmem [shape: bf16[128,32], index: 0, kind: input, shape index: {}]   ;;  %s1285_s1 = inlined_call_operand.vmem [shape: bf16[32,128], index: 1, kind: input, shape index: {}]   ;;  %s1286_s2 = inlined_call_operand.vmem [shape: f32[1,32], index: 2, kind: input, shape index: {}]   ;;  %s1287_s3 = inlined_call_operand.vmem [shape: f32[1,32], index: 3, kind: input, shape index: {}]   ;;  %s1288_s4 = inlined_call_operand.vmem [shape: f32[1,128], index: 4, kind: input, shape index: {}]   ;;  %s1289_s5 = inlined_call_operand.vmem [shape: bf16[128,128], index: 5, kind: output, shape index: {}]  }
   0x1   :  { %s1053_s20 = smov 0  }
   0x2 LB: > { %s34_s21 = sadd.s32 1, %s1012_s19  ;;  %p863_p0 = scmp.ge.s32.totalorder %s1016_s20, 1  ;;  %s1016_s20 = sphi %s1053_s20, %s15_s20   ;;  %s1012_s19 = sphi %s1051_s19, %s1297_s19   ;;  %s1008_s18 = sphi %s1049_s18, %s1296_s18  }
   0x3   : > { %p36_p1 = scmp.ge.s32.totalorder %s34_s21, 2  ;;  %p238_p2 = scmp.lt.s32.totalorder %s1016_s20, 3 }
   0x5   : > { %s1299_s21 = smov (%p36_p1, %s34_s21), 0  ;;  %p239_p3 = pnand %p863_p0, %p238_p2 }
   0x6   : > { %s864_s22 = sshll.u32 (!%p239_p3), %s1008_s18, 3 }
   0x7   : > { %242 = sbr.rel (%p239_p3) target bundleno = 475 (0x1db), region = 40  ;;  %p284_p4 = scmp.lt.s32.totalorder (!%p239_p3), %s864_s22, 15 }
   0xc   : > { %s1301_s22 = smov (!%p284_p4, %s864_s22), 15  ;;  %vm342_vm0 = vcmask 261120   ;;  %v1018_v20 = vmov 32.0  }
   0xd   : > { %s865_s23 = sshll.u32 %s1301_s22, 2  ;;  %960 = vrcp.f32 %v1018_v20 }
   0xe   : > { %s290_s26 = scalar_lea.vmem %s1284_s0, %s865_s23  ;;  %s311_s14 = scalar_lea.vmem %s1289_s5, %s865_s23 }
   0xf   : > { %v922_v0 = vld [vmem:[%s290_s26 + $0x18] sm:$0xff]   ;;  %v921_v1 = vld [vmem:[%s290_s26 + $0x10] sm:$0xff]   ;;  %v885_v2 = vld [vmem:[%s290_s26] sm:$0xff]  }
  0x10   : > { %v898_v3 = vunpack.c.l.bf16 %v922_v0  ;;  %v894_v4 = vunpack.c.l.bf16 %v921_v1  ;;  %v886_v5 = vunpack.c.l.bf16 %v885_v2  ;;  %v899_v9 = vunpack.c.h.bf16 %v922_v0  ;;  %v920_v15 = vld [vmem:[%s290_s26 + $0x8] sm:$0xff]  }
  0x11   : > { %v895_v10 = vunpack.c.h.bf16 %v921_v1  ;;  %v887_v11 = vunpack.c.h.bf16 %v885_v2  ;;  %v890_v16 = vunpack.c.l.bf16 %v920_v15  ;;  %v891_v17 = vunpack.c.h.bf16 %v920_v15 }
  0x12   : > { %v361_v6 = vsel %vm342_vm0, %v898_v3, 0.0  ;;  %v355_v7 = vsel %vm342_vm0, %v894_v4, 0.0  ;;  %v343_v8 = vsel %vm342_vm0, %v886_v5, 0.0  ;;  %v364_v12 = vsel %vm342_vm0, %v899_v9, 0.0 }
  0x13   : > { %362 = vadd.xlane.f32.xlu1 %v361_v6  ;;  %356 = vadd.xlane.f32.xlu0 %v355_v7  ;;  %v358_v13 = vsel %vm342_vm0, %v895_v10, 0.0  ;;  %v346_v14 = vsel %vm342_vm0, %v887_v11, 0.0  ;;  %v349_v18 = vsel %vm342_vm0, %v890_v16, 0.0  ;;  %v352_v19 = vsel %vm342_vm0, %v891_v17, 0.0  ;;  %v961_v21 = vpop.eup %960  ;;  %v883_v7 = vld [vmem:[%s1285_s1 + $0x8] sm:$0xff] }
  0x14   : > { %344 = vadd.xlane.f32.xlu2 %v343_v8  ;;  %v368_v22 = vmul.f32 32.0, %v961_v21  ;;  %vm372_vm1 = vweird.f32 %v961_v21  ;;  %927 = vmatpush.bf16.msra.mxu2 %v883_v7 }
  0x15   : > { %928 = vmatpush.bf16.msra.mxu3 %v883_v7  ;;  %596 = vmatpush.bf16.msra.mxu0 %v883_v7 }
  0x16   : > { %v369_v23 = vsub.f32 1.0, %v368_v22  ;;  %926 = vmatpush.bf16.msra.mxu1 %v883_v7 }
  0x18   : > { %v370_v24 = vmul.f32 %v961_v21, %v369_v23 }
  0x1a   : > { %v371_v25 = vadd.f32 %v961_v21, %v370_v24 }
  0x1b   : > { %365 = vadd.xlane.f32.xlu1 %v364_v12  ;;  %359 = vadd.xlane.f32.xlu0 %v358_v13 }
  0x1c   : > { %347 = vadd.xlane.f32.xlu2 %v346_v14  ;;  %v1083_v26 = vsel %vm372_vm1, %v961_v21, %v371_v25 }
  0x23   : > { %350 = vadd.xlane.f32.xlu0 %v349_v18  ;;  %353 = vadd.xlane.f32.xlu1 %v352_v19 }
  0x86   : > { %v363_v27 = vpop.xlane.xlu1 %362  ;;  %v357_v28 = vpop.xlane.xlu0 %356 }
  0x87   : > { %v380_v29 = vmul.f32 %v1083_v26, %v363_v27  ;;  %v378_v30 = vmul.f32 %v1083_v26, %v357_v28  ;;  %v345_v31 = vpop.xlane.xlu2 %344 }
  0x88   : > { %v374_v40 = vmul.f32 %v1083_v26, %v345_v31 }
  0x89   : > { %v1087_v32 = vsub.f32 %v898_v3, %v380_v29  ;;  %v1089_v33 = vsub.f32 %v894_v4, %v378_v30 }
  0x8a   : > { %v1107_v48 = vsub.f32 %v886_v5, %v374_v40 }
  0x8b   : > { %v396_v34 = vmul.f32 %v1087_v32, %v1087_v32  ;;  %v394_v35 = vmul.f32 %v1089_v33, %v1089_v33 }
  0x8c   : > { %v390_v59 = vmul.f32 %v1107_v48, %v1107_v48 }
  0x8d   : > { %v416_v36 = vsel %vm342_vm0, %v396_v34, 0.0  ;;  %v410_v37 = vsel %vm342_vm0, %v394_v35, 0.0 }
  0x8e   : > { %v366_v38 = vpop.xlane.xlu1 %365  ;;  %v360_v39 = vpop.xlane.xlu0 %359  ;;  %417 = vadd.xlane.f32.xlu1 %v416_v36  ;;  %411 = vadd.xlane.f32.xlu2 %v410_v37  ;;  %v398_v63 = vsel %vm342_vm0, %v390_v59, 0.0 }
  0x8f   : > { %v381_v41 = vmul.f32 %v1083_v26, %v366_v38  ;;  %v379_v42 = vmul.f32 %v1083_v26, %v360_v39  ;;  %v348_v43 = vpop.xlane.xlu2 %347 }
  0x90   : > { %v375_v44 = vmul.f32 %v1083_v26, %v348_v43 }
  0x91   : > { %v1101_v45 = vsub.f32 %v899_v9, %v381_v41  ;;  %v1103_v46 = vsub.f32 %v895_v10, %v379_v42  ;;  %v882_v10 = vld [vmem:[%s1285_s1] sm:$0xff] }
  0x92   : > { %v1105_v47 = vsub.f32 %v887_v11, %v375_v44  ;;  %930 = vmatpush.bf16.msra.mxu2 %v882_v10  ;;  %931 = vmatpush.bf16.msra.mxu3 %v882_v10 }
  0x93   : > { %v395_v49 = vmul.f32 %v1103_v46, %v1103_v46  ;;  %v397_v50 = vmul.f32 %v1101_v45, %v1101_v45  ;;  %597 = vmatpush.bf16.msra.mxu0 %v882_v10  ;;  %929 = vmatpush.bf16.msra.mxu1 %v882_v10 }
  0x94   : > { %v391_v51 = vmul.f32 %v1105_v47, %v1105_v47 }
  0x95   : > { %v413_v52 = vsel %vm342_vm0, %v395_v49, 0.0  ;;  %v419_v53 = vsel %vm342_vm0, %v397_v50, 0.0 }
  0x96   : > { %414 = vadd.xlane.f32.xlu0 %v413_v52  ;;  %v351_v54 = vpop.xlane.xlu0 %350  ;;  %420 = vadd.xlane.f32.xlu2 %v419_v53  ;;  %v401_v55 = vsel %vm342_vm0, %v391_v51, 0.0  ;;  %v354_v56 = vpop.xlane.xlu1 %353 }
  0x97   : > { %v376_v57 = vmul.f32 %v1083_v26, %v351_v54  ;;  %402 = vadd.xlane.f32.xlu1 %v401_v55  ;;  %v377_v58 = vmul.f32 %v1083_v26, %v354_v56 }
  0x99   : > { %v1122_v60 = vsub.f32 %v890_v16, %v376_v57  ;;  %v1124_v61 = vsub.f32 %v891_v17, %v377_v58 }
  0x9b   : > { %v392_v62 = vmul.f32 %v1122_v60, %v1122_v60  ;;  %v393_v1 = vmul.f32 %v1124_v61, %v1124_v61 }
  0x9d   : > { %v404_v0 = vsel %vm342_vm0, %v392_v62, 0.0  ;;  %v407_v2 = vsel %vm342_vm0, %v393_v1, 0.0 }
  0x9e   : > { %405 = vadd.xlane.f32.xlu2 %v404_v0  ;;  %399 = vadd.xlane.f32.xlu0 %v398_v63 }
  0xa6   : > { %408 = vadd.xlane.f32.xlu0 %v407_v2 }
 0x101   : > { %v418_v3 = vpop.xlane.xlu1 %417  ;;  %v412_v4 = vpop.xlane.xlu2 %411 }
 0x102   : > { %v428_v5 = vmul.f32 %v418_v3, %v1083_v26  ;;  %v426_v6 = vmul.f32 %v412_v4, %v1083_v26  ;;  %v1180_v3 = vld [vmem:[%s1286_s2] ss:$0 sm:$0xff] }
 0x104   : > { %v436_v8 = vadd.f32 1e-05, %v428_v5  ;;  %v434_v9 = vadd.f32 1e-05, %v426_v6 }
 0x106   : > { %962 = vrsqrt.f32 %v436_v8  ;;  %vm504_vm2 = vweird.f32 %v436_v8  ;;  %vm484_vm5 = vweird.f32 %v434_v9 }
 0x107   : > { %964 = vrsqrt.f32 %v434_v9 }
 0x109   : > { %v415_v11 = vpop.xlane.xlu0 %414  ;;  %v421_v12 = vpop.xlane.xlu2 %420 }
 0x10a   : > { %v427_v13 = vmul.f32 %v415_v11, %v1083_v26  ;;  %v403_v14 = vpop.xlane.xlu1 %402  ;;  %v429_v15 = vmul.f32 %v421_v12, %v1083_v26 }
 0x10b   : > { %v423_v16 = vmul.f32 %v403_v14, %v1083_v26 }
 0x10c   : > { %v963_v17 = vpop.eup %962  ;;  %v435_v18 = vadd.f32 1e-05, %v427_v13  ;;  %v1144_v19 = vadd.f32 1e-05, %v429_v15  ;;  %v958_v15 = vld [vmem:[%s1287_s3] ss:$0 sm:$0xff] }
 0x10d   : > { %v965_v20 = vpop.eup %964  ;;  %v499_v21 = vmul.f32 %v963_v17, %v436_v8  ;;  %v431_v22 = vadd.f32 1e-05, %v423_v16  ;;  %vm505_vm4 = vweird.f32 %v963_v17 }
 0x10e   : > { %v479_v23 = vmul.f32 %v965_v20, %v434_v9  ;;  %966 = vrsqrt.f32 %v435_v18  ;;  %vm485_vm3 = vweird.f32 %v965_v20  ;;  %vm494_vm7 = vweird.f32 %v435_v18  ;;  %vm1167_vm8 = vmor %vm504_vm2, %vm505_vm4 }
 0x10f   : > { %v500_v24 = vmul.f32 %v963_v17, %v499_v21  ;;  %968 = vrsqrt.f32 %v431_v22  ;;  %vm1157_vm6 = vmor %vm484_vm5, %vm485_vm3  ;;  %vm454_vm9 = vweird.f32 %v431_v22  ;;  %vm514_vm12 = vweird.f32 %v1144_v19 }
 0x110   : > { %v480_v25 = vmul.f32 %v965_v20, %v479_v23  ;;  %970 = vrsqrt.f32 %v1144_v19 }
 0x111   : > { %v501_v27 = vmul.f32 0.5, %v500_v24  ;;  %v400_v28 = vpop.xlane.xlu0 %399  ;;  %v406_v29 = vpop.xlane.xlu2 %405 }
 0x112   : > { %v481_v30 = vmul.f32 0.5, %v480_v25  ;;  %v422_v31 = vmul.f32 %v400_v28, %v1083_v26  ;;  %v424_v34 = vmul.f32 %v406_v29, %v1083_v26 }
 0x113   : > { %v502_v35 = vsub.f32 1.5, %v501_v27 }
 0x114   : > { %v967_v36 = vpop.eup %966  ;;  %v482_v37 = vsub.f32 1.5, %v481_v30  ;;  %v1149_v38 = vadd.f32 1e-05, %v422_v31  ;;  %v1153_v41 = vadd.f32 1e-05, %v424_v34 }
 0x115   : > { %v1151_v39 = vpop.eup %968  ;;  %v489_v40 = vmul.f32 %v967_v36, %v435_v18  ;;  %v503_v43 = vmul.f32 %v963_v17, %v502_v35  ;;  %vm495_vm10 = vweird.f32 %v967_v36 }
 0x116   : > { %v971_v42 = vpop.eup %970  ;;  %v483_v44 = vmul.f32 %v965_v20, %v482_v37  ;;  %v449_v49 = vmul.f32 %v1151_v39, %v431_v22  ;;  %972 = vrsqrt.f32 %v1149_v38  ;;  %vm455_vm11 = vweird.f32 %v1151_v39  ;;  %vm496_vm14 = vmor %vm494_vm7, %vm495_vm10 }
 0x117   : > { %v490_v51 = vmul.f32 %v967_v36, %v489_v40  ;;  %v509_v52 = vmul.f32 %v971_v42, %v1144_v19  ;;  %974 = vrsqrt.f32 %v1153_v41  ;;  %v507_v59 = vsel %vm1167_vm8, %v963_v17, %v503_v43  ;;  %vm1189_vm15 = vmor %vm454_vm9, %vm455_vm11 }
 0x118   : > { %v487_v53 = vsel %vm1157_vm6, %v965_v20, %v483_v44  ;;  %v450_v54 = vmul.f32 %v1151_v39, %v449_v49  ;;  %vm515_vm13 = vweird.f32 %v971_v42  ;;  %v524_v7 = vmul.f32 %v507_v59, %v1087_v32 }
 0x119   : > { %v491_v56 = vmul.f32 0.5, %v490_v51  ;;  %v510_v57 = vmul.f32 %v971_v42, %v509_v52  ;;  %v409_v58 = vpop.xlane.xlu0 %408  ;;  %v522_v0 = vmul.f32 %v487_v53, %v1089_v33  ;;  %vm516_vm1 = vmor %vm514_vm12, %vm515_vm13  ;;  %vm444_vm2 = vweird.f32 %v1149_v38 }
 0x11a   : > { %v451_v62 = vmul.f32 0.5, %v450_v54  ;;  %v425_v63 = vmul.f32 %v409_v58, %v1083_v26  ;;  %v536_v22 = vmul.f32 %v1180_v3, %v524_v7  ;;  %vm464_vm4 = vweird.f32 %v1153_v41 }
 0x11b   : > { %v492_v1 = vsub.f32 1.5, %v491_v56  ;;  %v511_v2 = vmul.f32 0.5, %v510_v57  ;;  %v534_v32 = vmul.f32 %v1180_v3, %v522_v0 }
 0x11c   : > { %v973_v4 = vpop.eup %972  ;;  %v452_v5 = vsub.f32 1.5, %v451_v62  ;;  %v433_v6 = vadd.f32 1e-05, %v425_v63 }
 0x11d   : > { %v493_v26 = vmul.f32 %v967_v36, %v492_v1  ;;  %v512_v33 = vsub.f32 1.5, %v511_v2  ;;  %v439_v8 = vmul.f32 %v973_v4, %v1149_v38  ;;  %v975_v11 = vpop.eup %974  ;;  %vm445_vm3 = vweird.f32 %v973_v4 }
 0x11e   : > { %v453_v9 = vmul.f32 %v1151_v39, %v452_v5  ;;  %976 = vrsqrt.f32 %v433_v6  ;;  %v459_v17 = vmul.f32 %v975_v11, %v1153_v41  ;;  %v546_v19 = vadd.f32 %v958_v15, %v534_v32  ;;  %vm446_vm5 = vmor %vm444_vm2, %vm445_vm3 }
 0x11f   : > { %v497_v12 = vsel %vm496_vm14, %v967_v36, %v493_v26  ;;  %v513_v13 = vmul.f32 %v971_v42, %v512_v33  ;;  %v440_v14 = vmul.f32 %v973_v4, %v439_v8  ;;  %vm465_vm6 = vweird.f32 %v975_v11 }
 0x120   : > { %v523_v16 = vmul.f32 %v497_v12, %v1103_v46  ;;  %v457_v18 = vsel %vm1189_vm15, %v1151_v39, %v453_v9  ;;  %v460_v24 = vmul.f32 %v975_v11, %v459_v17  ;;  %vm466_vm7 = vmor %vm464_vm4, %vm465_vm6  ;;  %vm474_vm9 = vweird.f32 %v433_v6 }
 0x121   : > { %v517_v20 = vsel %vm516_vm1, %v971_v42, %v513_v13  ;;  %v441_v21 = vmul.f32 0.5, %v440_v14  ;;  %v519_v28 = vmul.f32 %v457_v18, %v1105_v47 }
 0x122   : > { %v525_v23 = vmul.f32 %v517_v20, %v1101_v45  ;;  %v535_v25 = vmul.f32 %v1180_v3, %v523_v16  ;;  %v461_v29 = vmul.f32 0.5, %v460_v24  ;;  %v548_v45 = vadd.f32 %v958_v15, %v536_v22 }
 0x123   : > { %v442_v46 = vsub.f32 1.5, %v441_v21  ;;  %v531_v44 = vmul.f32 %v1180_v3, %v519_v28 }
 0x124   : > { %v977_v27 = vpop.eup %976  ;;  %v547_v30 = vadd.f32 %v958_v15, %v535_v25  ;;  %v537_v31 = vmul.f32 %v1180_v3, %v525_v23  ;;  %v462_v36 = vsub.f32 1.5, %v461_v29 }
 0x125   : > { %v443_v34 = vmul.f32 %v973_v4, %v442_v46  ;;  %v469_v35 = vmul.f32 %v977_v27, %v433_v6  ;;  %vm475_vm8 = vweird.f32 %v977_v27  ;;  %v543_v54 = vadd.f32 %v958_v15, %v531_v44 }
 0x126   : > { %v552_v37 = vpack.c.bf16 %v547_v30, %v546_v19  ;;  %v549_v39 = vadd.f32 %v958_v15, %v537_v31  ;;  %v463_v43 = vmul.f32 %v975_v11, %v462_v36  ;;  %vm476_vm10 = vmor %vm474_vm9, %vm475_vm8 }
 0x127   : > { %v447_v38 = vsel %vm446_vm5, %v973_v4, %v443_v34  ;;  %v470_v40 = vmul.f32 %v977_v27, %v469_v35 }
 0x128   : > { %v518_v42 = vmul.f32 %v447_v38, %v1107_v48  ;;  %878 = vmatmul.msk.bf16.vlgmr.msra.gmra.mxu2 %vm342_vm0, %v552_v37  ;;  %v553_v47 = vpack.c.bf16 %v549_v39, %v548_v45  ;;  %v467_v50 = vsel %vm466_vm7, %v975_v11, %v463_v43 }
 0x129   : > { %v471_v49 = vmul.f32 0.5, %v470_v40  ;;  %v520_v53 = vmul.f32 %v467_v50, %v1122_v60  ;;  %v959_v60 = vld [vmem:[%s1288_s4] ss:$0 sm:$0xff] }
 0x12a   : > { %879 = vmatmul.msk.bf16.vlgmr.msra.gmra.mxu3 %vm342_vm0, %v553_v47  ;;  %v530_v51 = vmul.f32 %v1180_v3, %v518_v42 }
 0x12b   : > { %v472_v52 = vsub.f32 1.5, %v471_v49  ;;  %v532_v58 = vmul.f32 %v1180_v3, %v520_v53 }
 0x12c   : > { %v542_v48 = vadd.f32 %v958_v15, %v530_v51 }
 0x12d   : > { %v473_v55 = vmul.f32 %v977_v27, %v472_v52  ;;  %v544_v62 = vadd.f32 %v958_v15, %v532_v58 }
 0x12e   : > { %v550_v56 = vpack.c.bf16 %v543_v54, %v542_v48 }
 0x12f   : > { %v477_v57 = vsel %vm476_vm10, %v977_v27, %v473_v55 }
 0x130   : > { %v521_v41 = vmul.f32 %v477_v57, %v1124_v61  ;;  %876 = vmatmul.msk.bf16.vlgmr.msra.gmra.mxu0 %vm342_vm0, %v550_v56 }
 0x132   : > { %v533_v59 = vmul.f32 %v1180_v3, %v521_v41 }
 0x134   : > { %v545_v63 = vadd.f32 %v958_v15, %v533_v59 }
 0x136   : > { %v551_v0 = vpack.c.bf16 %v545_v63, %v544_v62 }
 0x138   : > { %877 = vmatmul.msk.bf16.vlgmr.msra.gmra.mxu1 %vm342_vm0, %v551_v0 }
 0x1ab   : > { %v609_v1 = vpop.f32.mrf.mxu2 }
 0x1ac   : > { %v1228_v2 = vadd.f32 %v959_v60, %v609_v1 }
 0x1ad   : > { %v614_v4 = vpop.f32.mrf.mxu3  ;;  %v599_v61 = vpop.f32.mrf.mxu0 }
 0x1ae   : > { %v662_v5 = vmul.f32 %v1228_v2, %v1228_v2  ;;  %v1232_v6 = vadd.f32 %v959_v60, %v614_v4  ;;  %v1234_v3 = vadd.f32 %v959_v60, %v599_v61 }
 0x1b0   : > { %v670_v7 = vmul.f32 %v662_v5, %v1228_v2  ;;  %v664_v26 = vmul.f32 %v1232_v6, %v1232_v6  ;;  %v658_v33 = vmul.f32 %v1234_v3, %v1234_v3 }
 0x1b2   : > { %v678_v8 = vmul.f32 0.044715, %v670_v7  ;;  %v672_v9 = vmul.f32 %v664_v26, %v1232_v6  ;;  %v666_v10 = vmul.f32 %v658_v33, %v1234_v3 }
 0x1b3   : > { %v611_v11 = vpop.f32.mrf.mxu2 }
 0x1b4   : > { %v686_v12 = vadd.f32 %v678_v8, %v1228_v2  ;;  %v680_v13 = vmul.f32 0.044715, %v672_v9  ;;  %v674_v14 = vmul.f32 0.044715, %v666_v10  ;;  %v655_v32 = vadd.f32 %v959_v60, %v611_v11 }
 0x1b5   : > { %v616_v15 = vpop.f32.mrf.mxu3  ;;  %v601_v16 = vpop.f32.mrf.mxu0 }
 0x1b6   : > { %v694_v17 = vmul.f32 0.7978846, %v686_v12  ;;  %v688_v18 = vadd.f32 %v680_v13, %v1232_v6  ;;  %v682_v20 = vadd.f32 %v674_v14, %v1234_v3  ;;  %v663_v21 = vmul.f32 %v655_v32, %v655_v32  ;;  %v604_v22 = vpop.f32.mrf.mxu1 }
 0x1b7   : > { %v1246_v23 = vadd.f32 %v959_v60, %v616_v15  ;;  %v1248_v24 = vadd.f32 %v959_v60, %v601_v16  ;;  %v1250_v25 = vadd.f32 %v959_v60, %v604_v22 }
 0x1b8   : > { %v671_v46 = vmul.f32 %v663_v21, %v655_v32  ;;  %v696_v19 = vmul.f32 0.7978846, %v688_v18  ;;  %978 = vtanh.f32 %v694_v17  ;;  %v690_v30 = vmul.f32 0.7978846, %v682_v20 }
 0x1b9   : > { %v665_v27 = vmul.f32 %v1246_v23, %v1246_v23  ;;  %v659_v28 = vmul.f32 %v1248_v24, %v1248_v24  ;;  %v660_v29 = vmul.f32 %v1250_v25, %v1250_v25 }
 0x1ba   : > { %v679_v31 = vmul.f32 0.044715, %v671_v46  ;;  %980 = vtanh.f32 %v696_v19 }
 0x1bb   : > { %v673_v34 = vmul.f32 %v665_v27, %v1246_v23  ;;  %v667_v35 = vmul.f32 %v659_v28, %v1248_v24  ;;  %v668_v45 = vmul.f32 %v660_v29, %v1250_v25  ;;  %982 = vtanh.f32 %v690_v30 }
 0x1bc   : > { %v687_v36 = vadd.f32 %v679_v31, %v655_v32 }
 0x1bd   : > { %v681_v37 = vmul.f32 0.044715, %v673_v34  ;;  %v675_v39 = vmul.f32 0.044715, %v667_v35  ;;  %v676_v38 = vmul.f32 0.044715, %v668_v45 }
 0x1be   : > { %v695_v40 = vmul.f32 0.7978846, %v687_v36  ;;  %v606_v42 = vpop.f32.mrf.mxu1  ;;  %v979_v49 = vpop.eup %978 }
 0x1bf   : > { %v689_v43 = vadd.f32 %v681_v37, %v1246_v23  ;;  %v683_v47 = vadd.f32 %v675_v39, %v1248_v24  ;;  %v684_v44 = vadd.f32 %v676_v38, %v1250_v25  ;;  %v653_v50 = vadd.f32 %v959_v60, %v606_v42 }
 0x1c0   : > { %984 = vtanh.f32 %v695_v40  ;;  %v981_v54 = vpop.eup %980  ;;  %v710_v55 = vadd.f32 1.0, %v979_v49 }
 0x1c1   : > { %v697_v51 = vmul.f32 0.7978846, %v689_v43  ;;  %v691_v52 = vmul.f32 0.7978846, %v683_v47  ;;  %v692_v53 = vmul.f32 0.7978846, %v684_v44  ;;  %v661_v48 = vmul.f32 %v653_v50, %v653_v50  ;;  %v983_v56 = vpop.eup %982 }
 0x1c2   : > { %v712_v58 = vadd.f32 1.0, %v981_v54  ;;  %v718_v62 = vmul.f32 0.5, %v710_v55  ;;  %v706_v63 = vadd.f32 1.0, %v983_v56 }
 0x1c3   : > { %986 = vtanh.f32 %v697_v51  ;;  %v669_v57 = vmul.f32 %v661_v48, %v653_v50 }
 0x1c4   : > { %988 = vtanh.f32 %v691_v52  ;;  %v720_v5 = vmul.f32 0.5, %v712_v58  ;;  %v726_v33 = vmul.f32 %v718_v62, %v1228_v2  ;;  %v714_v8 = vmul.f32 0.5, %v706_v63 }
 0x1c5   : > { %990 = vtanh.f32 %v692_v53  ;;  %v677_v59 = vmul.f32 0.044715, %v669_v57 }
 0x1c6   : > { %v985_v41 = vpop.eup %984  ;;  %v728_v15 = vmul.f32 %v720_v5, %v1232_v6  ;;  %v722_v17 = vmul.f32 %v714_v8, %v1234_v3 }
 0x1c7   : > { %v711_v0 = vadd.f32 1.0, %v985_v41  ;;  %v685_v1 = vadd.f32 %v677_v59, %v653_v50 }
 0x1c9   : > { %v987_v60 = vpop.eup %986  ;;  %v719_v4 = vmul.f32 0.5, %v711_v0  ;;  %v693_v26 = vmul.f32 0.7978846, %v685_v1 }
 0x1ca   : > { %v989_v61 = vpop.eup %988  ;;  %v713_v7 = vadd.f32 1.0, %v987_v60 }
 0x1cb   : > { %v727_v9 = vmul.f32 %v719_v4, %v655_v32  ;;  %v707_v10 = vadd.f32 1.0, %v989_v61  ;;  %v991_v11 = vpop.eup %990  ;;  %992 = vtanh.f32 %v693_v26 }
 0x1cc   : > { %v721_v12 = vmul.f32 0.5, %v713_v7  ;;  %v708_v32 = vadd.f32 1.0, %v991_v11 }
 0x1cd   : > { %v913_v13 = vpack.c.bf16 %v727_v9, %v726_v33  ;;  %v715_v14 = vmul.f32 0.5, %v707_v10 }
 0x1ce   : > { %v729_v16 = vmul.f32 %v721_v12, %v1246_v23  ;;  %v716_v22 = vmul.f32 0.5, %v708_v32 }
 0x1cf   : > { %924 = vst [vmem:[%s311_s14 + $0x10] sm:$0xff] %v913_v13   ;;  %v723_v2 = vmul.f32 %v715_v14, %v1248_v24 }
 0x1d0   : > { %v918_v18 = vpack.c.bf16 %v729_v16, %v728_v15  ;;  %v724_v27 = vmul.f32 %v716_v22, %v1250_v25 }
 0x1d1   : > { %v903_v20 = vpack.c.bf16 %v723_v2, %v722_v17  ;;  %v993_v21 = vpop.eup %992 }
 0x1d2   : > { %925 = vst [vmem:[%s311_s14 + $0x18] sm:$0xff] %v918_v18   ;;  %v709_v46 = vadd.f32 1.0, %v993_v21 }
 0x1d3   : > { %904 = vst [vmem:[%s311_s14] sm:$0xff] %v903_v20  }
 0x1d4   : > { %v717_v19 = vmul.f32 0.5, %v709_v46 }
 0x1d6   : > { %v725_v28 = vmul.f32 %v717_v19, %v653_v50 }
 0x1d8   : > { %v908_v6 = vpack.c.bf16 %v725_v28, %v724_v27 }
 0x1da   : > { %923 = vst [vmem:[%s311_s14 + $0x8] sm:$0xff] %v908_v6  }
 0x1db PF: > { %s15_s20 = sadd.s32 1, %s1016_s20   ;;  %s1296_s18 = smov %s1012_s19 }
 0x1dc   : > { %p12_p5 = scmp.ge.s32.totalorder %s15_s20, 4   ;;  %s1297_s19 = smov %s1299_s21 }
 0x1de   :  { %14 = sbr.rel (!%p12_p5) target bundleno = 2 (0x2), region = 84 }

// kernel: dvae_clip_forward.21
= control target key start
LH: loop header
LB: loop body
LE: loop exit
PB: predicated region body
PF: predicated region fallthrough
CT: control target
= control target key end

     0   :  { %s802_s15 = smov 0   ;;  %s804_s16 = smov 0   ;;  %s852_s0 = inlined_call_operand.vmem [shape: bf16[128,32], index: 0, kind: input, shape index: {}]   ;;  %s853_s1 = inlined_call_operand.vmem [shape: bf16[32,128], index: 1, kind: input, shape index: {}]   ;;  %s854_s2 = inlined_call_operand.vmem [shape: f32[1,128], index: 2, kind: input, shape index: {}]   ;;  %s855_s3 = inlined_call_operand.vmem [shape: bf16[128,128], index: 3, kind: input, shape index: {}]   ;;  %s856_s4 = inlined_call_operand.vmem [shape: bf16[128,128], index: 4, kind: output, shape index: {}]  }
   0x1   :  { %s806_s17 = smov 0  }
   0x2 LB: > { %s33_s18 = sadd.s32 1, %s771_s16  ;;  %p637_p0 = scmp.ge.s32.totalorder %s775_s17, 1  ;;  %s775_s17 = sphi %s806_s17, %s14_s17   ;;  %s771_s16 = sphi %s804_s16, %s858_s16   ;;  %s767_s15 = sphi %s802_s15, %s857_s15  }
   0x3   : > { %p35_p1 = scmp.ge.s32.totalorder %s33_s18, 2  ;;  %p229_p2 = scmp.lt.s32.totalorder %s775_s17, 3 }
   0x5   : > { %s860_s18 = smov (%p35_p1, %s33_s18), 0  ;;  %p230_p3 = pnand %p637_p0, %p229_p2 }
   0x6   : > { %s638_s21 = sshll.u32 (!%p230_p3), %s767_s15, 3 }
   0x7   : > { %233 = sbr.rel (%p230_p3) target bundleno = 169 (0xa9), region = 36  ;;  %p281_p4 = scmp.lt.s32.totalorder (!%p230_p3), %s638_s21, 15 }
   0xc   : > { %v679_v0 = vld [vmem:[%s853_s1 + $0x8] sm:$0xff]  ;;  %v678_v1 = vld [vmem:[%s853_s1] sm:$0xff]  ;;  %s862_s21 = smov (!%p281_p4, %s638_s21), 15  ;;  %vm384_vm0 = vcmask 261120  }
   0xd   : > { %403 = vmatpush.bf16.msra.mxu0 %v679_v0  ;;  %722 = vmatpush.bf16.msra.mxu1 %v679_v0  ;;  %s826_s24 = sshll.u32 %s862_s21, 2  ;;  %v752_v8 = vld [vmem:[%s854_s2] ss:$0 sm:$0xff] }
   0xe   : > { %723 = vmatpush.bf16.msra.mxu2 %v679_v0  ;;  %724 = vmatpush.bf16.msra.mxu3 %v679_v0  ;;  %s287_s27 = scalar_lea.vmem %s852_s0, %s826_s24  ;;  %s308_s30 = scalar_lea.vmem %s855_s3, %s826_s24 }
   0xf   : > { %v674_v2 = vld [vmem:[%s287_s27] sm:$0xff]  ;;  %v675_v3 = vld [vmem:[%s287_s27 + $0x8] sm:$0xff]  ;;  %v676_v4 = vld [vmem:[%s287_s27 + $0x10] sm:$0xff]  ;;  %s317_s9 = scalar_lea.vmem %s856_s4, %s826_s24 }
  0x10   : > { %v677_v5 = vld [vmem:[%s287_s27 + $0x18] sm:$0xff]  ;;  %v681_v9 = vld [vmem:[%s308_s30] sm:$0xff]   ;;  %v716_v10 = vld [vmem:[%s308_s30 + $0x8] sm:$0xff]  }
  0x11   : > { %404 = vmatpush.bf16.msra.mxu0 %v678_v1  ;;  %725 = vmatpush.bf16.msra.mxu1 %v678_v1  ;;  %v682_v11 = vunpack.c.l.bf16 %v681_v9  ;;  %v686_v12 = vunpack.c.l.bf16 %v716_v10  ;;  %v683_v17 = vunpack.c.h.bf16 %v681_v9  ;;  %v687_v18 = vunpack.c.h.bf16 %v716_v10  ;;  %v717_v23 = vld [vmem:[%s308_s30 + $0x10] sm:$0xff]   ;;  %v718_v24 = vld [vmem:[%s308_s30 + $0x18] sm:$0xff]  }
  0x12   : > { %726 = vmatpush.bf16.msra.mxu2 %v678_v1  ;;  %727 = vmatpush.bf16.msra.mxu3 %v678_v1  ;;  %v690_v29 = vunpack.c.l.bf16 %v717_v23  ;;  %v694_v30 = vunpack.c.l.bf16 %v718_v24  ;;  %v691_v35 = vunpack.c.h.bf16 %v717_v23  ;;  %v695_v36 = vunpack.c.h.bf16 %v718_v24 }
  0x14   : > { %668 = vmatmul.msk.bf16.vlgmr.msra.gmra.mxu0 %vm384_vm0, %v674_v2  ;;  %669 = vmatmul.msk.bf16.vlgmr.msra.gmra.mxu1 %vm384_vm0, %v675_v3 }
  0x15   : > { %670 = vmatmul.msk.bf16.vlgmr.msra.gmra.mxu2 %vm384_vm0, %v676_v4  ;;  %671 = vmatmul.msk.bf16.vlgmr.msra.gmra.mxu3 %vm384_vm0, %v677_v5 }
  0x91   : > { %v406_v6 = vpop.f32.mrf.mxu0  ;;  %v411_v7 = vpop.f32.mrf.mxu1 }
  0x92   : > { %v457_v13 = vadd.f32 %v752_v8, %v406_v6  ;;  %v459_v14 = vadd.f32 %v752_v8, %v411_v7 }
  0x94   : > { %v481_v25 = vadd.f32 %v682_v11, %v457_v13  ;;  %v483_v26 = vadd.f32 %v686_v12, %v459_v14 }
  0x98   : > { %v416_v15 = vpop.f32.mrf.mxu2  ;;  %v421_v16 = vpop.f32.mrf.mxu3 }
  0x99   : > { %v408_v19 = vpop.f32.mrf.mxu0  ;;  %v413_v20 = vpop.f32.mrf.mxu1  ;;  %v461_v33 = vadd.f32 %v752_v8, %v416_v15  ;;  %v463_v34 = vadd.f32 %v752_v8, %v421_v16 }
  0x9a   : > { %v458_v21 = vadd.f32 %v752_v8, %v408_v19  ;;  %v460_v22 = vadd.f32 %v752_v8, %v413_v20 }
  0x9b   : > { %v485_v41 = vadd.f32 %v690_v29, %v461_v33  ;;  %v487_v42 = vadd.f32 %v694_v30, %v463_v34 }
  0x9c   : > { %v482_v27 = vadd.f32 %v683_v17, %v458_v21  ;;  %v484_v28 = vadd.f32 %v687_v18, %v460_v22 }
  0x9e   : > { %v699_v31 = vpack.c.bf16 %v482_v27, %v481_v25  ;;  %v704_v32 = vpack.c.bf16 %v484_v28, %v483_v26 }
  0xa0   : > { %700 = vst [vmem:[%s317_s9] sm:$0xff] %v699_v31   ;;  %v418_v37 = vpop.f32.mrf.mxu2  ;;  %v423_v38 = vpop.f32.mrf.mxu3 }
  0xa1   : > { %719 = vst [vmem:[%s317_s9 + $0x8] sm:$0xff] %v704_v32   ;;  %v462_v39 = vadd.f32 %v752_v8, %v418_v37  ;;  %v464_v40 = vadd.f32 %v752_v8, %v423_v38 }
  0xa3   : > { %v486_v43 = vadd.f32 %v691_v35, %v462_v39  ;;  %v488_v44 = vadd.f32 %v695_v36, %v464_v40 }
  0xa5   : > { %v709_v45 = vpack.c.bf16 %v486_v43, %v485_v41  ;;  %v714_v46 = vpack.c.bf16 %v488_v44, %v487_v42 }
  0xa7   : > { %720 = vst [vmem:[%s317_s9 + $0x10] sm:$0xff] %v709_v45  }
  0xa8   : > { %721 = vst [vmem:[%s317_s9 + $0x18] sm:$0xff] %v714_v46  }
  0xa9 PF: > { %s14_s17 = sadd.s32 1, %s775_s17   ;;  %s857_s15 = smov %s771_s16 }
  0xaa   : > { %p11_p5 = scmp.ge.s32.totalorder %s14_s17, 4   ;;  %s858_s16 = smov %s860_s18 }
  0xac   :  { %13 = sbr.rel (!%p11_p5) target bundleno = 2 (0x2), region = 83 }

// kernel: dvae_clip_forward.23
= control target key start
LH: loop header
LB: loop body
LE: loop exit
PB: predicated region body
PF: predicated region fallthrough
CT: control target
= control target key end

     0   :  { %s884_s15 = smov 0   ;;  %s886_s16 = smov 0   ;;  %s955_s0 = inlined_call_operand.vmem [shape: bf16[128,128], index: 0, kind: input, shape index: {}]   ;;  %s956_s1 = inlined_call_operand.vmem [shape: bf16[128,128], index: 1, kind: input, shape index: {}]   ;;  %s957_s2 = inlined_call_operand.vmem [shape: f32[1,128], index: 2, kind: input, shape index: {}]   ;;  %s958_s3 = inlined_call_operand.vmem [shape: bf16[128,128], index: 3, kind: input, shape index: {}]   ;;  %s959_s4 = inlined_call_operand.vmem [shape: bf16[128,128], index: 4, kind: output, shape index: {}]  }
   0x1   :  { %s888_s17 = smov 0  }
   0x2 LB: > { %s33_s18 = sadd.s32 1, %s853_s16  ;;  %p675_p0 = scmp.ge.s32.totalorder %s857_s17, 1  ;;  %s857_s17 = sphi %s888_s17, %s14_s17   ;;  %s853_s16 = sphi %s886_s16, %s961_s16   ;;  %s849_s15 = sphi %s884_s15, %s960_s15  }
   0x3   : > { %p35_p1 = scmp.ge.s32.totalorder %s33_s18, 2  ;;  %p229_p2 = scmp.lt.s32.totalorder %s857_s17, 3 }
   0x5   : > { %s963_s18 = smov (%p35_p1, %s33_s18), 0  ;;  %p230_p3 = pnand %p675_p0, %p229_p2 }
   0x6   : > { %s676_s27 = sshll.u32 (!%p230_p3), %s849_s15, 3 }
   0x7   : > { %233 = sbr.rel (%p230_p3) target bundleno = 193 (0xc1), region = 36  ;;  %p281_p4 = scmp.lt.s32.totalorder (!%p230_p3), %s676_s27, 15 }
   0xc   : > { %v743_v0 = vld [vmem:[%s956_s1 + $0x38] sm:$0xff]  ;;  %v742_v1 = vld [vmem:[%s956_s1 + $0x30] sm:$0xff]  ;;  %v741_v2 = vld [vmem:[%s956_s1 + $0x28] sm:$0xff]  ;;  %s965_s27 = smov (!%p281_p4, %s676_s27), 15 }
   0xd   : > { %435 = vmatpush.bf16.msra.mxu0 %v743_v0  ;;  %786 = vmatpush.bf16.msra.mxu1 %v743_v0  ;;  %v740_v3 = vld [vmem:[%s956_s1 + $0x20] sm:$0xff]  ;;  %v739_v4 = vld [vmem:[%s956_s1 + $0x18] sm:$0xff]  ;;  %v738_v5 = vld [vmem:[%s956_s1 + $0x10] sm:$0xff]  ;;  %s926_s8 = sshll.u32 %s965_s27, 2 }
   0xe   : > { %787 = vmatpush.bf16.msra.mxu2 %v743_v0  ;;  %788 = vmatpush.bf16.msra.mxu3 %v743_v0  ;;  %v737_v6 = vld [vmem:[%s956_s1 + $0x8] sm:$0xff]  ;;  %v736_v7 = vld [vmem:[%s956_s1] sm:$0xff]  ;;  %s287_s13 = scalar_lea.vmem %s955_s0, %s926_s8  ;;  %s308_s19 = scalar_lea.vmem %s958_s3, %s926_s8 }
   0xf   : > { %v732_v8 = vld [vmem:[%s287_s13] sm:$0xff]  ;;  %v733_v9 = vld [vmem:[%s287_s13 + $0x8] sm:$0xff]  ;;  %v734_v10 = vld [vmem:[%s287_s13 + $0x10] sm:$0xff]  ;;  %s317_s24 = scalar_lea.vmem %s959_s4, %s926_s8 }
  0x10   : > { %v735_v11 = vld [vmem:[%s287_s13 + $0x18] sm:$0xff]  ;;  %v834_v14 = vld [vmem:[%s957_s2] ss:$0 sm:$0xff]  ;;  %v780_v16 = vld [vmem:[%s308_s19 + $0x8] sm:$0xff]  }
  0x11   : > { %436 = vmatpush.bf16.msra.mxu0 %v742_v1  ;;  %789 = vmatpush.bf16.msra.mxu1 %v742_v1  ;;  %v745_v15 = vld [vmem:[%s308_s19] sm:$0xff]   ;;  %v750_v18 = vunpack.c.l.bf16 %v780_v16  ;;  %v751_v24 = vunpack.c.h.bf16 %v780_v16  ;;  %v781_v29 = vld [vmem:[%s308_s19 + $0x10] sm:$0xff]   ;;  %v782_v30 = vld [vmem:[%s308_s19 + $0x18] sm:$0xff]  }
  0x12   : > { %790 = vmatpush.bf16.msra.mxu2 %v742_v1  ;;  %791 = vmatpush.bf16.msra.mxu3 %v742_v1  ;;  %v746_v17 = vunpack.c.l.bf16 %v745_v15  ;;  %v747_v23 = vunpack.c.h.bf16 %v745_v15  ;;  %v754_v35 = vunpack.c.l.bf16 %v781_v29  ;;  %v758_v36 = vunpack.c.l.bf16 %v782_v30 }
  0x13   : > { %v755_v41 = vunpack.c.h.bf16 %v781_v29  ;;  %v759_v42 = vunpack.c.h.bf16 %v782_v30 }
  0x15   : > { %437 = vmatpush.bf16.msra.mxu0 %v741_v2  ;;  %792 = vmatpush.bf16.msra.mxu1 %v741_v2 }
  0x16   : > { %793 = vmatpush.bf16.msra.mxu2 %v741_v2  ;;  %794 = vmatpush.bf16.msra.mxu3 %v741_v2 }
  0x19   : > { %438 = vmatpush.bf16.msra.mxu0 %v740_v3  ;;  %795 = vmatpush.bf16.msra.mxu1 %v740_v3 }
  0x1a   : > { %796 = vmatpush.bf16.msra.mxu2 %v740_v3  ;;  %797 = vmatpush.bf16.msra.mxu3 %v740_v3 }
  0x1d   : > { %439 = vmatpush.bf16.msra.mxu0 %v739_v4  ;;  %798 = vmatpush.bf16.msra.mxu1 %v739_v4 }
  0x1e   : > { %799 = vmatpush.bf16.msra.mxu2 %v739_v4  ;;  %800 = vmatpush.bf16.msra.mxu3 %v739_v4 }
  0x21   : > { %440 = vmatpush.bf16.msra.mxu0 %v738_v5  ;;  %801 = vmatpush.bf16.msra.mxu1 %v738_v5 }
  0x22   : > { %802 = vmatpush.bf16.msra.mxu2 %v738_v5  ;;  %803 = vmatpush.bf16.msra.mxu3 %v738_v5 }
  0x25   : > { %441 = vmatpush.bf16.msra.mxu0 %v737_v6  ;;  %804 = vmatpush.bf16.msra.mxu1 %v737_v6 }
  0x26   : > { %805 = vmatpush.bf16.msra.mxu2 %v737_v6  ;;  %806 = vmatpush.bf16.msra.mxu3 %v737_v6 }
  0x29   : > { %442 = vmatpush.bf16.msra.mxu0 %v736_v7  ;;  %807 = vmatpush.bf16.msra.mxu1 %v736_v7 }
  0x2a   : > { %808 = vmatpush.bf16.msra.mxu2 %v736_v7  ;;  %809 = vmatpush.bf16.msra.mxu3 %v736_v7 }
  0x2c   : > { %443 = vmatmul.bf16.vlgmr.msra.gmra.mxu0 %v732_v8  ;;  %448 = vmatmul.bf16.vlgmr.msra.gmra.mxu1 %v733_v9 }
  0x2d   : > { %453 = vmatmul.bf16.vlgmr.msra.gmra.mxu2 %v734_v10  ;;  %458 = vmatmul.bf16.vlgmr.msra.gmra.mxu3 %v735_v11 }
  0xa9   : > { %v444_v12 = vpop.f32.mrf.mxu0  ;;  %v449_v13 = vpop.f32.mrf.mxu1 }
  0xaa   : > { %v495_v19 = vadd.f32 %v834_v14, %v444_v12  ;;  %v497_v20 = vadd.f32 %v834_v14, %v449_v13 }
  0xac   : > { %v519_v31 = vadd.f32 %v746_v17, %v495_v19  ;;  %v521_v32 = vadd.f32 %v750_v18, %v497_v20 }
  0xb0   : > { %v454_v21 = vpop.f32.mrf.mxu2  ;;  %v459_v22 = vpop.f32.mrf.mxu3 }
  0xb1   : > { %v446_v25 = vpop.f32.mrf.mxu0  ;;  %v451_v26 = vpop.f32.mrf.mxu1  ;;  %v499_v39 = vadd.f32 %v834_v14, %v454_v21  ;;  %v501_v40 = vadd.f32 %v834_v14, %v459_v22 }
  0xb2   : > { %v496_v27 = vadd.f32 %v834_v14, %v446_v25  ;;  %v498_v28 = vadd.f32 %v834_v14, %v451_v26 }
  0xb3   : > { %v523_v47 = vadd.f32 %v754_v35, %v499_v39  ;;  %v525_v48 = vadd.f32 %v758_v36, %v501_v40 }
  0xb4   : > { %v520_v33 = vadd.f32 %v747_v23, %v496_v27  ;;  %v522_v34 = vadd.f32 %v751_v24, %v498_v28 }
  0xb6   : > { %v763_v37 = vpack.c.bf16 %v520_v33, %v519_v31  ;;  %v768_v38 = vpack.c.bf16 %v522_v34, %v521_v32 }
  0xb8   : > { %764 = vst [vmem:[%s317_s24] sm:$0xff] %v763_v37   ;;  %v456_v43 = vpop.f32.mrf.mxu2  ;;  %v461_v44 = vpop.f32.mrf.mxu3 }
  0xb9   : > { %783 = vst [vmem:[%s317_s24 + $0x8] sm:$0xff] %v768_v38   ;;  %v500_v45 = vadd.f32 %v834_v14, %v456_v43  ;;  %v502_v46 = vadd.f32 %v834_v14, %v461_v44 }
  0xbb   : > { %v524_v49 = vadd.f32 %v755_v41, %v500_v45  ;;  %v526_v50 = vadd.f32 %v759_v42, %v502_v46 }
  0xbd   : > { %v773_v51 = vpack.c.bf16 %v524_v49, %v523_v47  ;;  %v778_v52 = vpack.c.bf16 %v526_v50, %v525_v48 }
  0xbf   : > { %784 = vst [vmem:[%s317_s24 + $0x10] sm:$0xff] %v773_v51  }
  0xc0   : > { %785 = vst [vmem:[%s317_s24 + $0x18] sm:$0xff] %v778_v52  }
  0xc1 PF: > { %s14_s17 = sadd.s32 1, %s857_s17   ;;  %s960_s15 = smov %s853_s16 }
  0xc2   : > { %p11_p5 = scmp.ge.s32.totalorder %s14_s17, 4   ;;  %s961_s16 = smov %s963_s18 }
  0xc4   :  { %13 = sbr.rel (!%p11_p5) target bundleno = 2 (0x2), region = 83 }

// kernel: dvae_clip_forward.36
= control target key start
LH: loop header
LB: loop body
LE: loop exit
PB: predicated region body
PF: predicated region fallthrough
CT: control target
= control target key end

     0   :  { %vm43_vm0 = vcmask 261120   ;;  %s156_s1 = inlined_call_operand.vmem [shape: bf16[32,128], index: 1, kind: input, shape index: {}]   ;;  %s157_s0 = inlined_call_operand.vmem [shape: bf16[16,32], index: 0, kind: input, shape index: {}]   ;;  %s158_s2 = inlined_call_operand.vmem [shape: f32[16,128], index: 2, kind: output, shape index: {}]  }
   0x1   :  { %v121_v0 = vld [vmem:[%s156_s1 + $0x8] sm:$0xff]  ;;  %v120_v1 = vld [vmem:[%s156_s1] sm:$0xff] }
   0x2   :  { %53 = vmatpush.bf16.msra.mxu0 %v121_v0  ;;  %v119_v2 = vld [vmem:[%s157_s0] sm:$0xff] }
   0x6   :  { %54 = vmatpush.bf16.msra.mxu0 %v120_v1 }
   0x9   :  { %118 = vmatmul.msk.bf16.vlgmr.msra.gmra.mxu0 %vm43_vm0, %v119_v2 }
  0x86   :  { %v56_v3 = vpop.f32.mrf.mxu0 }
  0x87   :  { %v70_v4 = vmul.f32 %v56_v3, %v56_v3 }
  0x89   :  { %72 = vadd.xlane.f32.xlu0 %v70_v4 }
  0x8e   :  { %v58_v5 = vpop.f32.mrf.mxu0 }
  0x8f   :  { %v71_v6 = vmul.f32 %v58_v5, %v58_v5 }
  0x91   :  { %74 = vadd.xlane.f32.xlu0 %v71_v6 }
  0xfc   :  { %v73_v7 = vpop.xlane.xlu0 %72 }
  0xfd   :  { %v76_v8 = vmax.f32 %v73_v7, 1e-30 }
  0xff   :  { %122 = vrsqrt.f32 %v76_v8  ;;  %vm84_vm2 = vweird.f32 %v76_v8 }
 0x104   :  { %v75_v9 = vpop.xlane.xlu0 %74 }
 0x105   :  { %v123_v10 = vpop.eup %122  ;;  %v77_v11 = vmax.f32 %v75_v9, 1e-30 }
 0x106   :  { %v79_v12 = vmul.f32 %v123_v10, %v76_v8  ;;  %vm85_vm1 = vweird.f32 %v123_v10 }
 0x107   :  { %124 = vrsqrt.f32 %v77_v11  ;;  %vm86_vm3 = vmor %vm84_vm2, %vm85_vm1  ;;  %vm94_vm5 = vweird.f32 %v77_v11 }
 0x108   :  { %v80_v13 = vmul.f32 %v123_v10, %v79_v12 }
 0x10a   :  { %v81_v14 = vmul.f32 0.5, %v80_v13 }
 0x10c   :  { %v82_v15 = vsub.f32 1.5, %v81_v14 }
 0x10d   :  { %v125_v16 = vpop.eup %124 }
 0x10e   :  { %v83_v17 = vmul.f32 %v123_v10, %v82_v15  ;;  %v89_v18 = vmul.f32 %v125_v16, %v77_v11  ;;  %vm95_vm4 = vweird.f32 %v125_v16 }
 0x10f   :  { %vm96_vm6 = vmor %vm94_vm5, %vm95_vm4 }
 0x110   :  { %v87_v19 = vsel %vm86_vm3, %v123_v10, %v83_v17  ;;  %v90_v20 = vmul.f32 %v125_v16, %v89_v18 }
 0x111   :  { %v98_v21 = vmul.f32 %v87_v19, %v56_v3 }
 0x112   :  { %v91_v22 = vmul.f32 0.5, %v90_v20 }
 0x113   :  { %100 = vst [vmem:[%s158_s2] sm:$0xff] %v98_v21 }
 0x114   :  { %v92_v23 = vsub.f32 1.5, %v91_v22 }
 0x116   :  { %v93_v24 = vmul.f32 %v125_v16, %v92_v23 }
 0x118   :  { %v97_v25 = vsel %vm96_vm6, %v125_v16, %v93_v24 }
 0x119   :  { %v99_v26 = vmul.f32 %v97_v25, %v58_v5 }
 0x11b   :  { %101 = vst [vmem:[%s158_s2 + $0x8] sm:$0xff] %v99_v26 }

// kernel: dvae_clip_forward.37
= control target key start
LH: loop header
LB: loop body
LE: loop exit
PB: predicated region body
PF: predicated region fallthrough
CT: control target
= control target key end

     0   :  { %vm43_vm0 = vcmask 261120   ;;  %s122_s1 = inlined_call_operand.vmem [shape: bf16[32,128], index: 1, kind: input, shape index: {}]   ;;  %s123_s0 = inlined_call_operand.vmem [shape: bf16[16,32], index: 0, kind: input, shape index: {}]   ;;  %s124_s2 = inlined_call_operand.vmem [shape: f32[16,128], index: 2, kind: output, shape index: {}]  }
   0x1   :  { %v91_v0 = vld [vmem:[%s122_s1 + $0x8] sm:$0xff]  ;;  %v90_v1 = vld [vmem:[%s122_s1] sm:$0xff] }
   0x2   :  { %53 = vmatpush.bf16.msra.mxu0 %v91_v0  ;;  %v89_v2 = vld [vmem:[%s123_s0] sm:$0xff] }
   0x6   :  { %54 = vmatpush.bf16.msra.mxu0 %v90_v1 }
   0x9   :  { %88 = vmatmul.msk.bf16.vlgmr.msra.gmra.mxu0 %vm43_vm0, %v89_v2 }
  0x86   :  { %v56_v3 = vpop.f32.mrf.mxu0 }
  0x87   :  { %70 = vst [vmem:[%s124_s2] sm:$0xff] %v56_v3 }
  0x8e   :  { %v58_v4 = vpop.f32.mrf.mxu0 }
  0x8f   :  { %71 = vst [vmem:[%s124_s2 + $0x8] sm:$0xff] %v58_v4 }

</bundles_post_ra>
